<compile_context>
chip_gen: v6e
topology: v6e:2x2x1
jax: 0.10.0
libtpu: 0.0.40
codegen_flags: <defaults>
</compile_context>

<pallas_src>
import numpy as np
import jax
import jax.numpy as jnp
from jax.experimental import pallas as pl
from jax.experimental.pallas import tpu as pltpu


# --------------------------------------------------------------------------
# Weight construction — exact replica of VisMolDiffusion.__init__ / wave()
# --------------------------------------------------------------------------
_A0 = 5.29


def _wave100(a, r):
    y = np.exp(-(a * 2 * r) / _A0) * np.sqrt(a ** 3 / (np.pi * _A0 ** 3))
    return y ** 2


def _wave200(a, r):
    y = (np.exp(-(a * r) / _A0)
         * np.sqrt(a ** 3 / (32 * np.pi * _A0 ** 3))
         * (2 - a * 2 * r / _A0))
    return y ** 2


def _wave(a, r):
    y = _wave100(a, r)
    if a >= 3:
        y += _wave200(a, r)
    return 4 * np.pi * r ** 2 * y


def init_weight(atoms):
    assert len(atoms) == 5
    w = np.zeros((5, 7, 7, 7), dtype=np.float32)
    for ai, a in enumerate(atoms):
        for i in range(7):
            for j in range(7):
                for k in range(7):
                    r = ((i - 3) ** 2 + (j - 3) ** 2 + (k - 3) ** 2) ** 0.5 / 4.0
                    w[ai, i, j, k] = _wave(a, r)
        w[ai, 3, 3, 3] = 1.0
    # torch: weight.unsqueeze(0).expand(5, 5, 7, 7, 7)
    # -> every output channel uses the same per-input-channel filter bank.
    w = np.broadcast_to(w[None], (5, 5, 7, 7, 7)).astype(np.float32).copy()
    return jnp.asarray(w)


# --------------------------------------------------------------------------
# Pallas kernel: one lane-dense MXU matmul per voxel tile.
#   w_ref : (8, K)   bf16, same block every grid step (stays VMEM-resident)
#   p_ref : (K, tm)  bf16, one voxel tile (tm lanes, multiple of 128)
#   o_ref : (8, tm)  f32
# K is fully resident -> no accumulator, no init pl.when, exactly one store.
# --------------------------------------------------------------------------
def _convmm_kernel(w_ref, p_ref, o_ref):
    o_ref[...] = jnp.dot(w_ref[...], p_ref[...],
                         preferred_element_type=jnp.float32)


def _pallas_convmm(wmat, patches_t, tm):
    n_sub, Kdim = wmat.shape
    _, Mp = patches_t.shape
    grid = (Mp // tm,)
    return pl.pallas_call(
        _convmm_kernel,
        out_shape=jax.ShapeDtypeStruct((n_sub, Mp), jnp.float32),
        grid_spec=pltpu.PrefetchScalarGridSpec(
            num_scalar_prefetch=0,
            grid=grid,
            in_specs=[
                # weight tile: constant block index -> fetched once, resident.
                # (8, Kdim) is legal unpadded: last dim equals full array dim.
                pl.BlockSpec((n_sub, Kdim), lambda i: (0, 0)),
                # voxel tile: full (unpadded) K, tm lanes.
                # (Kdim, tm): second-to-last dim equals full array dim.
                pl.BlockSpec((Kdim, tm), lambda i: (0, i)),
            ],
            out_specs=pl.BlockSpec((n_sub, tm), lambda i: (0, i)),
        ),
        compiler_params=pltpu.CompilerParams(
            # single M axis, independent tiles -> shards across v7x's 2 TCs
            dimension_semantics=("parallel",),
            # real double-buffered footprint ~3.7 MiB; 8 MiB leaves headroom
            # while keeping scoped VMEM free for surrounding fusions.
            vmem_limit_bytes=8 * 1024 * 1024,
        ),
    )(wmat, patches_t)


# --------------------------------------------------------------------------
# Forward: F.conv3d(x, weight, padding=(3,3,3)) via transposed im2col matmul.
# --------------------------------------------------------------------------
def vismol_forward(x, weight, tm=512):
    N, C, D, H, W = x.shape
    O = weight.shape[0]
    Kk, pad = 7, 3
    Kdim = C * Kk ** 3                       # 5 * 343 = 1715 (unpadded)

    M = N * D * H * W                        # output voxels (lane dimension)
    tm = min(tm, pl.cdiv(M, 128) * 128)      # don't exceed (padded) M
    assert tm % 128 == 0 and tm >= 128
    Mp = pl.cdiv(M, tm) * tm

    # --- im2col glue (pure JAX, bf16), channel axis hoisted BEFORE the
    #     343-tap expansion so only the tiny input is transposed and the
    #     final (K, M) view needs no copy.
    xb = jnp.transpose(x.astype(jnp.bfloat16), (1, 0, 2, 3, 4))   # (C,N,D,H,W)
    xp = jnp.pad(xb, ((0, 0), (0, 0), (pad, pad), (pad, pad), (pad, pad)))
    cols = [xp[:, :, kd:kd + D, kh:kh + H, kw:kw + W]
            for kd in range(Kk) for kh in range(Kk) for kw in range(Kk)]
    patches = jnp.stack(cols, axis=1)                    # (C, 343, N, D, H, W)
    patches_t = patches.reshape(Kdim, M)                 # no-copy view
    if Mp != M:
        patches_t = jnp.pad(patches_t, ((0, 0), (0, Mp - M)))

    # --- weight matrix: (O, K) rows padded to 8 sublanes; K left unpadded.
    # (All O rows are identical by construction of the module, but since O
    #  occupies the sublane dim this generality costs nothing.)
    wmat = weight.reshape(O, Kdim).astype(jnp.bfloat16)
    wmat = jnp.pad(wmat, ((0, 8 - O), (0, 0)))            # (8, Kdim)

    out_t = _pallas_convmm(wmat, patches_t, tm)           # (8, Mp) f32
    out = out_t[:O, :M].reshape(O, N, D, H, W)
    out = out.transpose(1, 0, 2, 3, 4)                    # -> NCDHW
    return out


# --------------------------------------------------------------------------
if __name__ == "__main__":
    atoms = [1, 3, 6, 7, 8]              # e.g. H, Li, C, N, O
    weight = init_weight(atoms)          # (5, 5, 7, 7, 7)

    key = jax.random.PRNGKey(0)
    # small NCDHW input consistent with the module: batch=2, channels=5, 8^3 grid
    x = jax.random.normal(key, (2, 5, 8, 8, 8), dtype=jnp.float32)

    fwd = jax.jit(vismol_forward)
    out = fwd(x, weight)
    out = jax.block_until_ready(out)
    assert out.shape == (2, 5, 8, 8, 8)

    # sanity check against XLA's native conv3d on the same bf16-rounded
    # operands (the kernel uses bf16 inputs with f32 accumulation)
    xq = x.astype(jnp.bfloat16).astype(jnp.float32)
    wq = weight.astype(jnp.bfloat16).astype(jnp.float32)
    ref = jax.lax.conv_general_dilated(
        xq, wq,
        window_strides=(1, 1, 1),
        padding=((3, 3), (3, 3), (3, 3)),
        dimension_numbers=("NCDHW", "OIDHW", "NCDHW"))
    ref = jax.block_until_ready(ref)
    np.testing.assert_allclose(np.asarray(out), np.asarray(ref),
                               rtol=2e-2, atol=2e-3)

    print("KERNEL_OK")
</pallas_src>

<mosaic_0001>
module attributes {stable_mosaic.version = 11 : i64} {
  func.func @_convmm_kernel(%arg0: i32, %arg1: memref<8x1715xbf16, #tpu.memory_space<vmem>>, %arg2: memref<1715x512xbf16, #tpu.memory_space<vmem>>, %arg3: memref<8x512xf32, #tpu.memory_space<vmem>>) attributes {dimension_semantics = [#tpu.dimension_semantics<parallel>], iteration_bounds = array<i64: 2>, scalar_prefetch = 0 : i64, scratch_operands = 0 : i64, tpu.core_type = #tpu.core_type<tc>, window_params = [{pipeline_mode = #tpu.pipeline_mode<synchronous>, transform_indices = @transform_0, window_bounds = array<i64: 8, 1715>}, {transform_indices = @transform_1, window_bounds = array<i64: 1715, 512>}, {transform_indices = @transform_2, window_bounds = array<i64: 8, 512>}]} {
    %c0 = arith.constant 0 : index
    %c0_0 = arith.constant 0 : index
    %0 = vector.load %arg1[%c0, %c0_0] : memref<8x1715xbf16, #tpu.memory_space<vmem>>, vector<8x1715xbf16>
    %c0_1 = arith.constant 0 : index
    %c0_2 = arith.constant 0 : index
    %1 = vector.load %arg2[%c0_1, %c0_2] : memref<1715x512xbf16, #tpu.memory_space<vmem>>, vector<1715x512xbf16>
    %cst = arith.constant dense<0.000000e+00> : vector<8x512xf32>
    %2 = tpu.matmul %0, %1, %cst {dimension_numbers = #tpu.dot_dimension_numbers<[1], [0], [0], [1], [0, 0, 1, 1], [], []>} : vector<8x1715xbf16>, vector<1715x512xbf16>, vector<8x512xf32> -> vector<8x512xf32>
    %c0_3 = arith.constant 0 : index
    %c0_4 = arith.constant 0 : index
    %3 = vector.load %arg3[%c0_3, %c0_4] : memref<8x512xf32, #tpu.memory_space<vmem>>, vector<8x512xf32>
    tpu.vector_store %arg3[%c0_3, %c0_4], %2 {strides = array<i32>} : memref<8x512xf32, #tpu.memory_space<vmem>>, vector<8x512xf32>,
    return
  }
  func.func @transform_0(%arg0: i32) -> (i32, i32) {
    %c0_i32 = arith.constant 0 : i32
    %c0_i32_0 = arith.constant 0 : i32
    %c0_i32_1 = arith.constant 0 : i32
    return %c0_i32, %c0_i32_0 : i32, i32
  }
  func.func @transform_1(%arg0: i32) -> (i32, i32) {
    %c0_i32 = arith.constant 0 : i32
    %c0_i32_0 = arith.constant 0 : i32
    return %c0_i32, %arg0 : i32, i32
  }
  func.func @transform_2(%arg0: i32) -> (i32, i32) {
    %c0_i32 = arith.constant 0 : i32
    %c0_i32_0 = arith.constant 0 : i32
    return %c0_i32, %arg0 : i32, i32
  }
}

</mosaic_0001>

<bundles_post_ra>
// kernel: vismol_forward.1
= control target key start
LH: loop header
LB: loop body
LE: loop exit
PB: predicated region body
PF: predicated region fallthrough
CT: control target
= control target key end

     0   :  { %s5507_s9 = smov 0   ;;  %s5509_s10 = smov 0   ;;  %s7012_s0 = inlined_call_operand.vmem [shape: bf16[8,1715], index: 0, kind: input, shape index: {}]   ;;  %s7013_s1 = inlined_call_operand.vmem [shape: bf16[1715,1024], index: 1, kind: input, shape index: {}]   ;;  %s7014_s2 = inlined_call_operand.vmem [shape: f32[8,1024], index: 2, kind: output, shape index: {}]  }
   0x1   :  { %s5511_s11 = smov 0  }
   0x2 LB: > { %s4320_s12 = sadd.s32 4294967295, %s5489_s11   ;;  %s5524_s13 = sadd.s32 1, %s5489_s11   ;;  %s5489_s11 = sphi %s5511_s11, %s7017_s11   ;;  %s5485_s10 = sphi %s5509_s10, %s7016_s10   ;;  %s5481_s9 = sphi %s5507_s9, %s7015_s9  }
   0x3   : > { %s37_s14 = ssub.s32 %s5489_s11, %s5524_s13  ;;  %s40_s15 = sadd.s32 1, %s5485_s10 }
   0x4   : > { %p38_p0 = scmp.eq.s32.totalorder %s37_s14, 0  ;;  %p47_p1 = scmp.ne.s32.totalorder %s5485_s10, %s5481_s9 }
   0x5   : > { %p48_p2 = scmp.eq.s32.totalorder %s5489_s11, 0  ;;  %p4323_p4 = scmp.ge.s32.totalorder %s5489_s11, 2 }
   0x6   : > { %s5533_s16 = scalar_select %p38_p0, %s5485_s10, %s40_s15  }
   0x7   : > { %p49_p3 = por %p48_p2, %p47_p1  ;;  %102 = sbr.rel (%p4323_p4) target bundleno = 231 (0xe7), region = 20 }
   0xc   : > { %105 = sbr.rel (!%p49_p3) target bundleno = 231 (0xe7), region = 24  ;;  %s107_s17 = sand.u32 (%p49_p3), 1, %s5485_s10  }
   0xd   : > { %s4779_s18 = sshll.u32 (%p49_p3), %s5489_s11, 4  ;;  %s4780_s19 = smul.u32 (%p49_p3), 3440, %s107_s17 }
   0xe   : > { %s5541_s22 = scalar_lea.vmem (%p49_p3), %s7013_s1, %s4779_s18 }
   0xf   : > { %v125_v0 = vld [vmem:[%s5541_s22] sm:$0xff] (%p49_p3)  ;;  %v127_v1 = vld [vmem:[%s5541_s22 + $0x8] sm:$0xff] (%p49_p3)  ;;  %s5549_s23 = scalar_lea.vmem (%p49_p3), [#allocation2], %s4780_s19 }
  0x10   : > { %v129_v2 = vld [vmem:[%s5541_s22 + $0x20] sm:$0xff] (%p49_p3)  ;;  %v131_v3 = vld [vmem:[%s5541_s22 + $0x28] sm:$0xff] (%p49_p3)  ;;  %126 = vst [vmem:[%s5549_s23] sm:$0xff] (%p49_p3), %v125_v0  ;;  %128 = vst [vmem:[%s5549_s23 + $0x8] sm:$0xff] (%p49_p3), %v127_v1 }
  0x11   : > { %v133_v4 = vld [vmem:[%s5541_s22 + $0x40] sm:$0xff]  ;;  %v135_v5 = vld [vmem:[%s5541_s22 + $0x48] sm:$0xff]  ;;  %130 = vst [vmem:[%s5549_s23 + $0x10] sm:$0xff] %v129_v2  ;;  %132 = vst [vmem:[%s5549_s23 + $0x18] sm:$0xff] %v131_v3 }
  0x12   : > { %134 = vst [vmem:[%s5549_s23 + $0x20] sm:$0xff] %v133_v4  ;;  %136 = vst [vmem:[%s5549_s23 + $0x28] sm:$0xff] %v135_v5  ;;  %v137_v6 = vld [vmem:[%s5541_s22 + $0x60] sm:$0xff]  ;;  %v139_v7 = vld [vmem:[%s5541_s22 + $0x68] sm:$0xff] }
  0x13   : > { %v141_v8 = vld [vmem:[%s5541_s22 + $0x80] sm:$0xff]  ;;  %138 = vst [vmem:[%s5549_s23 + $0x30] sm:$0xff] %v137_v6  ;;  %140 = vst [vmem:[%s5549_s23 + $0x38] sm:$0xff] %v139_v7  ;;  %v143_v9 = vld [vmem:[%s5541_s22 + $0x88] sm:$0xff] }
  0x14   : > { %142 = vst [vmem:[%s5549_s23 + $0x40] sm:$0xff] %v141_v8  ;;  %v145_v10 = vld [vmem:[%s5541_s22 + $0xa0] sm:$0xff]  ;;  %v147_v11 = vld [vmem:[%s5541_s22 + $0xa8] sm:$0xff]  ;;  %144 = vst [vmem:[%s5549_s23 + $0x48] sm:$0xff] %v143_v9 }
  0x15   : > { %146 = vst [vmem:[%s5549_s23 + $0x50] sm:$0xff] %v145_v10  ;;  %148 = vst [vmem:[%s5549_s23 + $0x58] sm:$0xff] %v147_v11  ;;  %v149_v12 = vld [vmem:[%s5541_s22 + $0xc0] sm:$0xff]  ;;  %v151_v13 = vld [vmem:[%s5541_s22 + $0xc8] sm:$0xff] }
  0x16   : > { %v153_v14 = vld [vmem:[%s5541_s22 + $0xe0] sm:$0xff]  ;;  %150 = vst [vmem:[%s5549_s23 + $0x60] sm:$0xff] %v149_v12  ;;  %152 = vst [vmem:[%s5549_s23 + $0x68] sm:$0xff] %v151_v13  ;;  %v155_v15 = vld [vmem:[%s5541_s22 + $0xe8] sm:$0xff] }
  0x17   : > { %154 = vst [vmem:[%s5549_s23 + $0x70] sm:$0xff] %v153_v14  ;;  %v157_v16 = vld [vmem:[%s5541_s22 + $0x100] sm:$0xff]  ;;  %v159_v17 = vld [vmem:[%s5541_s22 + $0x108] sm:$0xff]  ;;  %156 = vst [vmem:[%s5549_s23 + $0x78] sm:$0xff] %v155_v15 }
  0x18   : > { %158 = vst [vmem:[%s5549_s23 + $0x80] sm:$0xff] %v157_v16  ;;  %160 = vst [vmem:[%s5549_s23 + $0x88] sm:$0xff] %v159_v17  ;;  %v161_v18 = vld [vmem:[%s5541_s22 + $0x120] sm:$0xff]  ;;  %v163_v19 = vld [vmem:[%s5541_s22 + $0x128] sm:$0xff] }
  0x19   : > { %v165_v20 = vld [vmem:[%s5541_s22 + $0x140] sm:$0xff]  ;;  %162 = vst [vmem:[%s5549_s23 + $0x90] sm:$0xff] %v161_v18  ;;  %164 = vst [vmem:[%s5549_s23 + $0x98] sm:$0xff] %v163_v19  ;;  %v167_v21 = vld [vmem:[%s5541_s22 + $0x148] sm:$0xff] }
  0x1a   : > { %166 = vst [vmem:[%s5549_s23 + $0xa0] sm:$0xff] %v165_v20  ;;  %v169_v22 = vld [vmem:[%s5541_s22 + $0x160] sm:$0xff]  ;;  %v171_v23 = vld [vmem:[%s5541_s22 + $0x168] sm:$0xff]  ;;  %168 = vst [vmem:[%s5549_s23 + $0xa8] sm:$0xff] %v167_v21 }
  0x1b   : > { %170 = vst [vmem:[%s5549_s23 + $0xb0] sm:$0xff] %v169_v22  ;;  %172 = vst [vmem:[%s5549_s23 + $0xb8] sm:$0xff] %v171_v23  ;;  %v173_v24 = vld [vmem:[%s5541_s22 + $0x180] sm:$0xff]  ;;  %v175_v25 = vld [vmem:[%s5541_s22 + $0x188] sm:$0xff] }
  0x1c   : > { %v177_v26 = vld [vmem:[%s5541_s22 + $0x1a0] sm:$0xff]  ;;  %174 = vst [vmem:[%s5549_s23 + $0xc0] sm:$0xff] %v173_v24  ;;  %176 = vst [vmem:[%s5549_s23 + $0xc8] sm:$0xff] %v175_v25  ;;  %v179_v27 = vld [vmem:[%s5541_s22 + $0x1a8] sm:$0xff] }
  0x1d   : > { %178 = vst [vmem:[%s5549_s23 + $0xd0] sm:$0xff] %v177_v26  ;;  %v181_v28 = vld [vmem:[%s5541_s22 + $0x1c0] sm:$0xff]  ;;  %v183_v29 = vld [vmem:[%s5541_s22 + $0x1c8] sm:$0xff]  ;;  %180 = vst [vmem:[%s5549_s23 + $0xd8] sm:$0xff] %v179_v27 }
  0x1e   : > { %182 = vst [vmem:[%s5549_s23 + $0xe0] sm:$0xff] %v181_v28  ;;  %184 = vst [vmem:[%s5549_s23 + $0xe8] sm:$0xff] %v183_v29  ;;  %v185_v30 = vld [vmem:[%s5541_s22 + $0x1e0] sm:$0xff]  ;;  %v187_v31 = vld [vmem:[%s5541_s22 + $0x1e8] sm:$0xff] }
  0x1f   : > { %v189_v32 = vld [vmem:[%s5541_s22 + $0x200] sm:$0xff]  ;;  %186 = vst [vmem:[%s5549_s23 + $0xf0] sm:$0xff] %v185_v30  ;;  %188 = vst [vmem:[%s5549_s23 + $0xf8] sm:$0xff] %v187_v31  ;;  %v191_v33 = vld [vmem:[%s5541_s22 + $0x208] sm:$0xff] }
  0x20   : > { %190 = vst [vmem:[%s5549_s23 + $0x100] sm:$0xff] %v189_v32  ;;  %v193_v34 = vld [vmem:[%s5541_s22 + $0x220] sm:$0xff]  ;;  %v195_v35 = vld [vmem:[%s5541_s22 + $0x228] sm:$0xff]  ;;  %192 = vst [vmem:[%s5549_s23 + $0x108] sm:$0xff] %v191_v33 }
  0x21   : > { %194 = vst [vmem:[%s5549_s23 + $0x110] sm:$0xff] %v193_v34  ;;  %196 = vst [vmem:[%s5549_s23 + $0x118] sm:$0xff] %v195_v35  ;;  %v197_v36 = vld [vmem:[%s5541_s22 + $0x240] sm:$0xff]  ;;  %v199_v37 = vld [vmem:[%s5541_s22 + $0x248] sm:$0xff] }
  0x22   : > { %v201_v38 = vld [vmem:[%s5541_s22 + $0x260] sm:$0xff]  ;;  %198 = vst [vmem:[%s5549_s23 + $0x120] sm:$0xff] %v197_v36  ;;  %200 = vst [vmem:[%s5549_s23 + $0x128] sm:$0xff] %v199_v37  ;;  %v203_v39 = vld [vmem:[%s5541_s22 + $0x268] sm:$0xff] }
  0x23   : > { %202 = vst [vmem:[%s5549_s23 + $0x130] sm:$0xff] %v201_v38  ;;  %v205_v40 = vld [vmem:[%s5541_s22 + $0x280] sm:$0xff]  ;;  %v207_v41 = vld [vmem:[%s5541_s22 + $0x288] sm:$0xff]  ;;  %204 = vst [vmem:[%s5549_s23 + $0x138] sm:$0xff] %v203_v39 }
  0x24   : > { %206 = vst [vmem:[%s5549_s23 + $0x140] sm:$0xff] %v205_v40  ;;  %208 = vst [vmem:[%s5549_s23 + $0x148] sm:$0xff] %v207_v41  ;;  %v209_v42 = vld [vmem:[%s5541_s22 + $0x2a0] sm:$0xff]  ;;  %v211_v43 = vld [vmem:[%s5541_s22 + $0x2a8] sm:$0xff] }
  0x25   : > { %v213_v44 = vld [vmem:[%s5541_s22 + $0x2c0] sm:$0xff]  ;;  %210 = vst [vmem:[%s5549_s23 + $0x150] sm:$0xff] %v209_v42  ;;  %212 = vst [vmem:[%s5549_s23 + $0x158] sm:$0xff] %v211_v43  ;;  %v215_v45 = vld [vmem:[%s5541_s22 + $0x2c8] sm:$0xff] }
  0x26   : > { %214 = vst [vmem:[%s5549_s23 + $0x160] sm:$0xff] %v213_v44  ;;  %v217_v46 = vld [vmem:[%s5541_s22 + $0x2e0] sm:$0xff]  ;;  %v219_v47 = vld [vmem:[%s5541_s22 + $0x2e8] sm:$0xff]  ;;  %216 = vst [vmem:[%s5549_s23 + $0x168] sm:$0xff] %v215_v45 }
  0x27   : > { %218 = vst [vmem:[%s5549_s23 + $0x170] sm:$0xff] %v217_v46  ;;  %220 = vst [vmem:[%s5549_s23 + $0x178] sm:$0xff] %v219_v47  ;;  %v221_v48 = vld [vmem:[%s5541_s22 + $0x300] sm:$0xff]  ;;  %v223_v49 = vld [vmem:[%s5541_s22 + $0x308] sm:$0xff] }
  0x28   : > { %v225_v50 = vld [vmem:[%s5541_s22 + $0x320] sm:$0xff]  ;;  %222 = vst [vmem:[%s5549_s23 + $0x180] sm:$0xff] %v221_v48  ;;  %224 = vst [vmem:[%s5549_s23 + $0x188] sm:$0xff] %v223_v49  ;;  %v227_v51 = vld [vmem:[%s5541_s22 + $0x328] sm:$0xff] }
  0x29   : > { %226 = vst [vmem:[%s5549_s23 + $0x190] sm:$0xff] %v225_v50  ;;  %v229_v52 = vld [vmem:[%s5541_s22 + $0x340] sm:$0xff]  ;;  %v231_v53 = vld [vmem:[%s5541_s22 + $0x348] sm:$0xff]  ;;  %228 = vst [vmem:[%s5549_s23 + $0x198] sm:$0xff] %v227_v51 }
  0x2a   : > { %230 = vst [vmem:[%s5549_s23 + $0x1a0] sm:$0xff] %v229_v52  ;;  %232 = vst [vmem:[%s5549_s23 + $0x1a8] sm:$0xff] %v231_v53  ;;  %v233_v54 = vld [vmem:[%s5541_s22 + $0x360] sm:$0xff]  ;;  %v235_v55 = vld [vmem:[%s5541_s22 + $0x368] sm:$0xff] }
  0x2b   : > { %v237_v56 = vld [vmem:[%s5541_s22 + $0x380] sm:$0xff]  ;;  %234 = vst [vmem:[%s5549_s23 + $0x1b0] sm:$0xff] %v233_v54  ;;  %236 = vst [vmem:[%s5549_s23 + $0x1b8] sm:$0xff] %v235_v55  ;;  %v239_v57 = vld [vmem:[%s5541_s22 + $0x388] sm:$0xff] }
  0x2c   : > { %238 = vst [vmem:[%s5549_s23 + $0x1c0] sm:$0xff] %v237_v56  ;;  %v241_v58 = vld [vmem:[%s5541_s22 + $0x3a0] sm:$0xff]  ;;  %v243_v59 = vld [vmem:[%s5541_s22 + $0x3a8] sm:$0xff]  ;;  %240 = vst [vmem:[%s5549_s23 + $0x1c8] sm:$0xff] %v239_v57 }
  0x2d   : > { %242 = vst [vmem:[%s5549_s23 + $0x1d0] sm:$0xff] %v241_v58  ;;  %244 = vst [vmem:[%s5549_s23 + $0x1d8] sm:$0xff] %v243_v59  ;;  %v245_v60 = vld [vmem:[%s5541_s22 + $0x3c0] sm:$0xff]  ;;  %v247_v61 = vld [vmem:[%s5541_s22 + $0x3c8] sm:$0xff] }
  0x2e   : > { %v249_v62 = vld [vmem:[%s5541_s22 + $0x3e0] sm:$0xff]  ;;  %246 = vst [vmem:[%s5549_s23 + $0x1e0] sm:$0xff] %v245_v60  ;;  %248 = vst [vmem:[%s5549_s23 + $0x1e8] sm:$0xff] %v247_v61  ;;  %v251_v63 = vld [vmem:[%s5541_s22 + $0x3e8] sm:$0xff] }
  0x2f   : > { %250 = vst [vmem:[%s5549_s23 + $0x1f0] sm:$0xff] %v249_v62  ;;  %v253_v0 = vld [vmem:[%s5541_s22 + $0x400] sm:$0xff]  ;;  %v255_v1 = vld [vmem:[%s5541_s22 + $0x408] sm:$0xff]  ;;  %252 = vst [vmem:[%s5549_s23 + $0x1f8] sm:$0xff] %v251_v63 }
  0x30   : > { %254 = vst [vmem:[%s5549_s23 + $0x200] sm:$0xff] %v253_v0  ;;  %256 = vst [vmem:[%s5549_s23 + $0x208] sm:$0xff] %v255_v1  ;;  %v257_v2 = vld [vmem:[%s5541_s22 + $0x420] sm:$0xff]  ;;  %v259_v3 = vld [vmem:[%s5541_s22 + $0x428] sm:$0xff] }
  0x31   : > { %v261_v4 = vld [vmem:[%s5541_s22 + $0x440] sm:$0xff]  ;;  %258 = vst [vmem:[%s5549_s23 + $0x210] sm:$0xff] %v257_v2  ;;  %260 = vst [vmem:[%s5549_s23 + $0x218] sm:$0xff] %v259_v3  ;;  %v263_v5 = vld [vmem:[%s5541_s22 + $0x448] sm:$0xff] }
  0x32   : > { %262 = vst [vmem:[%s5549_s23 + $0x220] sm:$0xff] %v261_v4  ;;  %v265_v6 = vld [vmem:[%s5541_s22 + $0x460] sm:$0xff]  ;;  %v267_v7 = vld [vmem:[%s5541_s22 + $0x468] sm:$0xff]  ;;  %264 = vst [vmem:[%s5549_s23 + $0x228] sm:$0xff] %v263_v5 }
  0x33   : > { %266 = vst [vmem:[%s5549_s23 + $0x230] sm:$0xff] %v265_v6  ;;  %268 = vst [vmem:[%s5549_s23 + $0x238] sm:$0xff] %v267_v7  ;;  %v269_v8 = vld [vmem:[%s5541_s22 + $0x480] sm:$0xff]  ;;  %v271_v9 = vld [vmem:[%s5541_s22 + $0x488] sm:$0xff] }
  0x34   : > { %v273_v10 = vld [vmem:[%s5541_s22 + $0x4a0] sm:$0xff]  ;;  %270 = vst [vmem:[%s5549_s23 + $0x240] sm:$0xff] %v269_v8  ;;  %272 = vst [vmem:[%s5549_s23 + $0x248] sm:$0xff] %v271_v9  ;;  %v275_v11 = vld [vmem:[%s5541_s22 + $0x4a8] sm:$0xff] }
  0x35   : > { %274 = vst [vmem:[%s5549_s23 + $0x250] sm:$0xff] %v273_v10  ;;  %v277_v12 = vld [vmem:[%s5541_s22 + $0x4c0] sm:$0xff]  ;;  %v279_v13 = vld [vmem:[%s5541_s22 + $0x4c8] sm:$0xff]  ;;  %276 = vst [vmem:[%s5549_s23 + $0x258] sm:$0xff] %v275_v11 }
  0x36   : > { %278 = vst [vmem:[%s5549_s23 + $0x260] sm:$0xff] %v277_v12  ;;  %280 = vst [vmem:[%s5549_s23 + $0x268] sm:$0xff] %v279_v13  ;;  %v281_v14 = vld [vmem:[%s5541_s22 + $0x4e0] sm:$0xff]  ;;  %v283_v15 = vld [vmem:[%s5541_s22 + $0x4e8] sm:$0xff] }
  0x37   : > { %v285_v16 = vld [vmem:[%s5541_s22 + $0x500] sm:$0xff]  ;;  %282 = vst [vmem:[%s5549_s23 + $0x270] sm:$0xff] %v281_v14  ;;  %284 = vst [vmem:[%s5549_s23 + $0x278] sm:$0xff] %v283_v15  ;;  %v287_v17 = vld [vmem:[%s5541_s22 + $0x508] sm:$0xff] }
  0x38   : > { %286 = vst [vmem:[%s5549_s23 + $0x280] sm:$0xff] %v285_v16  ;;  %v289_v18 = vld [vmem:[%s5541_s22 + $0x520] sm:$0xff]  ;;  %v291_v19 = vld [vmem:[%s5541_s22 + $0x528] sm:$0xff]  ;;  %288 = vst [vmem:[%s5549_s23 + $0x288] sm:$0xff] %v287_v17 }
  0x39   : > { %290 = vst [vmem:[%s5549_s23 + $0x290] sm:$0xff] %v289_v18  ;;  %292 = vst [vmem:[%s5549_s23 + $0x298] sm:$0xff] %v291_v19  ;;  %v293_v20 = vld [vmem:[%s5541_s22 + $0x540] sm:$0xff]  ;;  %v295_v21 = vld [vmem:[%s5541_s22 + $0x548] sm:$0xff] }
  0x3a   : > { %v297_v22 = vld [vmem:[%s5541_s22 + $0x560] sm:$0xff]  ;;  %294 = vst [vmem:[%s5549_s23 + $0x2a0] sm:$0xff] %v293_v20  ;;  %296 = vst [vmem:[%s5549_s23 + $0x2a8] sm:$0xff] %v295_v21  ;;  %v299_v23 = vld [vmem:[%s5541_s22 + $0x568] sm:$0xff] }
  0x3b   : > { %298 = vst [vmem:[%s5549_s23 + $0x2b0] sm:$0xff] %v297_v22  ;;  %v301_v24 = vld [vmem:[%s5541_s22 + $0x580] sm:$0xff]  ;;  %v303_v25 = vld [vmem:[%s5541_s22 + $0x588] sm:$0xff]  ;;  %300 = vst [vmem:[%s5549_s23 + $0x2b8] sm:$0xff] %v299_v23 }
  0x3c   : > { %302 = vst [vmem:[%s5549_s23 + $0x2c0] sm:$0xff] %v301_v24  ;;  %304 = vst [vmem:[%s5549_s23 + $0x2c8] sm:$0xff] %v303_v25  ;;  %v305_v26 = vld [vmem:[%s5541_s22 + $0x5a0] sm:$0xff]  ;;  %v307_v27 = vld [vmem:[%s5541_s22 + $0x5a8] sm:$0xff] }
  0x3d   : > { %v309_v28 = vld [vmem:[%s5541_s22 + $0x5c0] sm:$0xff]  ;;  %306 = vst [vmem:[%s5549_s23 + $0x2d0] sm:$0xff] %v305_v26  ;;  %308 = vst [vmem:[%s5549_s23 + $0x2d8] sm:$0xff] %v307_v27  ;;  %v311_v29 = vld [vmem:[%s5541_s22 + $0x5c8] sm:$0xff] }
  0x3e   : > { %310 = vst [vmem:[%s5549_s23 + $0x2e0] sm:$0xff] %v309_v28  ;;  %v313_v30 = vld [vmem:[%s5541_s22 + $0x5e0] sm:$0xff]  ;;  %v315_v31 = vld [vmem:[%s5541_s22 + $0x5e8] sm:$0xff]  ;;  %312 = vst [vmem:[%s5549_s23 + $0x2e8] sm:$0xff] %v311_v29 }
  0x3f   : > { %314 = vst [vmem:[%s5549_s23 + $0x2f0] sm:$0xff] %v313_v30  ;;  %316 = vst [vmem:[%s5549_s23 + $0x2f8] sm:$0xff] %v315_v31  ;;  %v317_v32 = vld [vmem:[%s5541_s22 + $0x600] sm:$0xff]  ;;  %v319_v33 = vld [vmem:[%s5541_s22 + $0x608] sm:$0xff] }
  0x40   : > { %v321_v34 = vld [vmem:[%s5541_s22 + $0x620] sm:$0xff]  ;;  %318 = vst [vmem:[%s5549_s23 + $0x300] sm:$0xff] %v317_v32  ;;  %320 = vst [vmem:[%s5549_s23 + $0x308] sm:$0xff] %v319_v33  ;;  %v323_v35 = vld [vmem:[%s5541_s22 + $0x628] sm:$0xff] }
  0x41   : > { %322 = vst [vmem:[%s5549_s23 + $0x310] sm:$0xff] %v321_v34  ;;  %v325_v36 = vld [vmem:[%s5541_s22 + $0x640] sm:$0xff]  ;;  %v327_v37 = vld [vmem:[%s5541_s22 + $0x648] sm:$0xff]  ;;  %324 = vst [vmem:[%s5549_s23 + $0x318] sm:$0xff] %v323_v35 }
  0x42   : > { %326 = vst [vmem:[%s5549_s23 + $0x320] sm:$0xff] %v325_v36  ;;  %328 = vst [vmem:[%s5549_s23 + $0x328] sm:$0xff] %v327_v37  ;;  %v329_v38 = vld [vmem:[%s5541_s22 + $0x660] sm:$0xff]  ;;  %v331_v39 = vld [vmem:[%s5541_s22 + $0x668] sm:$0xff] }
  0x43   : > { %v333_v40 = vld [vmem:[%s5541_s22 + $0x680] sm:$0xff]  ;;  %330 = vst [vmem:[%s5549_s23 + $0x330] sm:$0xff] %v329_v38  ;;  %332 = vst [vmem:[%s5549_s23 + $0x338] sm:$0xff] %v331_v39  ;;  %v335_v41 = vld [vmem:[%s5541_s22 + $0x688] sm:$0xff] }
  0x44   : > { %334 = vst [vmem:[%s5549_s23 + $0x340] sm:$0xff] %v333_v40  ;;  %v337_v42 = vld [vmem:[%s5541_s22 + $0x6a0] sm:$0xff]  ;;  %v339_v43 = vld [vmem:[%s5541_s22 + $0x6a8] sm:$0xff]  ;;  %336 = vst [vmem:[%s5549_s23 + $0x348] sm:$0xff] %v335_v41 }
  0x45   : > { %338 = vst [vmem:[%s5549_s23 + $0x350] sm:$0xff] %v337_v42  ;;  %340 = vst [vmem:[%s5549_s23 + $0x358] sm:$0xff] %v339_v43  ;;  %v341_v44 = vld [vmem:[%s5541_s22 + $0x6c0] sm:$0xff]  ;;  %v343_v45 = vld [vmem:[%s5541_s22 + $0x6c8] sm:$0xff] }
  0x46   : > { %v345_v46 = vld [vmem:[%s5541_s22 + $0x6e0] sm:$0xff]  ;;  %342 = vst [vmem:[%s5549_s23 + $0x360] sm:$0xff] %v341_v44  ;;  %344 = vst [vmem:[%s5549_s23 + $0x368] sm:$0xff] %v343_v45  ;;  %v347_v47 = vld [vmem:[%s5541_s22 + $0x6e8] sm:$0xff] }
  0x47   : > { %346 = vst [vmem:[%s5549_s23 + $0x370] sm:$0xff] %v345_v46  ;;  %v349_v48 = vld [vmem:[%s5541_s22 + $0x700] sm:$0xff]  ;;  %v351_v49 = vld [vmem:[%s5541_s22 + $0x708] sm:$0xff]  ;;  %348 = vst [vmem:[%s5549_s23 + $0x378] sm:$0xff] %v347_v47 }
  0x48   : > { %350 = vst [vmem:[%s5549_s23 + $0x380] sm:$0xff] %v349_v48  ;;  %352 = vst [vmem:[%s5549_s23 + $0x388] sm:$0xff] %v351_v49  ;;  %v353_v50 = vld [vmem:[%s5541_s22 + $0x720] sm:$0xff]  ;;  %v355_v51 = vld [vmem:[%s5541_s22 + $0x728] sm:$0xff] }
  0x49   : > { %v357_v52 = vld [vmem:[%s5541_s22 + $0x740] sm:$0xff]  ;;  %354 = vst [vmem:[%s5549_s23 + $0x390] sm:$0xff] %v353_v50  ;;  %356 = vst [vmem:[%s5549_s23 + $0x398] sm:$0xff] %v355_v51  ;;  %v359_v53 = vld [vmem:[%s5541_s22 + $0x748] sm:$0xff] }
  0x4a   : > { %358 = vst [vmem:[%s5549_s23 + $0x3a0] sm:$0xff] %v357_v52  ;;  %v361_v54 = vld [vmem:[%s5541_s22 + $0x760] sm:$0xff]  ;;  %v363_v55 = vld [vmem:[%s5541_s22 + $0x768] sm:$0xff]  ;;  %360 = vst [vmem:[%s5549_s23 + $0x3a8] sm:$0xff] %v359_v53 }
  0x4b   : > { %362 = vst [vmem:[%s5549_s23 + $0x3b0] sm:$0xff] %v361_v54  ;;  %364 = vst [vmem:[%s5549_s23 + $0x3b8] sm:$0xff] %v363_v55  ;;  %v365_v56 = vld [vmem:[%s5541_s22 + $0x780] sm:$0xff]  ;;  %v367_v57 = vld [vmem:[%s5541_s22 + $0x788] sm:$0xff] }
  0x4c   : > { %v369_v58 = vld [vmem:[%s5541_s22 + $0x7a0] sm:$0xff]  ;;  %366 = vst [vmem:[%s5549_s23 + $0x3c0] sm:$0xff] %v365_v56  ;;  %368 = vst [vmem:[%s5549_s23 + $0x3c8] sm:$0xff] %v367_v57  ;;  %v371_v59 = vld [vmem:[%s5541_s22 + $0x7a8] sm:$0xff] }
  0x4d   : > { %370 = vst [vmem:[%s5549_s23 + $0x3d0] sm:$0xff] %v369_v58  ;;  %v373_v60 = vld [vmem:[%s5541_s22 + $0x7c0] sm:$0xff]  ;;  %v375_v61 = vld [vmem:[%s5541_s22 + $0x7c8] sm:$0xff]  ;;  %372 = vst [vmem:[%s5549_s23 + $0x3d8] sm:$0xff] %v371_v59 }
  0x4e   : > { %374 = vst [vmem:[%s5549_s23 + $0x3e0] sm:$0xff] %v373_v60  ;;  %376 = vst [vmem:[%s5549_s23 + $0x3e8] sm:$0xff] %v375_v61  ;;  %v377_v62 = vld [vmem:[%s5541_s22 + $0x7e0] sm:$0xff]  ;;  %v379_v63 = vld [vmem:[%s5541_s22 + $0x7e8] sm:$0xff] }
  0x4f   : > { %v381_v0 = vld [vmem:[%s5541_s22 + $0x800] sm:$0xff]  ;;  %378 = vst [vmem:[%s5549_s23 + $0x3f0] sm:$0xff] %v377_v62  ;;  %380 = vst [vmem:[%s5549_s23 + $0x3f8] sm:$0xff] %v379_v63  ;;  %v383_v1 = vld [vmem:[%s5541_s22 + $0x808] sm:$0xff] }
  0x50   : > { %382 = vst [vmem:[%s5549_s23 + $0x400] sm:$0xff] %v381_v0  ;;  %v385_v2 = vld [vmem:[%s5541_s22 + $0x820] sm:$0xff]  ;;  %v387_v3 = vld [vmem:[%s5541_s22 + $0x828] sm:$0xff]  ;;  %384 = vst [vmem:[%s5549_s23 + $0x408] sm:$0xff] %v383_v1 }
  0x51   : > { %386 = vst [vmem:[%s5549_s23 + $0x410] sm:$0xff] %v385_v2  ;;  %388 = vst [vmem:[%s5549_s23 + $0x418] sm:$0xff] %v387_v3  ;;  %v389_v4 = vld [vmem:[%s5541_s22 + $0x840] sm:$0xff]  ;;  %v391_v5 = vld [vmem:[%s5541_s22 + $0x848] sm:$0xff] }
  0x52   : > { %v393_v6 = vld [vmem:[%s5541_s22 + $0x860] sm:$0xff]  ;;  %390 = vst [vmem:[%s5549_s23 + $0x420] sm:$0xff] %v389_v4  ;;  %392 = vst [vmem:[%s5549_s23 + $0x428] sm:$0xff] %v391_v5  ;;  %v395_v7 = vld [vmem:[%s5541_s22 + $0x868] sm:$0xff] }
  0x53   : > { %394 = vst [vmem:[%s5549_s23 + $0x430] sm:$0xff] %v393_v6  ;;  %v397_v8 = vld [vmem:[%s5541_s22 + $0x880] sm:$0xff]  ;;  %v399_v9 = vld [vmem:[%s5541_s22 + $0x888] sm:$0xff]  ;;  %396 = vst [vmem:[%s5549_s23 + $0x438] sm:$0xff] %v395_v7 }
  0x54   : > { %398 = vst [vmem:[%s5549_s23 + $0x440] sm:$0xff] %v397_v8  ;;  %400 = vst [vmem:[%s5549_s23 + $0x448] sm:$0xff] %v399_v9  ;;  %v401_v10 = vld [vmem:[%s5541_s22 + $0x8a0] sm:$0xff]  ;;  %v403_v11 = vld [vmem:[%s5541_s22 + $0x8a8] sm:$0xff] }
  0x55   : > { %v405_v12 = vld [vmem:[%s5541_s22 + $0x8c0] sm:$0xff]  ;;  %402 = vst [vmem:[%s5549_s23 + $0x450] sm:$0xff] %v401_v10  ;;  %404 = vst [vmem:[%s5549_s23 + $0x458] sm:$0xff] %v403_v11  ;;  %v407_v13 = vld [vmem:[%s5541_s22 + $0x8c8] sm:$0xff] }
  0x56   : > { %406 = vst [vmem:[%s5549_s23 + $0x460] sm:$0xff] %v405_v12  ;;  %v409_v14 = vld [vmem:[%s5541_s22 + $0x8e0] sm:$0xff]  ;;  %v411_v15 = vld [vmem:[%s5541_s22 + $0x8e8] sm:$0xff]  ;;  %408 = vst [vmem:[%s5549_s23 + $0x468] sm:$0xff] %v407_v13 }
  0x57   : > { %410 = vst [vmem:[%s5549_s23 + $0x470] sm:$0xff] %v409_v14  ;;  %412 = vst [vmem:[%s5549_s23 + $0x478] sm:$0xff] %v411_v15  ;;  %v413_v16 = vld [vmem:[%s5541_s22 + $0x900] sm:$0xff]  ;;  %v415_v17 = vld [vmem:[%s5541_s22 + $0x908] sm:$0xff] }
  0x58   : > { %v417_v18 = vld [vmem:[%s5541_s22 + $0x920] sm:$0xff]  ;;  %414 = vst [vmem:[%s5549_s23 + $0x480] sm:$0xff] %v413_v16  ;;  %416 = vst [vmem:[%s5549_s23 + $0x488] sm:$0xff] %v415_v17  ;;  %v419_v19 = vld [vmem:[%s5541_s22 + $0x928] sm:$0xff] }
  0x59   : > { %418 = vst [vmem:[%s5549_s23 + $0x490] sm:$0xff] %v417_v18  ;;  %v421_v20 = vld [vmem:[%s5541_s22 + $0x940] sm:$0xff]  ;;  %v423_v21 = vld [vmem:[%s5541_s22 + $0x948] sm:$0xff]  ;;  %420 = vst [vmem:[%s5549_s23 + $0x498] sm:$0xff] %v419_v19 }
  0x5a   : > { %422 = vst [vmem:[%s5549_s23 + $0x4a0] sm:$0xff] %v421_v20  ;;  %424 = vst [vmem:[%s5549_s23 + $0x4a8] sm:$0xff] %v423_v21  ;;  %v425_v22 = vld [vmem:[%s5541_s22 + $0x960] sm:$0xff]  ;;  %v427_v23 = vld [vmem:[%s5541_s22 + $0x968] sm:$0xff] }
  0x5b   : > { %v429_v24 = vld [vmem:[%s5541_s22 + $0x980] sm:$0xff]  ;;  %426 = vst [vmem:[%s5549_s23 + $0x4b0] sm:$0xff] %v425_v22  ;;  %428 = vst [vmem:[%s5549_s23 + $0x4b8] sm:$0xff] %v427_v23  ;;  %v431_v25 = vld [vmem:[%s5541_s22 + $0x988] sm:$0xff] }
  0x5c   : > { %430 = vst [vmem:[%s5549_s23 + $0x4c0] sm:$0xff] %v429_v24  ;;  %v433_v26 = vld [vmem:[%s5541_s22 + $0x9a0] sm:$0xff]  ;;  %v435_v27 = vld [vmem:[%s5541_s22 + $0x9a8] sm:$0xff]  ;;  %432 = vst [vmem:[%s5549_s23 + $0x4c8] sm:$0xff] %v431_v25 }
  0x5d   : > { %434 = vst [vmem:[%s5549_s23 + $0x4d0] sm:$0xff] %v433_v26  ;;  %436 = vst [vmem:[%s5549_s23 + $0x4d8] sm:$0xff] %v435_v27  ;;  %v437_v28 = vld [vmem:[%s5541_s22 + $0x9c0] sm:$0xff]  ;;  %v439_v29 = vld [vmem:[%s5541_s22 + $0x9c8] sm:$0xff] }
  0x5e   : > { %v441_v30 = vld [vmem:[%s5541_s22 + $0x9e0] sm:$0xff]  ;;  %438 = vst [vmem:[%s5549_s23 + $0x4e0] sm:$0xff] %v437_v28  ;;  %440 = vst [vmem:[%s5549_s23 + $0x4e8] sm:$0xff] %v439_v29  ;;  %v443_v31 = vld [vmem:[%s5541_s22 + $0x9e8] sm:$0xff] }
  0x5f   : > { %442 = vst [vmem:[%s5549_s23 + $0x4f0] sm:$0xff] %v441_v30  ;;  %v445_v32 = vld [vmem:[%s5541_s22 + $0xa00] sm:$0xff]  ;;  %v447_v33 = vld [vmem:[%s5541_s22 + $0xa08] sm:$0xff]  ;;  %444 = vst [vmem:[%s5549_s23 + $0x4f8] sm:$0xff] %v443_v31 }
  0x60   : > { %446 = vst [vmem:[%s5549_s23 + $0x500] sm:$0xff] %v445_v32  ;;  %448 = vst [vmem:[%s5549_s23 + $0x508] sm:$0xff] %v447_v33  ;;  %v449_v34 = vld [vmem:[%s5541_s22 + $0xa20] sm:$0xff]  ;;  %v451_v35 = vld [vmem:[%s5541_s22 + $0xa28] sm:$0xff] }
  0x61   : > { %v453_v36 = vld [vmem:[%s5541_s22 + $0xa40] sm:$0xff]  ;;  %450 = vst [vmem:[%s5549_s23 + $0x510] sm:$0xff] %v449_v34  ;;  %452 = vst [vmem:[%s5549_s23 + $0x518] sm:$0xff] %v451_v35  ;;  %v455_v37 = vld [vmem:[%s5541_s22 + $0xa48] sm:$0xff] }
  0x62   : > { %454 = vst [vmem:[%s5549_s23 + $0x520] sm:$0xff] %v453_v36  ;;  %v457_v38 = vld [vmem:[%s5541_s22 + $0xa60] sm:$0xff]  ;;  %v459_v39 = vld [vmem:[%s5541_s22 + $0xa68] sm:$0xff]  ;;  %456 = vst [vmem:[%s5549_s23 + $0x528] sm:$0xff] %v455_v37 }
  0x63   : > { %458 = vst [vmem:[%s5549_s23 + $0x530] sm:$0xff] %v457_v38  ;;  %460 = vst [vmem:[%s5549_s23 + $0x538] sm:$0xff] %v459_v39  ;;  %v461_v40 = vld [vmem:[%s5541_s22 + $0xa80] sm:$0xff]  ;;  %v463_v41 = vld [vmem:[%s5541_s22 + $0xa88] sm:$0xff] }
  0x64   : > { %v465_v42 = vld [vmem:[%s5541_s22 + $0xaa0] sm:$0xff]  ;;  %462 = vst [vmem:[%s5549_s23 + $0x540] sm:$0xff] %v461_v40  ;;  %464 = vst [vmem:[%s5549_s23 + $0x548] sm:$0xff] %v463_v41  ;;  %v467_v43 = vld [vmem:[%s5541_s22 + $0xaa8] sm:$0xff] }
  0x65   : > { %466 = vst [vmem:[%s5549_s23 + $0x550] sm:$0xff] %v465_v42  ;;  %v469_v44 = vld [vmem:[%s5541_s22 + $0xac0] sm:$0xff]  ;;  %v471_v45 = vld [vmem:[%s5541_s22 + $0xac8] sm:$0xff]  ;;  %468 = vst [vmem:[%s5549_s23 + $0x558] sm:$0xff] %v467_v43 }
  0x66   : > { %470 = vst [vmem:[%s5549_s23 + $0x560] sm:$0xff] %v469_v44  ;;  %472 = vst [vmem:[%s5549_s23 + $0x568] sm:$0xff] %v471_v45  ;;  %v473_v46 = vld [vmem:[%s5541_s22 + $0xae0] sm:$0xff]  ;;  %v475_v47 = vld [vmem:[%s5541_s22 + $0xae8] sm:$0xff] }
  0x67   : > { %v477_v48 = vld [vmem:[%s5541_s22 + $0xb00] sm:$0xff]  ;;  %474 = vst [vmem:[%s5549_s23 + $0x570] sm:$0xff] %v473_v46  ;;  %476 = vst [vmem:[%s5549_s23 + $0x578] sm:$0xff] %v475_v47  ;;  %v479_v49 = vld [vmem:[%s5541_s22 + $0xb08] sm:$0xff] }
  0x68   : > { %478 = vst [vmem:[%s5549_s23 + $0x580] sm:$0xff] %v477_v48  ;;  %v481_v50 = vld [vmem:[%s5541_s22 + $0xb20] sm:$0xff]  ;;  %v483_v51 = vld [vmem:[%s5541_s22 + $0xb28] sm:$0xff]  ;;  %480 = vst [vmem:[%s5549_s23 + $0x588] sm:$0xff] %v479_v49 }
  0x69   : > { %482 = vst [vmem:[%s5549_s23 + $0x590] sm:$0xff] %v481_v50  ;;  %484 = vst [vmem:[%s5549_s23 + $0x598] sm:$0xff] %v483_v51  ;;  %v485_v52 = vld [vmem:[%s5541_s22 + $0xb40] sm:$0xff]  ;;  %v487_v53 = vld [vmem:[%s5541_s22 + $0xb48] sm:$0xff] }
  0x6a   : > { %v489_v54 = vld [vmem:[%s5541_s22 + $0xb60] sm:$0xff]  ;;  %486 = vst [vmem:[%s5549_s23 + $0x5a0] sm:$0xff] %v485_v52  ;;  %488 = vst [vmem:[%s5549_s23 + $0x5a8] sm:$0xff] %v487_v53  ;;  %v491_v55 = vld [vmem:[%s5541_s22 + $0xb68] sm:$0xff] }
  0x6b   : > { %490 = vst [vmem:[%s5549_s23 + $0x5b0] sm:$0xff] %v489_v54  ;;  %v493_v56 = vld [vmem:[%s5541_s22 + $0xb80] sm:$0xff]  ;;  %v495_v57 = vld [vmem:[%s5541_s22 + $0xb88] sm:$0xff]  ;;  %492 = vst [vmem:[%s5549_s23 + $0x5b8] sm:$0xff] %v491_v55 }
  0x6c   : > { %494 = vst [vmem:[%s5549_s23 + $0x5c0] sm:$0xff] %v493_v56  ;;  %496 = vst [vmem:[%s5549_s23 + $0x5c8] sm:$0xff] %v495_v57  ;;  %v497_v58 = vld [vmem:[%s5541_s22 + $0xba0] sm:$0xff]  ;;  %v499_v59 = vld [vmem:[%s5541_s22 + $0xba8] sm:$0xff] }
  0x6d   : > { %v501_v60 = vld [vmem:[%s5541_s22 + $0xbc0] sm:$0xff]  ;;  %498 = vst [vmem:[%s5549_s23 + $0x5d0] sm:$0xff] %v497_v58  ;;  %500 = vst [vmem:[%s5549_s23 + $0x5d8] sm:$0xff] %v499_v59  ;;  %v503_v61 = vld [vmem:[%s5541_s22 + $0xbc8] sm:$0xff] }
  0x6e   : > { %502 = vst [vmem:[%s5549_s23 + $0x5e0] sm:$0xff] %v501_v60  ;;  %v505_v62 = vld [vmem:[%s5541_s22 + $0xbe0] sm:$0xff]  ;;  %v507_v63 = vld [vmem:[%s5541_s22 + $0xbe8] sm:$0xff]  ;;  %504 = vst [vmem:[%s5549_s23 + $0x5e8] sm:$0xff] %v503_v61 }
  0x6f   : > { %506 = vst [vmem:[%s5549_s23 + $0x5f0] sm:$0xff] %v505_v62  ;;  %508 = vst [vmem:[%s5549_s23 + $0x5f8] sm:$0xff] %v507_v63  ;;  %v509_v0 = vld [vmem:[%s5541_s22 + $0xc00] sm:$0xff]  ;;  %v511_v1 = vld [vmem:[%s5541_s22 + $0xc08] sm:$0xff] }
  0x70   : > { %v513_v2 = vld [vmem:[%s5541_s22 + $0xc20] sm:$0xff]  ;;  %510 = vst [vmem:[%s5549_s23 + $0x600] sm:$0xff] %v509_v0  ;;  %512 = vst [vmem:[%s5549_s23 + $0x608] sm:$0xff] %v511_v1  ;;  %v515_v3 = vld [vmem:[%s5541_s22 + $0xc28] sm:$0xff] }
  0x71   : > { %514 = vst [vmem:[%s5549_s23 + $0x610] sm:$0xff] %v513_v2  ;;  %v517_v4 = vld [vmem:[%s5541_s22 + $0xc40] sm:$0xff]  ;;  %v519_v5 = vld [vmem:[%s5541_s22 + $0xc48] sm:$0xff]  ;;  %516 = vst [vmem:[%s5549_s23 + $0x618] sm:$0xff] %v515_v3 }
  0x72   : > { %518 = vst [vmem:[%s5549_s23 + $0x620] sm:$0xff] %v517_v4  ;;  %520 = vst [vmem:[%s5549_s23 + $0x628] sm:$0xff] %v519_v5  ;;  %v521_v6 = vld [vmem:[%s5541_s22 + $0xc60] sm:$0xff]  ;;  %v523_v7 = vld [vmem:[%s5541_s22 + $0xc68] sm:$0xff] }
  0x73   : > { %v525_v8 = vld [vmem:[%s5541_s22 + $0xc80] sm:$0xff]  ;;  %522 = vst [vmem:[%s5549_s23 + $0x630] sm:$0xff] %v521_v6  ;;  %524 = vst [vmem:[%s5549_s23 + $0x638] sm:$0xff] %v523_v7  ;;  %v527_v9 = vld [vmem:[%s5541_s22 + $0xc88] sm:$0xff] }
  0x74   : > { %526 = vst [vmem:[%s5549_s23 + $0x640] sm:$0xff] %v525_v8  ;;  %v529_v10 = vld [vmem:[%s5541_s22 + $0xca0] sm:$0xff]  ;;  %v531_v11 = vld [vmem:[%s5541_s22 + $0xca8] sm:$0xff]  ;;  %528 = vst [vmem:[%s5549_s23 + $0x648] sm:$0xff] %v527_v9 }
  0x75   : > { %530 = vst [vmem:[%s5549_s23 + $0x650] sm:$0xff] %v529_v10  ;;  %532 = vst [vmem:[%s5549_s23 + $0x658] sm:$0xff] %v531_v11  ;;  %v533_v12 = vld [vmem:[%s5541_s22 + $0xcc0] sm:$0xff]  ;;  %v535_v13 = vld [vmem:[%s5541_s22 + $0xcc8] sm:$0xff] }
  0x76   : > { %v537_v14 = vld [vmem:[%s5541_s22 + $0xce0] sm:$0xff]  ;;  %534 = vst [vmem:[%s5549_s23 + $0x660] sm:$0xff] %v533_v12  ;;  %536 = vst [vmem:[%s5549_s23 + $0x668] sm:$0xff] %v535_v13  ;;  %v539_v15 = vld [vmem:[%s5541_s22 + $0xce8] sm:$0xff] }
  0x77   : > { %538 = vst [vmem:[%s5549_s23 + $0x670] sm:$0xff] %v537_v14  ;;  %v541_v16 = vld [vmem:[%s5541_s22 + $0xd00] sm:$0xff]  ;;  %v543_v17 = vld [vmem:[%s5541_s22 + $0xd08] sm:$0xff]  ;;  %540 = vst [vmem:[%s5549_s23 + $0x678] sm:$0xff] %v539_v15 }
  0x78   : > { %542 = vst [vmem:[%s5549_s23 + $0x680] sm:$0xff] %v541_v16  ;;  %544 = vst [vmem:[%s5549_s23 + $0x688] sm:$0xff] %v543_v17  ;;  %v545_v18 = vld [vmem:[%s5541_s22 + $0xd20] sm:$0xff]  ;;  %v547_v19 = vld [vmem:[%s5541_s22 + $0xd28] sm:$0xff] }
  0x79   : > { %v549_v20 = vld [vmem:[%s5541_s22 + $0xd40] sm:$0xff]  ;;  %546 = vst [vmem:[%s5549_s23 + $0x690] sm:$0xff] %v545_v18  ;;  %548 = vst [vmem:[%s5549_s23 + $0x698] sm:$0xff] %v547_v19  ;;  %v551_v21 = vld [vmem:[%s5541_s22 + $0xd48] sm:$0xff] }
  0x7a   : > { %550 = vst [vmem:[%s5549_s23 + $0x6a0] sm:$0xff] %v549_v20  ;;  %v553_v22 = vld [vmem:[%s5541_s22 + $0xd60] sm:$0xff]  ;;  %v555_v23 = vld [vmem:[%s5541_s22 + $0xd68] sm:$0xff]  ;;  %552 = vst [vmem:[%s5549_s23 + $0x6a8] sm:$0xff] %v551_v21 }
  0x7b   : > { %554 = vst [vmem:[%s5549_s23 + $0x6b0] sm:$0xff] %v553_v22  ;;  %556 = vst [vmem:[%s5549_s23 + $0x6b8] sm:$0xff] %v555_v23  ;;  %v557_v24 = vld [vmem:[%s5541_s22 + $0xd80] sm:$0xff]  ;;  %v559_v25 = vld [vmem:[%s5541_s22 + $0xd88] sm:$0xff] }
  0x7c   : > { %v561_v26 = vld [vmem:[%s5541_s22 + $0xda0] sm:$0xff]  ;;  %558 = vst [vmem:[%s5549_s23 + $0x6c0] sm:$0xff] %v557_v24  ;;  %560 = vst [vmem:[%s5549_s23 + $0x6c8] sm:$0xff] %v559_v25  ;;  %v563_v27 = vld [vmem:[%s5541_s22 + $0xda8] sm:$0xff] }
  0x7d   : > { %562 = vst [vmem:[%s5549_s23 + $0x6d0] sm:$0xff] %v561_v26  ;;  %v565_v28 = vld [vmem:[%s5541_s22 + $0xdc0] sm:$0xff]  ;;  %v567_v29 = vld [vmem:[%s5541_s22 + $0xdc8] sm:$0xff]  ;;  %564 = vst [vmem:[%s5549_s23 + $0x6d8] sm:$0xff] %v563_v27 }
  0x7e   : > { %566 = vst [vmem:[%s5549_s23 + $0x6e0] sm:$0xff] %v565_v28  ;;  %568 = vst [vmem:[%s5549_s23 + $0x6e8] sm:$0xff] %v567_v29  ;;  %v569_v30 = vld [vmem:[%s5541_s22 + $0xde0] sm:$0xff]  ;;  %v571_v31 = vld [vmem:[%s5541_s22 + $0xde8] sm:$0xff] }
  0x7f   : > { %v573_v32 = vld [vmem:[%s5541_s22 + $0xe00] sm:$0xff]  ;;  %570 = vst [vmem:[%s5549_s23 + $0x6f0] sm:$0xff] %v569_v30  ;;  %572 = vst [vmem:[%s5549_s23 + $0x6f8] sm:$0xff] %v571_v31  ;;  %v575_v33 = vld [vmem:[%s5541_s22 + $0xe08] sm:$0xff] }
  0x80   : > { %574 = vst [vmem:[%s5549_s23 + $0x700] sm:$0xff] %v573_v32  ;;  %v577_v34 = vld [vmem:[%s5541_s22 + $0xe20] sm:$0xff]  ;;  %v579_v35 = vld [vmem:[%s5541_s22 + $0xe28] sm:$0xff]  ;;  %576 = vst [vmem:[%s5549_s23 + $0x708] sm:$0xff] %v575_v33 }
  0x81   : > { %578 = vst [vmem:[%s5549_s23 + $0x710] sm:$0xff] %v577_v34  ;;  %580 = vst [vmem:[%s5549_s23 + $0x718] sm:$0xff] %v579_v35  ;;  %v581_v36 = vld [vmem:[%s5541_s22 + $0xe40] sm:$0xff]  ;;  %v583_v37 = vld [vmem:[%s5541_s22 + $0xe48] sm:$0xff] }
  0x82   : > { %v585_v38 = vld [vmem:[%s5541_s22 + $0xe60] sm:$0xff]  ;;  %582 = vst [vmem:[%s5549_s23 + $0x720] sm:$0xff] %v581_v36  ;;  %584 = vst [vmem:[%s5549_s23 + $0x728] sm:$0xff] %v583_v37  ;;  %v587_v39 = vld [vmem:[%s5541_s22 + $0xe68] sm:$0xff] }
  0x83   : > { %586 = vst [vmem:[%s5549_s23 + $0x730] sm:$0xff] %v585_v38  ;;  %v589_v40 = vld [vmem:[%s5541_s22 + $0xe80] sm:$0xff]  ;;  %v591_v41 = vld [vmem:[%s5541_s22 + $0xe88] sm:$0xff]  ;;  %588 = vst [vmem:[%s5549_s23 + $0x738] sm:$0xff] %v587_v39 }
  0x84   : > { %590 = vst [vmem:[%s5549_s23 + $0x740] sm:$0xff] %v589_v40  ;;  %592 = vst [vmem:[%s5549_s23 + $0x748] sm:$0xff] %v591_v41  ;;  %v593_v42 = vld [vmem:[%s5541_s22 + $0xea0] sm:$0xff]  ;;  %v595_v43 = vld [vmem:[%s5541_s22 + $0xea8] sm:$0xff] }
  0x85   : > { %v597_v44 = vld [vmem:[%s5541_s22 + $0xec0] sm:$0xff]  ;;  %594 = vst [vmem:[%s5549_s23 + $0x750] sm:$0xff] %v593_v42  ;;  %596 = vst [vmem:[%s5549_s23 + $0x758] sm:$0xff] %v595_v43  ;;  %v599_v45 = vld [vmem:[%s5541_s22 + $0xec8] sm:$0xff] }
  0x86   : > { %598 = vst [vmem:[%s5549_s23 + $0x760] sm:$0xff] %v597_v44  ;;  %v601_v46 = vld [vmem:[%s5541_s22 + $0xee0] sm:$0xff]  ;;  %v603_v47 = vld [vmem:[%s5541_s22 + $0xee8] sm:$0xff]  ;;  %600 = vst [vmem:[%s5549_s23 + $0x768] sm:$0xff] %v599_v45 }
  0x87   : > { %602 = vst [vmem:[%s5549_s23 + $0x770] sm:$0xff] %v601_v46  ;;  %604 = vst [vmem:[%s5549_s23 + $0x778] sm:$0xff] %v603_v47  ;;  %v605_v48 = vld [vmem:[%s5541_s22 + $0xf00] sm:$0xff]  ;;  %v607_v49 = vld [vmem:[%s5541_s22 + $0xf08] sm:$0xff] }
  0x88   : > { %v609_v50 = vld [vmem:[%s5541_s22 + $0xf20] sm:$0xff]  ;;  %606 = vst [vmem:[%s5549_s23 + $0x780] sm:$0xff] %v605_v48  ;;  %608 = vst [vmem:[%s5549_s23 + $0x788] sm:$0xff] %v607_v49  ;;  %v611_v51 = vld [vmem:[%s5541_s22 + $0xf28] sm:$0xff] }
  0x89   : > { %610 = vst [vmem:[%s5549_s23 + $0x790] sm:$0xff] %v609_v50  ;;  %v613_v52 = vld [vmem:[%s5541_s22 + $0xf40] sm:$0xff]  ;;  %v615_v53 = vld [vmem:[%s5541_s22 + $0xf48] sm:$0xff]  ;;  %612 = vst [vmem:[%s5549_s23 + $0x798] sm:$0xff] %v611_v51 }
  0x8a   : > { %614 = vst [vmem:[%s5549_s23 + $0x7a0] sm:$0xff] %v613_v52  ;;  %616 = vst [vmem:[%s5549_s23 + $0x7a8] sm:$0xff] %v615_v53  ;;  %v617_v54 = vld [vmem:[%s5541_s22 + $0xf60] sm:$0xff]  ;;  %v619_v55 = vld [vmem:[%s5541_s22 + $0xf68] sm:$0xff] }
  0x8b   : > { %v621_v56 = vld [vmem:[%s5541_s22 + $0xf80] sm:$0xff]  ;;  %618 = vst [vmem:[%s5549_s23 + $0x7b0] sm:$0xff] %v617_v54  ;;  %620 = vst [vmem:[%s5549_s23 + $0x7b8] sm:$0xff] %v619_v55  ;;  %v623_v57 = vld [vmem:[%s5541_s22 + $0xf88] sm:$0xff] }
  0x8c   : > { %622 = vst [vmem:[%s5549_s23 + $0x7c0] sm:$0xff] %v621_v56  ;;  %v625_v58 = vld [vmem:[%s5541_s22 + $0xfa0] sm:$0xff]  ;;  %v627_v59 = vld [vmem:[%s5541_s22 + $0xfa8] sm:$0xff]  ;;  %624 = vst [vmem:[%s5549_s23 + $0x7c8] sm:$0xff] %v623_v57 }
  0x8d   : > { %626 = vst [vmem:[%s5549_s23 + $0x7d0] sm:$0xff] %v625_v58  ;;  %628 = vst [vmem:[%s5549_s23 + $0x7d8] sm:$0xff] %v627_v59  ;;  %v629_v60 = vld [vmem:[%s5541_s22 + $0xfc0] sm:$0xff]  ;;  %v631_v61 = vld [vmem:[%s5541_s22 + $0xfc8] sm:$0xff] }
  0x8e   : > { %v633_v62 = vld [vmem:[%s5541_s22 + $0xfe0] sm:$0xff]  ;;  %630 = vst [vmem:[%s5549_s23 + $0x7e0] sm:$0xff] %v629_v60  ;;  %632 = vst [vmem:[%s5549_s23 + $0x7e8] sm:$0xff] %v631_v61  ;;  %v635_v63 = vld [vmem:[%s5541_s22 + $0xfe8] sm:$0xff] }
  0x8f   : > { %634 = vst [vmem:[%s5549_s23 + $0x7f0] sm:$0xff] %v633_v62  ;;  %v637_v0 = vld [vmem:[%s5541_s22 + $0x1000] sm:$0xff]  ;;  %v639_v1 = vld [vmem:[%s5541_s22 + $0x1008] sm:$0xff]  ;;  %636 = vst [vmem:[%s5549_s23 + $0x7f8] sm:$0xff] %v635_v63 }
  0x90   : > { %638 = vst [vmem:[%s5549_s23 + $0x800] sm:$0xff] %v637_v0  ;;  %640 = vst [vmem:[%s5549_s23 + $0x808] sm:$0xff] %v639_v1  ;;  %v641_v2 = vld [vmem:[%s5541_s22 + $0x1020] sm:$0xff]  ;;  %v643_v3 = vld [vmem:[%s5541_s22 + $0x1028] sm:$0xff] }
  0x91   : > { %v645_v4 = vld [vmem:[%s5541_s22 + $0x1040] sm:$0xff]  ;;  %642 = vst [vmem:[%s5549_s23 + $0x810] sm:$0xff] %v641_v2  ;;  %644 = vst [vmem:[%s5549_s23 + $0x818] sm:$0xff] %v643_v3  ;;  %v647_v5 = vld [vmem:[%s5541_s22 + $0x1048] sm:$0xff] }
  0x92   : > { %646 = vst [vmem:[%s5549_s23 + $0x820] sm:$0xff] %v645_v4  ;;  %v649_v6 = vld [vmem:[%s5541_s22 + $0x1060] sm:$0xff]  ;;  %v651_v7 = vld [vmem:[%s5541_s22 + $0x1068] sm:$0xff]  ;;  %648 = vst [vmem:[%s5549_s23 + $0x828] sm:$0xff] %v647_v5 }
  0x93   : > { %650 = vst [vmem:[%s5549_s23 + $0x830] sm:$0xff] %v649_v6  ;;  %652 = vst [vmem:[%s5549_s23 + $0x838] sm:$0xff] %v651_v7  ;;  %v653_v8 = vld [vmem:[%s5541_s22 + $0x1080] sm:$0xff]  ;;  %v655_v9 = vld [vmem:[%s5541_s22 + $0x1088] sm:$0xff] }
  0x94   : > { %v657_v10 = vld [vmem:[%s5541_s22 + $0x10a0] sm:$0xff]  ;;  %654 = vst [vmem:[%s5549_s23 + $0x840] sm:$0xff] %v653_v8  ;;  %656 = vst [vmem:[%s5549_s23 + $0x848] sm:$0xff] %v655_v9  ;;  %v659_v11 = vld [vmem:[%s5541_s22 + $0x10a8] sm:$0xff] }
  0x95   : > { %658 = vst [vmem:[%s5549_s23 + $0x850] sm:$0xff] %v657_v10  ;;  %v661_v12 = vld [vmem:[%s5541_s22 + $0x10c0] sm:$0xff]  ;;  %v663_v13 = vld [vmem:[%s5541_s22 + $0x10c8] sm:$0xff]  ;;  %660 = vst [vmem:[%s5549_s23 + $0x858] sm:$0xff] %v659_v11 }
  0x96   : > { %662 = vst [vmem:[%s5549_s23 + $0x860] sm:$0xff] %v661_v12  ;;  %664 = vst [vmem:[%s5549_s23 + $0x868] sm:$0xff] %v663_v13  ;;  %v665_v14 = vld [vmem:[%s5541_s22 + $0x10e0] sm:$0xff]  ;;  %v667_v15 = vld [vmem:[%s5541_s22 + $0x10e8] sm:$0xff] }
  0x97   : > { %v669_v16 = vld [vmem:[%s5541_s22 + $0x1100] sm:$0xff]  ;;  %666 = vst [vmem:[%s5549_s23 + $0x870] sm:$0xff] %v665_v14  ;;  %668 = vst [vmem:[%s5549_s23 + $0x878] sm:$0xff] %v667_v15  ;;  %v671_v17 = vld [vmem:[%s5541_s22 + $0x1108] sm:$0xff] }
  0x98   : > { %670 = vst [vmem:[%s5549_s23 + $0x880] sm:$0xff] %v669_v16  ;;  %v673_v18 = vld [vmem:[%s5541_s22 + $0x1120] sm:$0xff]  ;;  %v675_v19 = vld [vmem:[%s5541_s22 + $0x1128] sm:$0xff]  ;;  %672 = vst [vmem:[%s5549_s23 + $0x888] sm:$0xff] %v671_v17 }
  0x99   : > { %674 = vst [vmem:[%s5549_s23 + $0x890] sm:$0xff] %v673_v18  ;;  %676 = vst [vmem:[%s5549_s23 + $0x898] sm:$0xff] %v675_v19  ;;  %v677_v20 = vld [vmem:[%s5541_s22 + $0x1140] sm:$0xff]  ;;  %v679_v21 = vld [vmem:[%s5541_s22 + $0x1148] sm:$0xff] }
  0x9a   : > { %v681_v22 = vld [vmem:[%s5541_s22 + $0x1160] sm:$0xff]  ;;  %678 = vst [vmem:[%s5549_s23 + $0x8a0] sm:$0xff] %v677_v20  ;;  %680 = vst [vmem:[%s5549_s23 + $0x8a8] sm:$0xff] %v679_v21  ;;  %v683_v23 = vld [vmem:[%s5541_s22 + $0x1168] sm:$0xff] }
  0x9b   : > { %682 = vst [vmem:[%s5549_s23 + $0x8b0] sm:$0xff] %v681_v22  ;;  %v685_v24 = vld [vmem:[%s5541_s22 + $0x1180] sm:$0xff]  ;;  %v687_v25 = vld [vmem:[%s5541_s22 + $0x1188] sm:$0xff]  ;;  %684 = vst [vmem:[%s5549_s23 + $0x8b8] sm:$0xff] %v683_v23 }
  0x9c   : > { %686 = vst [vmem:[%s5549_s23 + $0x8c0] sm:$0xff] %v685_v24  ;;  %688 = vst [vmem:[%s5549_s23 + $0x8c8] sm:$0xff] %v687_v25  ;;  %v689_v26 = vld [vmem:[%s5541_s22 + $0x11a0] sm:$0xff]  ;;  %v691_v27 = vld [vmem:[%s5541_s22 + $0x11a8] sm:$0xff] }
  0x9d   : > { %v693_v28 = vld [vmem:[%s5541_s22 + $0x11c0] sm:$0xff]  ;;  %690 = vst [vmem:[%s5549_s23 + $0x8d0] sm:$0xff] %v689_v26  ;;  %692 = vst [vmem:[%s5549_s23 + $0x8d8] sm:$0xff] %v691_v27  ;;  %v695_v29 = vld [vmem:[%s5541_s22 + $0x11c8] sm:$0xff] }
  0x9e   : > { %694 = vst [vmem:[%s5549_s23 + $0x8e0] sm:$0xff] %v693_v28  ;;  %v697_v30 = vld [vmem:[%s5541_s22 + $0x11e0] sm:$0xff]  ;;  %v699_v31 = vld [vmem:[%s5541_s22 + $0x11e8] sm:$0xff]  ;;  %696 = vst [vmem:[%s5549_s23 + $0x8e8] sm:$0xff] %v695_v29 }
  0x9f   : > { %698 = vst [vmem:[%s5549_s23 + $0x8f0] sm:$0xff] %v697_v30  ;;  %700 = vst [vmem:[%s5549_s23 + $0x8f8] sm:$0xff] %v699_v31  ;;  %v701_v32 = vld [vmem:[%s5541_s22 + $0x1200] sm:$0xff]  ;;  %v703_v33 = vld [vmem:[%s5541_s22 + $0x1208] sm:$0xff] }
  0xa0   : > { %v705_v34 = vld [vmem:[%s5541_s22 + $0x1220] sm:$0xff]  ;;  %702 = vst [vmem:[%s5549_s23 + $0x900] sm:$0xff] %v701_v32  ;;  %704 = vst [vmem:[%s5549_s23 + $0x908] sm:$0xff] %v703_v33  ;;  %v707_v35 = vld [vmem:[%s5541_s22 + $0x1228] sm:$0xff] }
  0xa1   : > { %706 = vst [vmem:[%s5549_s23 + $0x910] sm:$0xff] %v705_v34  ;;  %v709_v36 = vld [vmem:[%s5541_s22 + $0x1240] sm:$0xff]  ;;  %v711_v37 = vld [vmem:[%s5541_s22 + $0x1248] sm:$0xff]  ;;  %708 = vst [vmem:[%s5549_s23 + $0x918] sm:$0xff] %v707_v35 }
  0xa2   : > { %710 = vst [vmem:[%s5549_s23 + $0x920] sm:$0xff] %v709_v36  ;;  %712 = vst [vmem:[%s5549_s23 + $0x928] sm:$0xff] %v711_v37  ;;  %v713_v38 = vld [vmem:[%s5541_s22 + $0x1260] sm:$0xff]  ;;  %v715_v39 = vld [vmem:[%s5541_s22 + $0x1268] sm:$0xff] }
  0xa3   : > { %v717_v40 = vld [vmem:[%s5541_s22 + $0x1280] sm:$0xff]  ;;  %714 = vst [vmem:[%s5549_s23 + $0x930] sm:$0xff] %v713_v38  ;;  %716 = vst [vmem:[%s5549_s23 + $0x938] sm:$0xff] %v715_v39  ;;  %v719_v41 = vld [vmem:[%s5541_s22 + $0x1288] sm:$0xff] }
  0xa4   : > { %718 = vst [vmem:[%s5549_s23 + $0x940] sm:$0xff] %v717_v40  ;;  %v721_v42 = vld [vmem:[%s5541_s22 + $0x12a0] sm:$0xff]  ;;  %v723_v43 = vld [vmem:[%s5541_s22 + $0x12a8] sm:$0xff]  ;;  %720 = vst [vmem:[%s5549_s23 + $0x948] sm:$0xff] %v719_v41 }
  0xa5   : > { %722 = vst [vmem:[%s5549_s23 + $0x950] sm:$0xff] %v721_v42  ;;  %724 = vst [vmem:[%s5549_s23 + $0x958] sm:$0xff] %v723_v43  ;;  %v725_v44 = vld [vmem:[%s5541_s22 + $0x12c0] sm:$0xff]  ;;  %v727_v45 = vld [vmem:[%s5541_s22 + $0x12c8] sm:$0xff] }
  0xa6   : > { %v729_v46 = vld [vmem:[%s5541_s22 + $0x12e0] sm:$0xff]  ;;  %726 = vst [vmem:[%s5549_s23 + $0x960] sm:$0xff] %v725_v44  ;;  %728 = vst [vmem:[%s5549_s23 + $0x968] sm:$0xff] %v727_v45  ;;  %v731_v47 = vld [vmem:[%s5541_s22 + $0x12e8] sm:$0xff] }
  0xa7   : > { %730 = vst [vmem:[%s5549_s23 + $0x970] sm:$0xff] %v729_v46  ;;  %v733_v48 = vld [vmem:[%s5541_s22 + $0x1300] sm:$0xff]  ;;  %v735_v49 = vld [vmem:[%s5541_s22 + $0x1308] sm:$0xff]  ;;  %732 = vst [vmem:[%s5549_s23 + $0x978] sm:$0xff] %v731_v47 }
  0xa8   : > { %734 = vst [vmem:[%s5549_s23 + $0x980] sm:$0xff] %v733_v48  ;;  %736 = vst [vmem:[%s5549_s23 + $0x988] sm:$0xff] %v735_v49  ;;  %v737_v50 = vld [vmem:[%s5541_s22 + $0x1320] sm:$0xff]  ;;  %v739_v51 = vld [vmem:[%s5541_s22 + $0x1328] sm:$0xff] }
  0xa9   : > { %v741_v52 = vld [vmem:[%s5541_s22 + $0x1340] sm:$0xff]  ;;  %738 = vst [vmem:[%s5549_s23 + $0x990] sm:$0xff] %v737_v50  ;;  %740 = vst [vmem:[%s5549_s23 + $0x998] sm:$0xff] %v739_v51  ;;  %v743_v53 = vld [vmem:[%s5541_s22 + $0x1348] sm:$0xff] }
  0xaa   : > { %742 = vst [vmem:[%s5549_s23 + $0x9a0] sm:$0xff] %v741_v52  ;;  %v745_v54 = vld [vmem:[%s5541_s22 + $0x1360] sm:$0xff]  ;;  %v747_v55 = vld [vmem:[%s5541_s22 + $0x1368] sm:$0xff]  ;;  %744 = vst [vmem:[%s5549_s23 + $0x9a8] sm:$0xff] %v743_v53 }
  0xab   : > { %746 = vst [vmem:[%s5549_s23 + $0x9b0] sm:$0xff] %v745_v54  ;;  %748 = vst [vmem:[%s5549_s23 + $0x9b8] sm:$0xff] %v747_v55  ;;  %v749_v56 = vld [vmem:[%s5541_s22 + $0x1380] sm:$0xff]  ;;  %v751_v57 = vld [vmem:[%s5541_s22 + $0x1388] sm:$0xff] }
  0xac   : > { %v753_v58 = vld [vmem:[%s5541_s22 + $0x13a0] sm:$0xff]  ;;  %750 = vst [vmem:[%s5549_s23 + $0x9c0] sm:$0xff] %v749_v56  ;;  %752 = vst [vmem:[%s5549_s23 + $0x9c8] sm:$0xff] %v751_v57  ;;  %v755_v59 = vld [vmem:[%s5541_s22 + $0x13a8] sm:$0xff] }
  0xad   : > { %754 = vst [vmem:[%s5549_s23 + $0x9d0] sm:$0xff] %v753_v58  ;;  %v757_v60 = vld [vmem:[%s5541_s22 + $0x13c0] sm:$0xff]  ;;  %v759_v61 = vld [vmem:[%s5541_s22 + $0x13c8] sm:$0xff]  ;;  %756 = vst [vmem:[%s5549_s23 + $0x9d8] sm:$0xff] %v755_v59 }
  0xae   : > { %758 = vst [vmem:[%s5549_s23 + $0x9e0] sm:$0xff] %v757_v60  ;;  %760 = vst [vmem:[%s5549_s23 + $0x9e8] sm:$0xff] %v759_v61  ;;  %v761_v62 = vld [vmem:[%s5541_s22 + $0x13e0] sm:$0xff]  ;;  %v763_v63 = vld [vmem:[%s5541_s22 + $0x13e8] sm:$0xff] }
  0xaf   : > { %v765_v0 = vld [vmem:[%s5541_s22 + $0x1400] sm:$0xff]  ;;  %762 = vst [vmem:[%s5549_s23 + $0x9f0] sm:$0xff] %v761_v62  ;;  %764 = vst [vmem:[%s5549_s23 + $0x9f8] sm:$0xff] %v763_v63  ;;  %v767_v1 = vld [vmem:[%s5541_s22 + $0x1408] sm:$0xff] }
  0xb0   : > { %766 = vst [vmem:[%s5549_s23 + $0xa00] sm:$0xff] %v765_v0  ;;  %v769_v2 = vld [vmem:[%s5541_s22 + $0x1420] sm:$0xff]  ;;  %v771_v3 = vld [vmem:[%s5541_s22 + $0x1428] sm:$0xff]  ;;  %768 = vst [vmem:[%s5549_s23 + $0xa08] sm:$0xff] %v767_v1 }
  0xb1   : > { %770 = vst [vmem:[%s5549_s23 + $0xa10] sm:$0xff] %v769_v2  ;;  %772 = vst [vmem:[%s5549_s23 + $0xa18] sm:$0xff] %v771_v3  ;;  %v773_v4 = vld [vmem:[%s5541_s22 + $0x1440] sm:$0xff]  ;;  %v775_v5 = vld [vmem:[%s5541_s22 + $0x1448] sm:$0xff] }
  0xb2   : > { %v777_v6 = vld [vmem:[%s5541_s22 + $0x1460] sm:$0xff]  ;;  %774 = vst [vmem:[%s5549_s23 + $0xa20] sm:$0xff] %v773_v4  ;;  %776 = vst [vmem:[%s5549_s23 + $0xa28] sm:$0xff] %v775_v5  ;;  %v779_v7 = vld [vmem:[%s5541_s22 + $0x1468] sm:$0xff] }
  0xb3   : > { %778 = vst [vmem:[%s5549_s23 + $0xa30] sm:$0xff] %v777_v6  ;;  %v781_v8 = vld [vmem:[%s5541_s22 + $0x1480] sm:$0xff]  ;;  %v783_v9 = vld [vmem:[%s5541_s22 + $0x1488] sm:$0xff]  ;;  %780 = vst [vmem:[%s5549_s23 + $0xa38] sm:$0xff] %v779_v7 }
  0xb4   : > { %782 = vst [vmem:[%s5549_s23 + $0xa40] sm:$0xff] %v781_v8  ;;  %784 = vst [vmem:[%s5549_s23 + $0xa48] sm:$0xff] %v783_v9  ;;  %v785_v10 = vld [vmem:[%s5541_s22 + $0x14a0] sm:$0xff]  ;;  %v787_v11 = vld [vmem:[%s5541_s22 + $0x14a8] sm:$0xff] }
  0xb5   : > { %v789_v12 = vld [vmem:[%s5541_s22 + $0x14c0] sm:$0xff]  ;;  %786 = vst [vmem:[%s5549_s23 + $0xa50] sm:$0xff] %v785_v10  ;;  %788 = vst [vmem:[%s5549_s23 + $0xa58] sm:$0xff] %v787_v11  ;;  %v791_v13 = vld [vmem:[%s5541_s22 + $0x14c8] sm:$0xff] }
  0xb6   : > { %790 = vst [vmem:[%s5549_s23 + $0xa60] sm:$0xff] %v789_v12  ;;  %v793_v14 = vld [vmem:[%s5541_s22 + $0x14e0] sm:$0xff]  ;;  %v795_v15 = vld [vmem:[%s5541_s22 + $0x14e8] sm:$0xff]  ;;  %792 = vst [vmem:[%s5549_s23 + $0xa68] sm:$0xff] %v791_v13 }
  0xb7   : > { %794 = vst [vmem:[%s5549_s23 + $0xa70] sm:$0xff] %v793_v14  ;;  %796 = vst [vmem:[%s5549_s23 + $0xa78] sm:$0xff] %v795_v15  ;;  %v797_v16 = vld [vmem:[%s5541_s22 + $0x1500] sm:$0xff]  ;;  %v799_v17 = vld [vmem:[%s5541_s22 + $0x1508] sm:$0xff] }
  0xb8   : > { %v801_v18 = vld [vmem:[%s5541_s22 + $0x1520] sm:$0xff]  ;;  %798 = vst [vmem:[%s5549_s23 + $0xa80] sm:$0xff] %v797_v16  ;;  %800 = vst [vmem:[%s5549_s23 + $0xa88] sm:$0xff] %v799_v17  ;;  %v803_v19 = vld [vmem:[%s5541_s22 + $0x1528] sm:$0xff] }
  0xb9   : > { %802 = vst [vmem:[%s5549_s23 + $0xa90] sm:$0xff] %v801_v18  ;;  %v805_v20 = vld [vmem:[%s5541_s22 + $0x1540] sm:$0xff]  ;;  %v807_v21 = vld [vmem:[%s5541_s22 + $0x1548] sm:$0xff]  ;;  %804 = vst [vmem:[%s5549_s23 + $0xa98] sm:$0xff] %v803_v19 }
  0xba   : > { %806 = vst [vmem:[%s5549_s23 + $0xaa0] sm:$0xff] %v805_v20  ;;  %808 = vst [vmem:[%s5549_s23 + $0xaa8] sm:$0xff] %v807_v21  ;;  %v809_v22 = vld [vmem:[%s5541_s22 + $0x1560] sm:$0xff]  ;;  %v811_v23 = vld [vmem:[%s5541_s22 + $0x1568] sm:$0xff] }
  0xbb   : > { %v813_v24 = vld [vmem:[%s5541_s22 + $0x1580] sm:$0xff]  ;;  %810 = vst [vmem:[%s5549_s23 + $0xab0] sm:$0xff] %v809_v22  ;;  %812 = vst [vmem:[%s5549_s23 + $0xab8] sm:$0xff] %v811_v23  ;;  %v815_v25 = vld [vmem:[%s5541_s22 + $0x1588] sm:$0xff] }
  0xbc   : > { %814 = vst [vmem:[%s5549_s23 + $0xac0] sm:$0xff] %v813_v24  ;;  %v817_v26 = vld [vmem:[%s5541_s22 + $0x15a0] sm:$0xff]  ;;  %v819_v27 = vld [vmem:[%s5541_s22 + $0x15a8] sm:$0xff]  ;;  %816 = vst [vmem:[%s5549_s23 + $0xac8] sm:$0xff] %v815_v25 }
  0xbd   : > { %818 = vst [vmem:[%s5549_s23 + $0xad0] sm:$0xff] %v817_v26  ;;  %820 = vst [vmem:[%s5549_s23 + $0xad8] sm:$0xff] %v819_v27  ;;  %v821_v28 = vld [vmem:[%s5541_s22 + $0x15c0] sm:$0xff]  ;;  %v823_v29 = vld [vmem:[%s5541_s22 + $0x15c8] sm:$0xff] }
  0xbe   : > { %v825_v30 = vld [vmem:[%s5541_s22 + $0x15e0] sm:$0xff]  ;;  %822 = vst [vmem:[%s5549_s23 + $0xae0] sm:$0xff] %v821_v28  ;;  %824 = vst [vmem:[%s5549_s23 + $0xae8] sm:$0xff] %v823_v29  ;;  %v827_v31 = vld [vmem:[%s5541_s22 + $0x15e8] sm:$0xff] }
  0xbf   : > { %826 = vst [vmem:[%s5549_s23 + $0xaf0] sm:$0xff] %v825_v30  ;;  %v829_v32 = vld [vmem:[%s5541_s22 + $0x1600] sm:$0xff]  ;;  %v831_v33 = vld [vmem:[%s5541_s22 + $0x1608] sm:$0xff]  ;;  %828 = vst [vmem:[%s5549_s23 + $0xaf8] sm:$0xff] %v827_v31 }
  0xc0   : > { %830 = vst [vmem:[%s5549_s23 + $0xb00] sm:$0xff] %v829_v32  ;;  %832 = vst [vmem:[%s5549_s23 + $0xb08] sm:$0xff] %v831_v33  ;;  %v833_v34 = vld [vmem:[%s5541_s22 + $0x1620] sm:$0xff]  ;;  %v835_v35 = vld [vmem:[%s5541_s22 + $0x1628] sm:$0xff] }
  0xc1   : > { %v837_v36 = vld [vmem:[%s5541_s22 + $0x1640] sm:$0xff]  ;;  %834 = vst [vmem:[%s5549_s23 + $0xb10] sm:$0xff] %v833_v34  ;;  %836 = vst [vmem:[%s5549_s23 + $0xb18] sm:$0xff] %v835_v35  ;;  %v839_v37 = vld [vmem:[%s5541_s22 + $0x1648] sm:$0xff] }
  0xc2   : > { %838 = vst [vmem:[%s5549_s23 + $0xb20] sm:$0xff] %v837_v36  ;;  %v841_v38 = vld [vmem:[%s5541_s22 + $0x1660] sm:$0xff]  ;;  %v843_v39 = vld [vmem:[%s5541_s22 + $0x1668] sm:$0xff]  ;;  %840 = vst [vmem:[%s5549_s23 + $0xb28] sm:$0xff] %v839_v37 }
  0xc3   : > { %842 = vst [vmem:[%s5549_s23 + $0xb30] sm:$0xff] %v841_v38  ;;  %844 = vst [vmem:[%s5549_s23 + $0xb38] sm:$0xff] %v843_v39  ;;  %v845_v40 = vld [vmem:[%s5541_s22 + $0x1680] sm:$0xff]  ;;  %v847_v41 = vld [vmem:[%s5541_s22 + $0x1688] sm:$0xff] }
  0xc4   : > { %v849_v42 = vld [vmem:[%s5541_s22 + $0x16a0] sm:$0xff]  ;;  %846 = vst [vmem:[%s5549_s23 + $0xb40] sm:$0xff] %v845_v40  ;;  %848 = vst [vmem:[%s5549_s23 + $0xb48] sm:$0xff] %v847_v41  ;;  %v851_v43 = vld [vmem:[%s5541_s22 + $0x16a8] sm:$0xff] }
  0xc5   : > { %850 = vst [vmem:[%s5549_s23 + $0xb50] sm:$0xff] %v849_v42  ;;  %v853_v44 = vld [vmem:[%s5541_s22 + $0x16c0] sm:$0xff]  ;;  %v855_v45 = vld [vmem:[%s5541_s22 + $0x16c8] sm:$0xff]  ;;  %852 = vst [vmem:[%s5549_s23 + $0xb58] sm:$0xff] %v851_v43 }
  0xc6   : > { %854 = vst [vmem:[%s5549_s23 + $0xb60] sm:$0xff] %v853_v44  ;;  %856 = vst [vmem:[%s5549_s23 + $0xb68] sm:$0xff] %v855_v45  ;;  %v857_v46 = vld [vmem:[%s5541_s22 + $0x16e0] sm:$0xff]  ;;  %v859_v47 = vld [vmem:[%s5541_s22 + $0x16e8] sm:$0xff] }
  0xc7   : > { %v861_v48 = vld [vmem:[%s5541_s22 + $0x1700] sm:$0xff]  ;;  %858 = vst [vmem:[%s5549_s23 + $0xb70] sm:$0xff] %v857_v46  ;;  %860 = vst [vmem:[%s5549_s23 + $0xb78] sm:$0xff] %v859_v47  ;;  %v863_v49 = vld [vmem:[%s5541_s22 + $0x1708] sm:$0xff] }
  0xc8   : > { %862 = vst [vmem:[%s5549_s23 + $0xb80] sm:$0xff] %v861_v48  ;;  %v865_v50 = vld [vmem:[%s5541_s22 + $0x1720] sm:$0xff]  ;;  %v867_v51 = vld [vmem:[%s5541_s22 + $0x1728] sm:$0xff]  ;;  %864 = vst [vmem:[%s5549_s23 + $0xb88] sm:$0xff] %v863_v49 }
  0xc9   : > { %866 = vst [vmem:[%s5549_s23 + $0xb90] sm:$0xff] %v865_v50  ;;  %868 = vst [vmem:[%s5549_s23 + $0xb98] sm:$0xff] %v867_v51  ;;  %v869_v52 = vld [vmem:[%s5541_s22 + $0x1740] sm:$0xff]  ;;  %v871_v53 = vld [vmem:[%s5541_s22 + $0x1748] sm:$0xff] }
  0xca   : > { %v873_v54 = vld [vmem:[%s5541_s22 + $0x1760] sm:$0xff]  ;;  %870 = vst [vmem:[%s5549_s23 + $0xba0] sm:$0xff] %v869_v52  ;;  %872 = vst [vmem:[%s5549_s23 + $0xba8] sm:$0xff] %v871_v53  ;;  %v875_v55 = vld [vmem:[%s5541_s22 + $0x1768] sm:$0xff] }
  0xcb   : > { %874 = vst [vmem:[%s5549_s23 + $0xbb0] sm:$0xff] %v873_v54  ;;  %v877_v56 = vld [vmem:[%s5541_s22 + $0x1780] sm:$0xff]  ;;  %v879_v57 = vld [vmem:[%s5541_s22 + $0x1788] sm:$0xff]  ;;  %876 = vst [vmem:[%s5549_s23 + $0xbb8] sm:$0xff] %v875_v55 }
  0xcc   : > { %878 = vst [vmem:[%s5549_s23 + $0xbc0] sm:$0xff] %v877_v56  ;;  %880 = vst [vmem:[%s5549_s23 + $0xbc8] sm:$0xff] %v879_v57  ;;  %v881_v58 = vld [vmem:[%s5541_s22 + $0x17a0] sm:$0xff]  ;;  %v883_v59 = vld [vmem:[%s5541_s22 + $0x17a8] sm:$0xff] }
  0xcd   : > { %v885_v60 = vld [vmem:[%s5541_s22 + $0x17c0] sm:$0xff]  ;;  %882 = vst [vmem:[%s5549_s23 + $0xbd0] sm:$0xff] %v881_v58  ;;  %884 = vst [vmem:[%s5549_s23 + $0xbd8] sm:$0xff] %v883_v59  ;;  %v887_v61 = vld [vmem:[%s5541_s22 + $0x17c8] sm:$0xff] }
  0xce   : > { %886 = vst [vmem:[%s5549_s23 + $0xbe0] sm:$0xff] %v885_v60  ;;  %v889_v62 = vld [vmem:[%s5541_s22 + $0x17e0] sm:$0xff]  ;;  %v891_v63 = vld [vmem:[%s5541_s22 + $0x17e8] sm:$0xff]  ;;  %888 = vst [vmem:[%s5549_s23 + $0xbe8] sm:$0xff] %v887_v61 }
  0xcf   : > { %890 = vst [vmem:[%s5549_s23 + $0xbf0] sm:$0xff] %v889_v62  ;;  %892 = vst [vmem:[%s5549_s23 + $0xbf8] sm:$0xff] %v891_v63  ;;  %v893_v0 = vld [vmem:[%s5541_s22 + $0x1800] sm:$0xff]  ;;  %v895_v1 = vld [vmem:[%s5541_s22 + $0x1808] sm:$0xff] }
  0xd0   : > { %v897_v2 = vld [vmem:[%s5541_s22 + $0x1820] sm:$0xff]  ;;  %894 = vst [vmem:[%s5549_s23 + $0xc00] sm:$0xff] %v893_v0  ;;  %896 = vst [vmem:[%s5549_s23 + $0xc08] sm:$0xff] %v895_v1  ;;  %v899_v3 = vld [vmem:[%s5541_s22 + $0x1828] sm:$0xff] }
  0xd1   : > { %898 = vst [vmem:[%s5549_s23 + $0xc10] sm:$0xff] %v897_v2  ;;  %v901_v4 = vld [vmem:[%s5541_s22 + $0x1840] sm:$0xff]  ;;  %v903_v5 = vld [vmem:[%s5541_s22 + $0x1848] sm:$0xff]  ;;  %900 = vst [vmem:[%s5549_s23 + $0xc18] sm:$0xff] %v899_v3 }
  0xd2   : > { %902 = vst [vmem:[%s5549_s23 + $0xc20] sm:$0xff] %v901_v4  ;;  %904 = vst [vmem:[%s5549_s23 + $0xc28] sm:$0xff] %v903_v5  ;;  %v905_v6 = vld [vmem:[%s5541_s22 + $0x1860] sm:$0xff]  ;;  %v907_v7 = vld [vmem:[%s5541_s22 + $0x1868] sm:$0xff] }
  0xd3   : > { %v909_v8 = vld [vmem:[%s5541_s22 + $0x1880] sm:$0xff]  ;;  %906 = vst [vmem:[%s5549_s23 + $0xc30] sm:$0xff] %v905_v6  ;;  %908 = vst [vmem:[%s5549_s23 + $0xc38] sm:$0xff] %v907_v7  ;;  %v911_v9 = vld [vmem:[%s5541_s22 + $0x1888] sm:$0xff] }
  0xd4   : > { %910 = vst [vmem:[%s5549_s23 + $0xc40] sm:$0xff] %v909_v8  ;;  %v913_v10 = vld [vmem:[%s5541_s22 + $0x18a0] sm:$0xff]  ;;  %v915_v11 = vld [vmem:[%s5541_s22 + $0x18a8] sm:$0xff]  ;;  %912 = vst [vmem:[%s5549_s23 + $0xc48] sm:$0xff] %v911_v9 }
  0xd5   : > { %914 = vst [vmem:[%s5549_s23 + $0xc50] sm:$0xff] %v913_v10  ;;  %916 = vst [vmem:[%s5549_s23 + $0xc58] sm:$0xff] %v915_v11  ;;  %v917_v12 = vld [vmem:[%s5541_s22 + $0x18c0] sm:$0xff]  ;;  %v919_v13 = vld [vmem:[%s5541_s22 + $0x18c8] sm:$0xff] }
  0xd6   : > { %v921_v14 = vld [vmem:[%s5541_s22 + $0x18e0] sm:$0xff]  ;;  %918 = vst [vmem:[%s5549_s23 + $0xc60] sm:$0xff] %v917_v12  ;;  %920 = vst [vmem:[%s5549_s23 + $0xc68] sm:$0xff] %v919_v13  ;;  %v923_v15 = vld [vmem:[%s5541_s22 + $0x18e8] sm:$0xff] }
  0xd7   : > { %922 = vst [vmem:[%s5549_s23 + $0xc70] sm:$0xff] %v921_v14  ;;  %v925_v16 = vld [vmem:[%s5541_s22 + $0x1900] sm:$0xff]  ;;  %v927_v17 = vld [vmem:[%s5541_s22 + $0x1908] sm:$0xff]  ;;  %924 = vst [vmem:[%s5549_s23 + $0xc78] sm:$0xff] %v923_v15 }
  0xd8   : > { %926 = vst [vmem:[%s5549_s23 + $0xc80] sm:$0xff] %v925_v16  ;;  %928 = vst [vmem:[%s5549_s23 + $0xc88] sm:$0xff] %v927_v17  ;;  %v929_v18 = vld [vmem:[%s5541_s22 + $0x1920] sm:$0xff]  ;;  %v931_v19 = vld [vmem:[%s5541_s22 + $0x1928] sm:$0xff] }
  0xd9   : > { %v933_v20 = vld [vmem:[%s5541_s22 + $0x1940] sm:$0xff]  ;;  %930 = vst [vmem:[%s5549_s23 + $0xc90] sm:$0xff] %v929_v18  ;;  %932 = vst [vmem:[%s5549_s23 + $0xc98] sm:$0xff] %v931_v19  ;;  %v935_v21 = vld [vmem:[%s5541_s22 + $0x1948] sm:$0xff] }
  0xda   : > { %934 = vst [vmem:[%s5549_s23 + $0xca0] sm:$0xff] %v933_v20  ;;  %v937_v22 = vld [vmem:[%s5541_s22 + $0x1960] sm:$0xff]  ;;  %v939_v23 = vld [vmem:[%s5541_s22 + $0x1968] sm:$0xff]  ;;  %936 = vst [vmem:[%s5549_s23 + $0xca8] sm:$0xff] %v935_v21 }
  0xdb   : > { %938 = vst [vmem:[%s5549_s23 + $0xcb0] sm:$0xff] %v937_v22  ;;  %940 = vst [vmem:[%s5549_s23 + $0xcb8] sm:$0xff] %v939_v23  ;;  %v941_v24 = vld [vmem:[%s5541_s22 + $0x1980] sm:$0xff]  ;;  %v943_v25 = vld [vmem:[%s5541_s22 + $0x1988] sm:$0xff] }
  0xdc   : > { %v945_v26 = vld [vmem:[%s5541_s22 + $0x19a0] sm:$0xff]  ;;  %942 = vst [vmem:[%s5549_s23 + $0xcc0] sm:$0xff] %v941_v24  ;;  %944 = vst [vmem:[%s5549_s23 + $0xcc8] sm:$0xff] %v943_v25  ;;  %v947_v27 = vld [vmem:[%s5541_s22 + $0x19a8] sm:$0xff] }
  0xdd   : > { %946 = vst [vmem:[%s5549_s23 + $0xcd0] sm:$0xff] %v945_v26  ;;  %v949_v28 = vld [vmem:[%s5541_s22 + $0x19c0] sm:$0xff]  ;;  %v951_v29 = vld [vmem:[%s5541_s22 + $0x19c8] sm:$0xff]  ;;  %948 = vst [vmem:[%s5549_s23 + $0xcd8] sm:$0xff] %v947_v27 }
  0xde   : > { %950 = vst [vmem:[%s5549_s23 + $0xce0] sm:$0xff] %v949_v28  ;;  %952 = vst [vmem:[%s5549_s23 + $0xce8] sm:$0xff] %v951_v29  ;;  %v953_v30 = vld [vmem:[%s5541_s22 + $0x19e0] sm:$0xff]  ;;  %v955_v31 = vld [vmem:[%s5541_s22 + $0x19e8] sm:$0xff] }
  0xdf   : > { %v957_v32 = vld [vmem:[%s5541_s22 + $0x1a00] sm:$0xff]  ;;  %954 = vst [vmem:[%s5549_s23 + $0xcf0] sm:$0xff] %v953_v30  ;;  %956 = vst [vmem:[%s5549_s23 + $0xcf8] sm:$0xff] %v955_v31  ;;  %v959_v33 = vld [vmem:[%s5541_s22 + $0x1a08] sm:$0xff] }
  0xe0   : > { %958 = vst [vmem:[%s5549_s23 + $0xd00] sm:$0xff] %v957_v32  ;;  %v961_v34 = vld [vmem:[%s5541_s22 + $0x1a20] sm:$0xff]  ;;  %v963_v35 = vld [vmem:[%s5541_s22 + $0x1a28] sm:$0xff]  ;;  %960 = vst [vmem:[%s5549_s23 + $0xd08] sm:$0xff] %v959_v33 }
  0xe1   : > { %962 = vst [vmem:[%s5549_s23 + $0xd10] sm:$0xff] %v961_v34  ;;  %964 = vst [vmem:[%s5549_s23 + $0xd18] sm:$0xff] %v963_v35  ;;  %v965_v36 = vld [vmem:[%s5541_s22 + $0x1a40] sm:$0xff]  ;;  %v967_v37 = vld [vmem:[%s5541_s22 + $0x1a48] sm:$0xff] }
  0xe2   : > { %v969_v38 = vld [vmem:[%s5541_s22 + $0x1a60] sm:$0xff]  ;;  %966 = vst [vmem:[%s5549_s23 + $0xd20] sm:$0xff] %v965_v36  ;;  %968 = vst [vmem:[%s5549_s23 + $0xd28] sm:$0xff] %v967_v37  ;;  %v971_v39 = vld [vmem:[%s5541_s22 + $0x1a68] sm:$0xff] }
  0xe3   : > { %970 = vst [vmem:[%s5549_s23 + $0xd30] sm:$0xff] %v969_v38  ;;  %v973_v40 = vld [vmem:[%s5541_s22 + $0x1a80] sm:$0xff]  ;;  %v975_v41 = vld [vmem:[%s5541_s22 + $0x1a88] sm:$0xff]  ;;  %972 = vst [vmem:[%s5549_s23 + $0xd38] sm:$0xff] %v971_v39 }
  0xe4   : > { %974 = vst [vmem:[%s5549_s23 + $0xd40] sm:$0xff] %v973_v40  ;;  %976 = vst [vmem:[%s5549_s23 + $0xd48] sm:$0xff] %v975_v41  ;;  %v977_v42 = vld [vmem:[%s5541_s22 + $0x1aa0] sm:$0xff]  ;;  %v979_v43 = vld [vmem:[%s5541_s22 + $0x1aa8] sm:$0xff] }
  0xe5   : > { %v981_v44 = vld [vmem:[%s5541_s22 + $0x1ac0] sm:$0xff]  ;;  %978 = vst [vmem:[%s5549_s23 + $0xd50] sm:$0xff] %v977_v42  ;;  %980 = vst [vmem:[%s5549_s23 + $0xd58] sm:$0xff] %v979_v43  ;;  %v983_v45 = vld [vmem:[%s5541_s22 + $0x1ac8] sm:$0xff] }
  0xe6   : > { %982 = vst [vmem:[%s5549_s23 + $0xd60] sm:$0xff] %v981_v44  ;;  %984 = vst [vmem:[%s5549_s23 + $0xd68] sm:$0xff] %v983_v45 }
  0xe7 PF: > { %p4326_p5 = scmp.ge.s32.totalorder %s5489_s11, 1  ;;  %p989_p6 = scmp.lt.s32.totalorder %s5489_s11, 3 }
  0xe9   : > { %p990_p7 = pnand %p4326_p5, %p989_p6 }
  0xea   : > { %s996_s24 = sand.u32 (!%p990_p7), 1, %s5481_s9   ;;  %s4327_s18 = sshll.u32 (!%p990_p7), %s4320_s12, 2 }
  0xeb   : > { %993 = sbr.rel (%p990_p7) target bundleno = 875 (0x36b), region = 47  ;;  %p1019_p8 = scmp.lt.s32.totalorder (!%p990_p7), %s4327_s18, 7 }
  0xec   : > { %s4781_s29 = smul.u32 (!%p990_p7), 3440, %s996_s24 }
  0xee   : > { %s6428_s30 = scalar_lea.vmem (!%p990_p7), [#allocation2], %s4781_s29 }
  0xf0   : > { %v6411_v46 = vld [vmem:[%s7012_s0] sm:$0xff]  ;;  %v6416_v47 = vld [vmem:[%s7012_s0 + $0x8] sm:$0xff]  ;;  %vm3660_vm0 = vcmask 416768   ;;  %vm3664_vm1 = vcmask 1040384   ;;  %vm3665_vm2 = vcmask 1041408   ;;  %s7019_s18 = smov (!%p1019_p8, %s4327_s18), 7 }
  0xf1   : > { %v6420_v48 = vcombine.high %v6411_v46, %v6411_v46  ;;  %v6424_v49 = vcombine.high %v6416_v47, %v6416_v47  ;;  %v4807_v50 = vld [vmem:[%s6428_s30 + $0xe4] ss:$16 sps:$4 sm:$0xff]   ;;  %v4811_v52 = vld [vmem:[%s6428_s30 + $0xe0] ss:$16 sps:$4 sm:$0xff]   ;;  %s4328_s11 = sshll.u32 %s7019_s18, 3 }
  0xf2   : > { %v4809_v51 = vld [vmem:[%s6428_s30 + $0x2e4] ss:$16 sps:$4 sm:$0xff]   ;;  %3680 = vmatprep.subr.bf16.mxu0 %v4807_v50  ;;  %v4812_v53 = vld [vmem:[%s6428_s30 + $0x2e0] ss:$16 sps:$4 sm:$0xff]   ;;  %s6993_s20 = scalar_lea.vmem %s7014_s2, %s4328_s11 }
  0xf3   : > { %3712 = vmatprep.mubr.bf16.mxu0 %v6420_v48  ;;  %3753 = vmatprep.mubr.bf16.mxu1 %v6424_v49  ;;  %v4813_v54 = vld [vmem:[%s6428_s30 + $0xc4] ss:$16 sps:$4 sm:$0xff]   ;;  %v4817_v56 = vld [vmem:[%s6428_s30 + $0xc0] ss:$16 sps:$4 sm:$0xff]  }
  0xf4   : > { %3721 = vmatprep.subr.bf16.mxu1 %v4809_v51  ;;  %3681 = vmatpush1.bf16.msra.mxu0 %v4811_v52  ;;  %v4815_v55 = vld [vmem:[%s6428_s30 + $0x2c4] ss:$16 sps:$4 sm:$0xff]   ;;  %v4818_v57 = vld [vmem:[%s6428_s30 + $0x2c0] ss:$16 sps:$4 sm:$0xff]  }
  0xf5   : > { %3722 = vmatpush1.bf16.msra.mxu1 %v4812_v53  ;;  %3682 = vmatprep.subr.bf16.mxu0 %v4813_v54  ;;  %v4819_v58 = vld [vmem:[%s6428_s30 + $0xa4] ss:$16 sps:$4 sm:$0xff]   ;;  %v4823_v60 = vld [vmem:[%s6428_s30 + $0xa0] ss:$16 sps:$4 sm:$0xff]  }
  0xf6   : > { %3723 = vmatprep.subr.bf16.mxu1 %v4815_v55  ;;  %v4821_v59 = vld [vmem:[%s6428_s30 + $0x2a4] ss:$16 sps:$4 sm:$0xff]   ;;  %v4824_v61 = vld [vmem:[%s6428_s30 + $0x2a0] ss:$16 sps:$4 sm:$0xff]  }
  0xf7   : > { %v4825_v62 = vld [vmem:[%s6428_s30 + $0x84] ss:$16 sps:$4 sm:$0xff]   ;;  %v4829_v0 = vld [vmem:[%s6428_s30 + $0x80] ss:$16 sps:$4 sm:$0xff]  }
  0xf8   : > { %3683 = vmatpush1.bf16.msra.mxu0 %v4817_v56  ;;  %v4827_v63 = vld [vmem:[%s6428_s30 + $0x284] ss:$16 sps:$4 sm:$0xff]   ;;  %v4830_v1 = vld [vmem:[%s6428_s30 + $0x280] ss:$16 sps:$4 sm:$0xff]  }
  0xf9   : > { %3724 = vmatpush1.bf16.msra.mxu1 %v4818_v57  ;;  %3684 = vmatprep.subr.bf16.mxu0 %v4819_v58  ;;  %v4831_v2 = vld [vmem:[%s6428_s30 + $0x64] ss:$16 sps:$4 sm:$0xff]   ;;  %v4835_v4 = vld [vmem:[%s6428_s30 + $0x60] ss:$16 sps:$4 sm:$0xff]   ;;  %v6504_v57 = vld [vmem:[%s7012_s0 + $0x18] sm:$0xff]  ;;  %v6508_v58 = vcombine.low %v6411_v46, %v6411_v46 }
  0xfa   : > { %3725 = vmatprep.subr.bf16.mxu1 %v4821_v59  ;;  %v4833_v3 = vld [vmem:[%s6428_s30 + $0x264] ss:$16 sps:$4 sm:$0xff]   ;;  %v4836_v5 = vld [vmem:[%s6428_s30 + $0x260] ss:$16 sps:$4 sm:$0xff]   ;;  %v6512_v59 = vcombine.low %v6416_v47, %v6416_v47  ;;  %v6524_v47 = vcombine.high %v6504_v57, %v6504_v57 }
  0xfb   : > { %v4837_v6 = vld [vmem:[%s6428_s30 + $0x44] ss:$16 sps:$4 sm:$0xff]   ;;  %v4841_v8 = vld [vmem:[%s6428_s30 + $0x40] ss:$16 sps:$4 sm:$0xff]  }
  0xfc   : > { %3685 = vmatpush1.bf16.msra.mxu0 %v4823_v60  ;;  %v4839_v7 = vld [vmem:[%s6428_s30 + $0x244] ss:$16 sps:$4 sm:$0xff]   ;;  %v4842_v9 = vld [vmem:[%s6428_s30 + $0x240] ss:$16 sps:$4 sm:$0xff]  }
  0xfd   : > { %3726 = vmatpush1.bf16.msra.mxu1 %v4824_v61  ;;  %3686 = vmatprep.subr.bf16.mxu0 %v4825_v62  ;;  %v4843_v10 = vld [vmem:[%s6428_s30 + $0x24] ss:$16 sps:$4 sm:$0xff]   ;;  %v4847_v12 = vld [vmem:[%s6428_s30 + $0x20] ss:$16 sps:$4 sm:$0xff]  }
  0xfe   : > { %3727 = vmatprep.subr.bf16.mxu1 %v4827_v63  ;;  %v4845_v11 = vld [vmem:[%s6428_s30 + $0x224] ss:$16 sps:$4 sm:$0xff]   ;;  %v4848_v13 = vld [vmem:[%s6428_s30 + $0x220] ss:$16 sps:$4 sm:$0xff]  }
  0xff   : > { %v4849_v14 = vld [vmem:[%s6428_s30 + $0x4] ss:$16 sps:$4 sm:$0xff]   ;;  %v4853_v16 = vld [vmem:[%s6428_s30] ss:$16 sps:$4 sm:$0xff]  }
 0x100   : > { %3687 = vmatpush1.bf16.msra.mxu0 %v4829_v0  ;;  %v4851_v15 = vld [vmem:[%s6428_s30 + $0x204] ss:$16 sps:$4 sm:$0xff]   ;;  %v4854_v17 = vld [vmem:[%s6428_s30 + $0x200] ss:$16 sps:$4 sm:$0xff]  }
 0x101   : > { %3728 = vmatpush1.bf16.msra.mxu1 %v4830_v1  ;;  %3688 = vmatprep.subr.bf16.mxu0 %v4831_v2  ;;  %v4855_v18 = vld [vmem:[%s6428_s30 + $0x1e4] ss:$16 sps:$4 sm:$0xff]   ;;  %v4859_v20 = vld [vmem:[%s6428_s30 + $0x1e0] ss:$16 sps:$4 sm:$0xff]  }
 0x102   : > { %3729 = vmatprep.subr.bf16.mxu1 %v4833_v3  ;;  %v4857_v19 = vld [vmem:[%s6428_s30 + $0x3e4] ss:$16 sps:$4 sm:$0xff]   ;;  %v4860_v21 = vld [vmem:[%s6428_s30 + $0x3e0] ss:$16 sps:$4 sm:$0xff]  }
 0x103   : > { %v4861_v22 = vld [vmem:[%s6428_s30 + $0x1c4] ss:$16 sps:$4 sm:$0xff]   ;;  %v4865_v24 = vld [vmem:[%s6428_s30 + $0x1c0] ss:$16 sps:$4 sm:$0xff]  }
 0x104   : > { %3689 = vmatpush1.bf16.msra.mxu0 %v4835_v4  ;;  %v4863_v23 = vld [vmem:[%s6428_s30 + $0x3c4] ss:$16 sps:$4 sm:$0xff]   ;;  %v4866_v25 = vld [vmem:[%s6428_s30 + $0x3c0] ss:$16 sps:$4 sm:$0xff]  }
 0x105   : > { %3730 = vmatpush1.bf16.msra.mxu1 %v4836_v5  ;;  %3690 = vmatprep.subr.bf16.mxu0 %v4837_v6  ;;  %v4867_v26 = vld [vmem:[%s6428_s30 + $0x1a4] ss:$16 sps:$4 sm:$0xff]   ;;  %v4871_v28 = vld [vmem:[%s6428_s30 + $0x1a0] ss:$16 sps:$4 sm:$0xff]  }
 0x106   : > { %3731 = vmatprep.subr.bf16.mxu1 %v4839_v7  ;;  %v4869_v27 = vld [vmem:[%s6428_s30 + $0x3a4] ss:$16 sps:$4 sm:$0xff]   ;;  %v4872_v29 = vld [vmem:[%s6428_s30 + $0x3a0] ss:$16 sps:$4 sm:$0xff]  }
 0x107   : > { %v4873_v30 = vld [vmem:[%s6428_s30 + $0x184] ss:$16 sps:$4 sm:$0xff]   ;;  %v4877_v32 = vld [vmem:[%s6428_s30 + $0x180] ss:$16 sps:$4 sm:$0xff]  }
 0x108   : > { %3691 = vmatpush1.bf16.msra.mxu0 %v4841_v8  ;;  %v4875_v31 = vld [vmem:[%s6428_s30 + $0x384] ss:$16 sps:$4 sm:$0xff]   ;;  %v4878_v33 = vld [vmem:[%s6428_s30 + $0x380] ss:$16 sps:$4 sm:$0xff]  }
 0x109   : > { %3732 = vmatpush1.bf16.msra.mxu1 %v4842_v9  ;;  %3692 = vmatprep.subr.bf16.mxu0 %v4843_v10  ;;  %v4879_v34 = vld [vmem:[%s6428_s30 + $0x164] ss:$16 sps:$4 sm:$0xff]   ;;  %v4883_v36 = vld [vmem:[%s6428_s30 + $0x160] ss:$16 sps:$4 sm:$0xff]  }
 0x10a   : > { %3733 = vmatprep.subr.bf16.mxu1 %v4845_v11  ;;  %v4881_v35 = vld [vmem:[%s6428_s30 + $0x364] ss:$16 sps:$4 sm:$0xff]   ;;  %v4884_v37 = vld [vmem:[%s6428_s30 + $0x360] ss:$16 sps:$4 sm:$0xff]  }
 0x10b   : > { %v4885_v38 = vld [vmem:[%s6428_s30 + $0x144] ss:$16 sps:$4 sm:$0xff]   ;;  %v4889_v40 = vld [vmem:[%s6428_s30 + $0x140] ss:$16 sps:$4 sm:$0xff]  }
 0x10c   : > { %3693 = vmatpush1.bf16.msra.mxu0 %v4847_v12  ;;  %v4887_v39 = vld [vmem:[%s6428_s30 + $0x344] ss:$16 sps:$4 sm:$0xff]   ;;  %v4890_v41 = vld [vmem:[%s6428_s30 + $0x340] ss:$16 sps:$4 sm:$0xff]  }
 0x10d   : > { %3734 = vmatpush1.bf16.msra.mxu1 %v4848_v13  ;;  %3694 = vmatprep.subr.bf16.mxu0 %v4849_v14  ;;  %v4891_v42 = vld [vmem:[%s6428_s30 + $0x124] ss:$16 sps:$4 sm:$0xff]   ;;  %v4895_v44 = vld [vmem:[%s6428_s30 + $0x120] ss:$16 sps:$4 sm:$0xff]  }
 0x10e   : > { %3735 = vmatprep.subr.bf16.mxu1 %v4851_v15  ;;  %v4893_v43 = vld [vmem:[%s6428_s30 + $0x324] ss:$16 sps:$4 sm:$0xff]   ;;  %v4896_v45 = vld [vmem:[%s6428_s30 + $0x320] ss:$16 sps:$4 sm:$0xff]  }
 0x10f   : > { %v4897_v50 = vld [vmem:[%s6428_s30 + $0x104] ss:$16 sps:$4 sm:$0xff]   ;;  %v4901_v52 = vld [vmem:[%s6428_s30 + $0x100] ss:$16 sps:$4 sm:$0xff]  }
 0x110   : > { %3695 = vmatpush1.bf16.msra.mxu0 %v4853_v16  ;;  %v4899_v51 = vld [vmem:[%s6428_s30 + $0x304] ss:$16 sps:$4 sm:$0xff]   ;;  %v4902_v53 = vld [vmem:[%s6428_s30 + $0x300] ss:$16 sps:$4 sm:$0xff]  }
 0x111   : > { %3736 = vmatpush1.bf16.msra.mxu1 %v4854_v17  ;;  %3696 = vmatprep.subr.bf16.mxu0 %v4855_v18  ;;  %v4909_v54 = vld [vmem:[%s6428_s30 + $0x4e4] ss:$16 sps:$4 sm:$0xff]   ;;  %v4907_v60 = vld [vmem:[%s6428_s30 + $0x4e0] ss:$16 sps:$4 sm:$0xff]  }
 0x112   : > { %3737 = vmatprep.subr.bf16.mxu1 %v4857_v19  ;;  %v4912_v55 = vld [vmem:[%s6428_s30 + $0x6e4] ss:$16 sps:$4 sm:$0xff]   ;;  %v4910_v61 = vld [vmem:[%s6428_s30 + $0x6e0] ss:$16 sps:$4 sm:$0xff]  }
 0x113   : > { %v6499_v56 = vld [vmem:[%s7012_s0 + $0x10] sm:$0xff] }
 0x114   : > { %3697 = vmatpush2.bf16.msra.mxu0 %v4859_v20  ;;  %v4915_v62 = vld [vmem:[%s6428_s30 + $0x4c4] ss:$16 sps:$4 sm:$0xff]   ;;  %v6520_v46 = vcombine.high %v6499_v56, %v6499_v56  ;;  %v4913_v0 = vld [vmem:[%s6428_s30 + $0x4c0] ss:$16 sps:$4 sm:$0xff]  }
 0x115   : > { %3738 = vmatpush2.bf16.msra.mxu1 %v4860_v21  ;;  %3698 = vmatprep.subr.bf16.mxu0 %v4861_v22  ;;  %v4918_v63 = vld [vmem:[%s6428_s30 + $0x6c4] ss:$16 sps:$4 sm:$0xff]   ;;  %v4916_v1 = vld [vmem:[%s6428_s30 + $0x6c0] ss:$16 sps:$4 sm:$0xff]  }
 0x116   : > { %3739 = vmatprep.subr.bf16.mxu1 %v4863_v23  ;;  %v4921_v2 = vld [vmem:[%s6428_s30 + $0x4a4] ss:$16 sps:$4 sm:$0xff]   ;;  %v4919_v4 = vld [vmem:[%s6428_s30 + $0x4a0] ss:$16 sps:$4 sm:$0xff]  }
 0x117   : > { %v4924_v3 = vld [vmem:[%s6428_s30 + $0x6a4] ss:$16 sps:$4 sm:$0xff]   ;;  %v4922_v5 = vld [vmem:[%s6428_s30 + $0x6a0] ss:$16 sps:$4 sm:$0xff]  }
 0x118   : > { %3699 = vmatpush2.bf16.msra.mxu0 %v4865_v24  ;;  %v4927_v6 = vld [vmem:[%s6428_s30 + $0x484] ss:$16 sps:$4 sm:$0xff]   ;;  %v4925_v8 = vld [vmem:[%s6428_s30 + $0x480] ss:$16 sps:$4 sm:$0xff]  }
 0x119   : > { %3740 = vmatpush2.bf16.msra.mxu1 %v4866_v25  ;;  %3700 = vmatprep.subr.bf16.mxu0 %v4867_v26  ;;  %v4930_v7 = vld [vmem:[%s6428_s30 + $0x684] ss:$16 sps:$4 sm:$0xff]   ;;  %v4928_v9 = vld [vmem:[%s6428_s30 + $0x680] ss:$16 sps:$4 sm:$0xff]  }
 0x11a   : > { %3741 = vmatprep.subr.bf16.mxu1 %v4869_v27  ;;  %v4933_v10 = vld [vmem:[%s6428_s30 + $0x464] ss:$16 sps:$4 sm:$0xff]   ;;  %v4931_v12 = vld [vmem:[%s6428_s30 + $0x460] ss:$16 sps:$4 sm:$0xff]  }
 0x11b   : > { %v4936_v11 = vld [vmem:[%s6428_s30 + $0x664] ss:$16 sps:$4 sm:$0xff]   ;;  %v4934_v13 = vld [vmem:[%s6428_s30 + $0x660] ss:$16 sps:$4 sm:$0xff]  }
 0x11c   : > { %3701 = vmatpush2.bf16.msra.mxu0 %v4871_v28  ;;  %v4939_v14 = vld [vmem:[%s6428_s30 + $0x444] ss:$16 sps:$4 sm:$0xff]   ;;  %v4937_v16 = vld [vmem:[%s6428_s30 + $0x440] ss:$16 sps:$4 sm:$0xff]  }
 0x11d   : > { %3742 = vmatpush2.bf16.msra.mxu1 %v4872_v29  ;;  %3702 = vmatprep.subr.bf16.mxu0 %v4873_v30  ;;  %v4942_v15 = vld [vmem:[%s6428_s30 + $0x644] ss:$16 sps:$4 sm:$0xff]   ;;  %v4940_v17 = vld [vmem:[%s6428_s30 + $0x640] ss:$16 sps:$4 sm:$0xff]  }
 0x11e   : > { %3743 = vmatprep.subr.bf16.mxu1 %v4875_v31  ;;  %v4945_v18 = vld [vmem:[%s6428_s30 + $0x424] ss:$16 sps:$4 sm:$0xff]   ;;  %v4943_v20 = vld [vmem:[%s6428_s30 + $0x420] ss:$16 sps:$4 sm:$0xff]  }
 0x11f   : > { %v4948_v19 = vld [vmem:[%s6428_s30 + $0x624] ss:$16 sps:$4 sm:$0xff]   ;;  %v4946_v21 = vld [vmem:[%s6428_s30 + $0x620] ss:$16 sps:$4 sm:$0xff]  }
 0x120   : > { %3703 = vmatpush2.bf16.msra.mxu0 %v4877_v32  ;;  %v4951_v22 = vld [vmem:[%s6428_s30 + $0x404] ss:$16 sps:$4 sm:$0xff]   ;;  %v4949_v24 = vld [vmem:[%s6428_s30 + $0x400] ss:$16 sps:$4 sm:$0xff]  }
 0x121   : > { %3744 = vmatpush2.bf16.msra.mxu1 %v4878_v33  ;;  %3704 = vmatprep.subr.bf16.mxu0 %v4879_v34  ;;  %v4954_v23 = vld [vmem:[%s6428_s30 + $0x604] ss:$16 sps:$4 sm:$0xff]   ;;  %v4952_v25 = vld [vmem:[%s6428_s30 + $0x600] ss:$16 sps:$4 sm:$0xff]  }
 0x122   : > { %3745 = vmatprep.subr.bf16.mxu1 %v4881_v35  ;;  %v4957_v26 = vld [vmem:[%s6428_s30 + $0x5e4] ss:$16 sps:$4 sm:$0xff]   ;;  %v4955_v28 = vld [vmem:[%s6428_s30 + $0x5e0] ss:$16 sps:$4 sm:$0xff]  }
 0x123   : > { %v4960_v27 = vld [vmem:[%s6428_s30 + $0x7e4] ss:$16 sps:$4 sm:$0xff]   ;;  %v4958_v29 = vld [vmem:[%s6428_s30 + $0x7e0] ss:$16 sps:$4 sm:$0xff]  }
 0x124   : > { %3705 = vmatpush2.bf16.msra.mxu0 %v4883_v36  ;;  %v4963_v30 = vld [vmem:[%s6428_s30 + $0x5c4] ss:$16 sps:$4 sm:$0xff]   ;;  %v4961_v32 = vld [vmem:[%s6428_s30 + $0x5c0] ss:$16 sps:$4 sm:$0xff]  }
 0x125   : > { %3746 = vmatpush2.bf16.msra.mxu1 %v4884_v37  ;;  %3706 = vmatprep.subr.bf16.mxu0 %v4885_v38  ;;  %v4966_v31 = vld [vmem:[%s6428_s30 + $0x7c4] ss:$16 sps:$4 sm:$0xff]   ;;  %v4964_v33 = vld [vmem:[%s6428_s30 + $0x7c0] ss:$16 sps:$4 sm:$0xff]  }
 0x126   : > { %3747 = vmatprep.subr.bf16.mxu1 %v4887_v39  ;;  %v4969_v34 = vld [vmem:[%s6428_s30 + $0x5a4] ss:$16 sps:$4 sm:$0xff]   ;;  %v4967_v36 = vld [vmem:[%s6428_s30 + $0x5a0] ss:$16 sps:$4 sm:$0xff]  }
 0x127   : > { %v4972_v35 = vld [vmem:[%s6428_s30 + $0x7a4] ss:$16 sps:$4 sm:$0xff]   ;;  %v4970_v37 = vld [vmem:[%s6428_s30 + $0x7a0] ss:$16 sps:$4 sm:$0xff]  }
 0x128   : > { %3707 = vmatpush2.bf16.msra.mxu0 %v4889_v40  ;;  %v4975_v38 = vld [vmem:[%s6428_s30 + $0x584] ss:$16 sps:$4 sm:$0xff]   ;;  %v4973_v40 = vld [vmem:[%s6428_s30 + $0x580] ss:$16 sps:$4 sm:$0xff]  }
 0x129   : > { %3748 = vmatpush2.bf16.msra.mxu1 %v4890_v41  ;;  %3708 = vmatprep.subr.bf16.mxu0 %v4891_v42  ;;  %v4978_v39 = vld [vmem:[%s6428_s30 + $0x784] ss:$16 sps:$4 sm:$0xff]   ;;  %v4976_v41 = vld [vmem:[%s6428_s30 + $0x780] ss:$16 sps:$4 sm:$0xff]  }
 0x12a   : > { %3749 = vmatprep.subr.bf16.mxu1 %v4893_v43  ;;  %v4981_v42 = vld [vmem:[%s6428_s30 + $0x564] ss:$16 sps:$4 sm:$0xff]  }
 0x12b   : > { %v4984_v43 = vld [vmem:[%s6428_s30 + $0x764] ss:$16 sps:$4 sm:$0xff]  }
 0x12c   : > { %3709 = vmatpush2.bf16.msra.mxu0 %v4895_v44  ;;  %v4979_v44 = vld [vmem:[%s6428_s30 + $0x560] ss:$16 sps:$4 sm:$0xff]  }
 0x12d   : > { %3750 = vmatpush2.bf16.msra.mxu1 %v4896_v45  ;;  %3710 = vmatprep.subr.bf16.mxu0 %v4897_v50  ;;  %v4982_v45 = vld [vmem:[%s6428_s30 + $0x760] ss:$16 sps:$4 sm:$0xff]   ;;  %v4987_v50 = vld [vmem:[%s6428_s30 + $0x544] ss:$16 sps:$4 sm:$0xff]  }
 0x12e   : > { %3751 = vmatprep.subr.bf16.mxu1 %v4899_v51  ;;  %v4990_v51 = vld [vmem:[%s6428_s30 + $0x744] ss:$16 sps:$4 sm:$0xff]  }
 0x130   : > { %3711 = vmatpush2.bf16.msra.mxu0 %v4901_v52  ;;  %v4985_v52 = vld [vmem:[%s6428_s30 + $0x540] ss:$16 sps:$4 sm:$0xff]  }
 0x131   : > { %3752 = vmatpush2.bf16.msra.mxu1 %v4902_v53  ;;  %3762 = vmatprep.subr.bf16.mxu0 %v4909_v54  ;;  %v4988_v53 = vld [vmem:[%s6428_s30 + $0x740] ss:$16 sps:$4 sm:$0xff]   ;;  %v4993_v54 = vld [vmem:[%s6428_s30 + $0x524] ss:$16 sps:$4 sm:$0xff]  }
 0x132   : > { %3803 = vmatprep.subr.bf16.mxu1 %v4912_v55  ;;  %v4996_v55 = vld [vmem:[%s6428_s30 + $0x724] ss:$16 sps:$4 sm:$0xff]  }
 0x133   : > { %3713 = vmatmul.mubr.bf16.vlgmr.msra.gmra.mxu0 %v6508_v58 }
 0x134   : > { %3754 = vmatmul.mubr.bf16.vlgmr.msra.gmra.mxu1 %v6512_v59  ;;  %3763 = vmatpush1.bf16.msra.mxu0 %v4907_v60  ;;  %v4991_v60 = vld [vmem:[%s6428_s30 + $0x520] ss:$16 sps:$4 sm:$0xff]  }
 0x135   : > { %3804 = vmatpush1.bf16.msra.mxu1 %v4910_v61  ;;  %3764 = vmatprep.subr.bf16.mxu0 %v4915_v62  ;;  %v4994_v61 = vld [vmem:[%s6428_s30 + $0x720] ss:$16 sps:$4 sm:$0xff]   ;;  %v4999_v62 = vld [vmem:[%s6428_s30 + $0x504] ss:$16 sps:$4 sm:$0xff]  }
 0x136   : > { %3805 = vmatprep.subr.bf16.mxu1 %v4918_v63  ;;  %3794 = vmatprep.mubr.bf16.mxu0 %v6520_v46  ;;  %v5002_v63 = vld [vmem:[%s6428_s30 + $0x704] ss:$16 sps:$4 sm:$0xff]  }
 0x137   : > { %3835 = vmatprep.mubr.bf16.mxu1 %v6524_v47 }
 0x138   : > { %3765 = vmatpush1.bf16.msra.mxu0 %v4913_v0  ;;  %v4997_v0 = vld [vmem:[%s6428_s30 + $0x500] ss:$16 sps:$4 sm:$0xff]  }
 0x139   : > { %3806 = vmatpush1.bf16.msra.mxu1 %v4916_v1  ;;  %3766 = vmatprep.subr.bf16.mxu0 %v4921_v2  ;;  %v5000_v1 = vld [vmem:[%s6428_s30 + $0x700] ss:$16 sps:$4 sm:$0xff]   ;;  %v5009_v2 = vld [vmem:[%s6428_s30 + $0x8e4] ss:$16 sps:$4 sm:$0xff]  }
 0x13a   : > { %3807 = vmatprep.subr.bf16.mxu1 %v4924_v3  ;;  %v5012_v3 = vld [vmem:[%s6428_s30 + $0xae4] ss:$16 sps:$4 sm:$0xff]  }
 0x13c   : > { %3767 = vmatpush1.bf16.msra.mxu0 %v4919_v4  ;;  %v6592_v4 = vcombine.low %v6499_v56, %v6499_v56  ;;  %v6608_v56 = vld [vmem:[%s7012_s0 + $0x28] sm:$0xff] }
 0x13d   : > { %3808 = vmatpush1.bf16.msra.mxu1 %v4922_v5  ;;  %3768 = vmatprep.subr.bf16.mxu0 %v4927_v6  ;;  %v6596_v5 = vcombine.low %v6504_v57, %v6504_v57  ;;  %v5007_v6 = vld [vmem:[%s6428_s30 + $0x8e0] ss:$16 sps:$4 sm:$0xff]   ;;  %v5015_v57 = vld [vmem:[%s6428_s30 + $0x8c4] ss:$16 sps:$4 sm:$0xff]  }
 0x13e   : > { %3809 = vmatprep.subr.bf16.mxu1 %v4930_v7  ;;  %v5010_v7 = vld [vmem:[%s6428_s30 + $0xae0] ss:$16 sps:$4 sm:$0xff]  }
 0x140   : > { %3769 = vmatpush1.bf16.msra.mxu0 %v4925_v8  ;;  %v6603_v8 = vld [vmem:[%s7012_s0 + $0x20] sm:$0xff] }
 0x141   : > { %3810 = vmatpush1.bf16.msra.mxu1 %v4928_v9  ;;  %3770 = vmatprep.subr.bf16.mxu0 %v4933_v10  ;;  %v5018_v9 = vld [vmem:[%s6428_s30 + $0xac4] ss:$16 sps:$4 sm:$0xff]   ;;  %v6614_v10 = vcombine.high %v6603_v8, %v6603_v8 }
 0x142   : > { %3811 = vmatprep.subr.bf16.mxu1 %v4936_v11  ;;  %v6618_v11 = vcombine.high %v6608_v56, %v6608_v56 }
 0x144   : > { %3771 = vmatpush1.bf16.msra.mxu0 %v4931_v12  ;;  %v5013_v12 = vld [vmem:[%s6428_s30 + $0x8c0] ss:$16 sps:$4 sm:$0xff]  }
 0x145   : > { %3812 = vmatpush1.bf16.msra.mxu1 %v4934_v13  ;;  %3772 = vmatprep.subr.bf16.mxu0 %v4939_v14  ;;  %v5016_v13 = vld [vmem:[%s6428_s30 + $0xac0] ss:$16 sps:$4 sm:$0xff]   ;;  %v5021_v14 = vld [vmem:[%s6428_s30 + $0x8a4] ss:$16 sps:$4 sm:$0xff]  }
 0x146   : > { %3813 = vmatprep.subr.bf16.mxu1 %v4942_v15  ;;  %v5024_v15 = vld [vmem:[%s6428_s30 + $0xaa4] ss:$16 sps:$4 sm:$0xff]  }
 0x148   : > { %3773 = vmatpush1.bf16.msra.mxu0 %v4937_v16  ;;  %v5019_v16 = vld [vmem:[%s6428_s30 + $0x8a0] ss:$16 sps:$4 sm:$0xff]  }
 0x149   : > { %3814 = vmatpush1.bf16.msra.mxu1 %v4940_v17  ;;  %3774 = vmatprep.subr.bf16.mxu0 %v4945_v18  ;;  %v5022_v17 = vld [vmem:[%s6428_s30 + $0xaa0] ss:$16 sps:$4 sm:$0xff]   ;;  %v5027_v18 = vld [vmem:[%s6428_s30 + $0x884] ss:$16 sps:$4 sm:$0xff]  }
 0x14a   : > { %3815 = vmatprep.subr.bf16.mxu1 %v4948_v19  ;;  %v5030_v19 = vld [vmem:[%s6428_s30 + $0xa84] ss:$16 sps:$4 sm:$0xff]  }
 0x14c   : > { %3775 = vmatpush1.bf16.msra.mxu0 %v4943_v20  ;;  %v5025_v20 = vld [vmem:[%s6428_s30 + $0x880] ss:$16 sps:$4 sm:$0xff]  }
 0x14d   : > { %3816 = vmatpush1.bf16.msra.mxu1 %v4946_v21  ;;  %3776 = vmatprep.subr.bf16.mxu0 %v4951_v22  ;;  %v5028_v21 = vld [vmem:[%s6428_s30 + $0xa80] ss:$16 sps:$4 sm:$0xff]   ;;  %v5033_v22 = vld [vmem:[%s6428_s30 + $0x864] ss:$16 sps:$4 sm:$0xff]  }
 0x14e   : > { %3817 = vmatprep.subr.bf16.mxu1 %v4954_v23  ;;  %v5036_v23 = vld [vmem:[%s6428_s30 + $0xa64] ss:$16 sps:$4 sm:$0xff]  }
 0x150   : > { %3777 = vmatpush1.bf16.msra.mxu0 %v4949_v24  ;;  %v5031_v24 = vld [vmem:[%s6428_s30 + $0x860] ss:$16 sps:$4 sm:$0xff]  }
 0x151   : > { %3818 = vmatpush1.bf16.msra.mxu1 %v4952_v25  ;;  %3778 = vmatprep.subr.bf16.mxu0 %v4957_v26  ;;  %v5034_v25 = vld [vmem:[%s6428_s30 + $0xa60] ss:$16 sps:$4 sm:$0xff]   ;;  %v5039_v26 = vld [vmem:[%s6428_s30 + $0x844] ss:$16 sps:$4 sm:$0xff]  }
 0x152   : > { %3819 = vmatprep.subr.bf16.mxu1 %v4960_v27  ;;  %v5042_v27 = vld [vmem:[%s6428_s30 + $0xa44] ss:$16 sps:$4 sm:$0xff]  }
 0x154   : > { %3779 = vmatpush2.bf16.msra.mxu0 %v4955_v28  ;;  %v5037_v28 = vld [vmem:[%s6428_s30 + $0x840] ss:$16 sps:$4 sm:$0xff]  }
 0x155   : > { %3820 = vmatpush2.bf16.msra.mxu1 %v4958_v29  ;;  %3780 = vmatprep.subr.bf16.mxu0 %v4963_v30  ;;  %v5040_v29 = vld [vmem:[%s6428_s30 + $0xa40] ss:$16 sps:$4 sm:$0xff]   ;;  %v5045_v30 = vld [vmem:[%s6428_s30 + $0x824] ss:$16 sps:$4 sm:$0xff]  }
 0x156   : > { %3821 = vmatprep.subr.bf16.mxu1 %v4966_v31  ;;  %v5048_v31 = vld [vmem:[%s6428_s30 + $0xa24] ss:$16 sps:$4 sm:$0xff]  }
 0x158   : > { %3781 = vmatpush2.bf16.msra.mxu0 %v4961_v32  ;;  %v5043_v32 = vld [vmem:[%s6428_s30 + $0x820] ss:$16 sps:$4 sm:$0xff]  }
 0x159   : > { %3822 = vmatpush2.bf16.msra.mxu1 %v4964_v33  ;;  %3782 = vmatprep.subr.bf16.mxu0 %v4969_v34  ;;  %v5046_v33 = vld [vmem:[%s6428_s30 + $0xa20] ss:$16 sps:$4 sm:$0xff]   ;;  %v5051_v34 = vld [vmem:[%s6428_s30 + $0x804] ss:$16 sps:$4 sm:$0xff]  }
 0x15a   : > { %3823 = vmatprep.subr.bf16.mxu1 %v4972_v35  ;;  %v5054_v35 = vld [vmem:[%s6428_s30 + $0xa04] ss:$16 sps:$4 sm:$0xff]  }
 0x15c   : > { %3783 = vmatpush2.bf16.msra.mxu0 %v4967_v36  ;;  %v5049_v36 = vld [vmem:[%s6428_s30 + $0x800] ss:$16 sps:$4 sm:$0xff]  }
 0x15d   : > { %3824 = vmatpush2.bf16.msra.mxu1 %v4970_v37  ;;  %3784 = vmatprep.subr.bf16.mxu0 %v4975_v38  ;;  %v5052_v37 = vld [vmem:[%s6428_s30 + $0xa00] ss:$16 sps:$4 sm:$0xff]   ;;  %v5057_v38 = vld [vmem:[%s6428_s30 + $0x9e4] ss:$16 sps:$4 sm:$0xff]  }
 0x15e   : > { %3825 = vmatprep.subr.bf16.mxu1 %v4978_v39  ;;  %v5060_v39 = vld [vmem:[%s6428_s30 + $0xbe4] ss:$16 sps:$4 sm:$0xff]  }
 0x160   : > { %3785 = vmatpush2.bf16.msra.mxu0 %v4973_v40  ;;  %v5055_v40 = vld [vmem:[%s6428_s30 + $0x9e0] ss:$16 sps:$4 sm:$0xff]  }
 0x161   : > { %3826 = vmatpush2.bf16.msra.mxu1 %v4976_v41  ;;  %3786 = vmatprep.subr.bf16.mxu0 %v4981_v42  ;;  %v5058_v41 = vld [vmem:[%s6428_s30 + $0xbe0] ss:$16 sps:$4 sm:$0xff]   ;;  %v5063_v42 = vld [vmem:[%s6428_s30 + $0x9c4] ss:$16 sps:$4 sm:$0xff]  }
 0x162   : > { %3827 = vmatprep.subr.bf16.mxu1 %v4984_v43  ;;  %v5066_v43 = vld [vmem:[%s6428_s30 + $0xbc4] ss:$16 sps:$4 sm:$0xff]  }
 0x164   : > { %3787 = vmatpush2.bf16.msra.mxu0 %v4979_v44  ;;  %v5061_v44 = vld [vmem:[%s6428_s30 + $0x9c0] ss:$16 sps:$4 sm:$0xff]  }
 0x165   : > { %3828 = vmatpush2.bf16.msra.mxu1 %v4982_v45  ;;  %3788 = vmatprep.subr.bf16.mxu0 %v4987_v50  ;;  %v5064_v45 = vld [vmem:[%s6428_s30 + $0xbc0] ss:$16 sps:$4 sm:$0xff]   ;;  %v5069_v50 = vld [vmem:[%s6428_s30 + $0x9a4] ss:$16 sps:$4 sm:$0xff]  }
 0x166   : > { %3829 = vmatprep.subr.bf16.mxu1 %v4990_v51  ;;  %v5072_v51 = vld [vmem:[%s6428_s30 + $0xba4] ss:$16 sps:$4 sm:$0xff]  }
 0x168   : > { %3789 = vmatpush2.bf16.msra.mxu0 %v4985_v52  ;;  %v5067_v52 = vld [vmem:[%s6428_s30 + $0x9a0] ss:$16 sps:$4 sm:$0xff]  }
 0x169   : > { %3830 = vmatpush2.bf16.msra.mxu1 %v4988_v53  ;;  %3790 = vmatprep.subr.bf16.mxu0 %v4993_v54  ;;  %v5070_v53 = vld [vmem:[%s6428_s30 + $0xba0] ss:$16 sps:$4 sm:$0xff]   ;;  %v5075_v54 = vld [vmem:[%s6428_s30 + $0x984] ss:$16 sps:$4 sm:$0xff]  }
 0x16a   : > { %3831 = vmatprep.subr.bf16.mxu1 %v4996_v55  ;;  %v5078_v55 = vld [vmem:[%s6428_s30 + $0xb84] ss:$16 sps:$4 sm:$0xff]  }
 0x16c   : > { %3791 = vmatpush2.bf16.msra.mxu0 %v4991_v60  ;;  %v5073_v60 = vld [vmem:[%s6428_s30 + $0x980] ss:$16 sps:$4 sm:$0xff]  }
 0x16d   : > { %3832 = vmatpush2.bf16.msra.mxu1 %v4994_v61  ;;  %3792 = vmatprep.subr.bf16.mxu0 %v4999_v62  ;;  %v5076_v61 = vld [vmem:[%s6428_s30 + $0xb80] ss:$16 sps:$4 sm:$0xff]   ;;  %v5081_v62 = vld [vmem:[%s6428_s30 + $0x964] ss:$16 sps:$4 sm:$0xff]  }
 0x16e   : > { %3833 = vmatprep.subr.bf16.mxu1 %v5002_v63  ;;  %v5084_v63 = vld [vmem:[%s6428_s30 + $0xb64] ss:$16 sps:$4 sm:$0xff]  }
 0x170   : > { %3793 = vmatpush2.bf16.msra.mxu0 %v4997_v0  ;;  %v5079_v0 = vld [vmem:[%s6428_s30 + $0x960] ss:$16 sps:$4 sm:$0xff]  }
 0x171   : > { %3834 = vmatpush2.bf16.msra.mxu1 %v5000_v1  ;;  %3844 = vmatprep.subr.bf16.mxu0 %v5009_v2  ;;  %v5082_v1 = vld [vmem:[%s6428_s30 + $0xb60] ss:$16 sps:$4 sm:$0xff]   ;;  %v5087_v2 = vld [vmem:[%s6428_s30 + $0x944] ss:$16 sps:$4 sm:$0xff]  }
 0x172   : > { %3885 = vmatprep.subr.bf16.mxu1 %v5012_v3  ;;  %v5090_v3 = vld [vmem:[%s6428_s30 + $0xb44] ss:$16 sps:$4 sm:$0xff]  }
 0x173   : > { %3795 = vmatmul.mubr.bf16.vlgmr.msra.gmra.mxu0 %v6592_v4 }
 0x174   : > { %3836 = vmatmul.mubr.bf16.vlgmr.msra.gmra.mxu1 %v6596_v5  ;;  %3845 = vmatpush1.bf16.msra.mxu0 %v5007_v6  ;;  %v5085_v6 = vld [vmem:[%s6428_s30 + $0x940] ss:$16 sps:$4 sm:$0xff]  }
 0x175   : > { %3886 = vmatpush1.bf16.msra.mxu1 %v5010_v7  ;;  %3846 = vmatprep.subr.bf16.mxu0 %v5015_v57  ;;  %v5088_v7 = vld [vmem:[%s6428_s30 + $0xb40] ss:$16 sps:$4 sm:$0xff]   ;;  %v5093_v57 = vld [vmem:[%s6428_s30 + $0x924] ss:$16 sps:$4 sm:$0xff]  }
 0x176   : > { %3887 = vmatprep.subr.bf16.mxu1 %v5018_v9  ;;  %3876 = vmatprep.mubr.bf16.mxu0 %v6614_v10  ;;  %v5096_v9 = vld [vmem:[%s6428_s30 + $0xb24] ss:$16 sps:$4 sm:$0xff]  }
 0x177   : > { %3917 = vmatprep.mubr.bf16.mxu1 %v6618_v11 }
 0x178   : > { %3847 = vmatpush1.bf16.msra.mxu0 %v5013_v12  ;;  %v5091_v12 = vld [vmem:[%s6428_s30 + $0x920] ss:$16 sps:$4 sm:$0xff]  }
 0x179   : > { %3888 = vmatpush1.bf16.msra.mxu1 %v5016_v13  ;;  %3848 = vmatprep.subr.bf16.mxu0 %v5021_v14  ;;  %v5094_v13 = vld [vmem:[%s6428_s30 + $0xb20] ss:$16 sps:$4 sm:$0xff]   ;;  %v5099_v14 = vld [vmem:[%s6428_s30 + $0x904] ss:$16 sps:$4 sm:$0xff]  }
 0x17a   : > { %3889 = vmatprep.subr.bf16.mxu1 %v5024_v15  ;;  %v5102_v15 = vld [vmem:[%s6428_s30 + $0xb04] ss:$16 sps:$4 sm:$0xff]  }
 0x17c   : > { %3849 = vmatpush1.bf16.msra.mxu0 %v5019_v16  ;;  %v5097_v16 = vld [vmem:[%s6428_s30 + $0x900] ss:$16 sps:$4 sm:$0xff]  }
 0x17d   : > { %3890 = vmatpush1.bf16.msra.mxu1 %v5022_v17  ;;  %3850 = vmatprep.subr.bf16.mxu0 %v5027_v18  ;;  %v5100_v17 = vld [vmem:[%s6428_s30 + $0xb00] ss:$16 sps:$4 sm:$0xff]   ;;  %v5109_v18 = vld [vmem:[%s6428_s30 + $0xce4] ss:$16 sps:$4 sm:$0xff]  }
 0x17e   : > { %3891 = vmatprep.subr.bf16.mxu1 %v5030_v19  ;;  %v5112_v19 = vld [vmem:[%s6428_s30 + $0xec] ss:$16 sps:$4 sm:$0xff]  }
 0x180   : > { %3851 = vmatpush1.bf16.msra.mxu0 %v5025_v20  ;;  %v5107_v20 = vld [vmem:[%s6428_s30 + $0xce0] ss:$16 sps:$4 sm:$0xff]  }
 0x181   : > { %3892 = vmatpush1.bf16.msra.mxu1 %v5028_v21  ;;  %3852 = vmatprep.subr.bf16.mxu0 %v5033_v22  ;;  %v6687_v21 = vcombine.low %v6603_v8, %v6603_v8  ;;  %v6691_v22 = vcombine.low %v6608_v56, %v6608_v56  ;;  %v5118_v8 = vld [vmem:[%s6428_s30 + $0xcc] ss:$16 sps:$4 sm:$0xff]  }
 0x182   : > { %3893 = vmatprep.subr.bf16.mxu1 %v5036_v23  ;;  %v5110_v23 = vld [vmem:[%s6428_s30 + $0xe8] ss:$16 sps:$4 sm:$0xff]  }
 0x184   : > { %3853 = vmatpush1.bf16.msra.mxu0 %v5031_v24  ;;  %v6697_v24 = vld [vmem:[%s7012_s0 + $0x30] sm:$0xff] }
 0x185   : > { %3894 = vmatpush1.bf16.msra.mxu1 %v5034_v25  ;;  %3854 = vmatprep.subr.bf16.mxu0 %v5039_v26  ;;  %v5115_v25 = vld [vmem:[%s6428_s30 + $0xcc4] ss:$16 sps:$4 sm:$0xff]   ;;  %v6703_v56 = vcombine.high %v6697_v24, %v6697_v24  ;;  %v5113_v26 = vld [vmem:[%s6428_s30 + $0xcc0] ss:$16 sps:$4 sm:$0xff]  }
 0x186   : > { %3895 = vmatprep.subr.bf16.mxu1 %v5042_v27  ;;  %v5116_v27 = vld [vmem:[%s6428_s30 + $0xc8] ss:$16 sps:$4 sm:$0xff]  }
 0x188   : > { %3855 = vmatpush1.bf16.msra.mxu0 %v5037_v28  ;;  %v5121_v28 = vld [vmem:[%s6428_s30 + $0xca4] ss:$16 sps:$4 sm:$0xff]  }
 0x189   : > { %3896 = vmatpush1.bf16.msra.mxu1 %v5040_v29  ;;  %3856 = vmatprep.subr.bf16.mxu0 %v5045_v30  ;;  %v5124_v29 = vld [vmem:[%s6428_s30 + $0xac] ss:$16 sps:$4 sm:$0xff]   ;;  %v5119_v30 = vld [vmem:[%s6428_s30 + $0xca0] ss:$16 sps:$4 sm:$0xff]  }
 0x18a   : > { %3897 = vmatprep.subr.bf16.mxu1 %v5048_v31  ;;  %v5122_v31 = vld [vmem:[%s6428_s30 + $0xa8] ss:$16 sps:$4 sm:$0xff]  }
 0x18c   : > { %3857 = vmatpush1.bf16.msra.mxu0 %v5043_v32  ;;  %v5127_v32 = vld [vmem:[%s6428_s30 + $0xc84] ss:$16 sps:$4 sm:$0xff]  }
 0x18d   : > { %3898 = vmatpush1.bf16.msra.mxu1 %v5046_v33  ;;  %3858 = vmatprep.subr.bf16.mxu0 %v5051_v34  ;;  %v5130_v33 = vld [vmem:[%s6428_s30 + $0x8c] ss:$16 sps:$4 sm:$0xff]   ;;  %v5125_v34 = vld [vmem:[%s6428_s30 + $0xc80] ss:$16 sps:$4 sm:$0xff]  }
 0x18e   : > { %3899 = vmatprep.subr.bf16.mxu1 %v5054_v35  ;;  %v5128_v35 = vld [vmem:[%s6428_s30 + $0x88] ss:$16 sps:$4 sm:$0xff]  }
 0x190   : > { %3859 = vmatpush1.bf16.msra.mxu0 %v5049_v36  ;;  %v5136_v36 = vld [vmem:[%s6428_s30 + $0x6c] ss:$16 sps:$4 sm:$0xff]  }
 0x191   : > { %3900 = vmatpush1.bf16.msra.mxu1 %v5052_v37  ;;  %3860 = vmatprep.subr.bf16.mxu0 %v5057_v38  ;;  %v5131_v37 = vld [vmem:[%s6428_s30 + $0xc60] ss:$16 sps:$4 sm:$0xff]   ;;  %v5134_v38 = vld [vmem:[%s6428_s30 + $0x68] ss:$16 sps:$4 sm:$0xff]  }
 0x192   : > { %3901 = vmatprep.subr.bf16.mxu1 %v5060_v39  ;;  %v5139_v39 = vld [vmem:[%s6428_s30 + $0xc44] ss:$16 sps:$4 sm:$0xff]  }
 0x194   : > { %3861 = vmatpush2.bf16.msra.mxu0 %v5055_v40  ;;  %v5142_v40 = vld [vmem:[%s6428_s30 + $0x4c] ss:$16 sps:$4 sm:$0xff]  }
 0x195   : > { %3902 = vmatpush2.bf16.msra.mxu1 %v5058_v41  ;;  %3862 = vmatprep.subr.bf16.mxu0 %v5063_v42  ;;  %v5137_v41 = vld [vmem:[%s6428_s30 + $0xc40] ss:$16 sps:$4 sm:$0xff]   ;;  %v5140_v42 = vld [vmem:[%s6428_s30 + $0x48] ss:$16 sps:$4 sm:$0xff]  }
 0x196   : > { %3903 = vmatprep.subr.bf16.mxu1 %v5066_v43  ;;  %v5145_v43 = vld [vmem:[%s6428_s30 + $0xc24] ss:$16 sps:$4 sm:$0xff]  }
 0x198   : > { %3863 = vmatpush2.bf16.msra.mxu0 %v5061_v44  ;;  %v5148_v44 = vld [vmem:[%s6428_s30 + $0x2c] ss:$16 sps:$4 sm:$0xff]  }
 0x199   : > { %3904 = vmatpush2.bf16.msra.mxu1 %v5064_v45  ;;  %3864 = vmatprep.subr.bf16.mxu0 %v5069_v50  ;;  %v1460_v45 = vld [vmem:[%s6428_s30 + $0xd60] sm:$0x33] }
 0x19a   : > { %3905 = vmatprep.subr.bf16.mxu1 %v5072_v51  ;;  %v5143_v50 = vld [vmem:[%s6428_s30 + $0xc20] ss:$16 sps:$4 sm:$0xff]   ;;  %v5146_v51 = vld [vmem:[%s6428_s30 + $0x28] ss:$16 sps:$4 sm:$0xff]  }
 0x19c   : > { %3865 = vmatpush2.bf16.msra.mxu0 %v5067_v52  ;;  %v5491_v52 = vmov 65535  }
 0x19d   : > { %3906 = vmatpush2.bf16.msra.mxu1 %v5070_v53  ;;  %3866 = vmatprep.subr.bf16.mxu0 %v5075_v54  ;;  %v3666_v53 = vsel %vm3664_vm1, 4294967295, %v5491_v52  ;;  %v5151_v54 = vld [vmem:[%s6428_s30 + $0xc04] ss:$16 sps:$4 sm:$0xff]  }
 0x19e   : > { %3907 = vmatprep.subr.bf16.mxu1 %v5078_v55  ;;  %v5154_v55 = vld [vmem:[%s6428_s30 + $0xc] ss:$16 sps:$4 sm:$0xff]  }
 0x1a0   : > { %3867 = vmatpush2.bf16.msra.mxu0 %v5073_v60  ;;  %v4772_v60 = vcombine.high %v1460_v45, %v1460_v45 }
 0x1a1   : > { %3908 = vmatpush2.bf16.msra.mxu1 %v5076_v61  ;;  %3868 = vmatprep.subr.bf16.mxu0 %v5081_v62  ;;  %v6735_v61 = vsel %vm3665_vm2, %v3666_v53, 0  ;;  %v5149_v62 = vld [vmem:[%s6428_s30 + $0xc00] ss:$16 sps:$4 sm:$0xff]  }
 0x1a2   : > { %3909 = vmatprep.subr.bf16.mxu1 %v5084_v63  ;;  %v5152_v63 = vld [vmem:[%s6428_s30 + $0x8] ss:$16 sps:$4 sm:$0xff]  }
 0x1a4   : > { %3869 = vmatpush2.bf16.msra.mxu0 %v5079_v0  ;;  %v4771_v0 = vcombine.low %v1460_v45, %v1460_v45 }
 0x1a5   : > { %3910 = vmatpush2.bf16.msra.mxu1 %v5082_v1  ;;  %3870 = vmatprep.subr.bf16.mxu0 %v5087_v2  ;;  %v3672_v1 = vand.u32 %v4772_v60, %v6735_v61  ;;  %v5159_v2 = vld [vmem:[%s6428_s30 + $0x1ec] ss:$16 sps:$4 sm:$0xff]  }
 0x1a6   : > { %3911 = vmatprep.subr.bf16.mxu1 %v5090_v3  ;;  %v5157_v3 = vld [vmem:[%s6428_s30 + $0x1e8] ss:$16 sps:$4 sm:$0xff]  }
 0x1a8   : > { %3871 = vmatpush2.bf16.msra.mxu0 %v5085_v6  ;;  %v3669_v6 = vand.u32 %v4771_v0, %v6735_v61 }
 0x1a9   : > { %3912 = vmatpush2.bf16.msra.mxu1 %v5088_v7  ;;  %3872 = vmatprep.subr.bf16.mxu0 %v5093_v57  ;;  %v5162_v7 = vld [vmem:[%s6428_s30 + $0xd44] ss:$16 sps:$4 sm:$0xff]   ;;  %v5165_v57 = vld [vmem:[%s6428_s30 + $0x1cc] ss:$16 sps:$4 sm:$0xff]  }
 0x1aa   : > { %3913 = vmatprep.subr.bf16.mxu1 %v5096_v9  ;;  %v5160_v9 = vld [vmem:[%s6428_s30 + $0xd40] ss:$16 sps:$4 sm:$0xff]  }
 0x1ac   : > { %3873 = vmatpush2.bf16.msra.mxu0 %v5091_v12  ;;  %v5163_v12 = vld [vmem:[%s6428_s30 + $0x1c8] ss:$16 sps:$4 sm:$0xff]  }
 0x1ad   : > { %3914 = vmatpush2.bf16.msra.mxu1 %v5094_v13  ;;  %3874 = vmatprep.subr.bf16.mxu0 %v5099_v14  ;;  %v5168_v13 = vld [vmem:[%s6428_s30 + $0xd24] ss:$16 sps:$4 sm:$0xff]   ;;  %v5171_v14 = vld [vmem:[%s6428_s30 + $0x1ac] ss:$16 sps:$4 sm:$0xff]  }
 0x1ae   : > { %3915 = vmatprep.subr.bf16.mxu1 %v5102_v15  ;;  %v5166_v15 = vld [vmem:[%s6428_s30 + $0xd20] ss:$16 sps:$4 sm:$0xff]  }
 0x1b0   : > { %3875 = vmatpush2.bf16.msra.mxu0 %v5097_v16  ;;  %v5169_v16 = vld [vmem:[%s6428_s30 + $0x1a8] ss:$16 sps:$4 sm:$0xff]  }
 0x1b1   : > { %3916 = vmatpush2.bf16.msra.mxu1 %v5100_v17  ;;  %3926 = vmatprep.subr.bf16.mxu0 %v5109_v18  ;;  %v5174_v17 = vld [vmem:[%s6428_s30 + $0xd04] ss:$16 sps:$4 sm:$0xff]   ;;  %v5177_v18 = vld [vmem:[%s6428_s30 + $0x18c] ss:$16 sps:$4 sm:$0xff]  }
 0x1b2   : > { %3967 = vmatprep.subr.bf16.mxu1 %v5112_v19  ;;  %v5172_v19 = vld [vmem:[%s6428_s30 + $0xd00] ss:$16 sps:$4 sm:$0xff]  }
 0x1b3   : > { %3877 = vmatmul.mubr.bf16.vlgmr.msra.gmra.mxu0 %v6687_v21 }
 0x1b4   : > { %3918 = vmatmul.mubr.bf16.vlgmr.msra.gmra.mxu1 %v6691_v22  ;;  %3927 = vmatpush1.bf16.msra.mxu0 %v5107_v20  ;;  %v5175_v20 = vld [vmem:[%s6428_s30 + $0x188] ss:$16 sps:$4 sm:$0xff]  }
 0x1b5   : > { %3968 = vmatpush1.bf16.msra.mxu1 %v5110_v23  ;;  %3928 = vmatprep.subr.bf16.mxu0 %v5115_v25  ;;  %v5182_v23 = vld [vmem:[%s6428_s30 + $0x16c] ss:$16 sps:$4 sm:$0xff]  }
 0x1b6   : > { %3969 = vmatprep.subr.bf16.mxu1 %v5118_v8  ;;  %4775 = vmatprep.mubr.msk.bf16.mxu0 %vm3660_vm0, %v6703_v56  ;;  %v5185_v25 = vld [vmem:[%s6428_s30 + $0x2ec] ss:$16 sps:$4 sm:$0xff]   ;;  %v6759_v8 = vcombine.low %v6697_v24, %v6697_v24 }
 0x1b7   : > { %3999 = vmatprep.mubr.bf16.mxu1 %v6420_v48  ;;  %v5133_v48 = vld [vmem:[%s6428_s30 + $0xc64] ss:$16 sps:$4 sm:$0xff]   ;;  %v5194_v24 = vld [vmem:[%s6428_s30 + $0x12c] ss:$16 sps:$4 sm:$0xff]  }
 0x1b8   : > { %3929 = vmatpush1.bf16.msra.mxu0 %v5113_v26  ;;  %v5180_v26 = vld [vmem:[%s6428_s30 + $0x168] ss:$16 sps:$4 sm:$0xff]  }
 0x1b9   : > { %3970 = vmatpush1.bf16.msra.mxu1 %v5116_v27  ;;  %3930 = vmatprep.subr.bf16.mxu0 %v5121_v28  ;;  %v5183_v27 = vld [vmem:[%s6428_s30 + $0x2e8] ss:$16 sps:$4 sm:$0xff]   ;;  %v5188_v28 = vld [vmem:[%s6428_s30 + $0x14c] ss:$16 sps:$4 sm:$0xff]  }
 0x1ba   : > { %3971 = vmatprep.subr.bf16.mxu1 %v5124_v29  ;;  %v5191_v29 = vld [vmem:[%s6428_s30 + $0x2cc] ss:$16 sps:$4 sm:$0xff]  }
 0x1bc   : > { %3931 = vmatpush1.bf16.msra.mxu0 %v5119_v30  ;;  %v5186_v30 = vld [vmem:[%s6428_s30 + $0x148] ss:$16 sps:$4 sm:$0xff]  }
 0x1bd   : > { %3972 = vmatpush1.bf16.msra.mxu1 %v5122_v31  ;;  %3932 = vmatprep.subr.bf16.mxu0 %v5127_v32  ;;  %v5189_v31 = vld [vmem:[%s6428_s30 + $0x2c8] ss:$16 sps:$4 sm:$0xff]   ;;  %v5197_v32 = vld [vmem:[%s6428_s30 + $0x2ac] ss:$16 sps:$4 sm:$0xff]  }
 0x1be   : > { %3973 = vmatprep.subr.bf16.mxu1 %v5130_v33  ;;  %v5192_v33 = vld [vmem:[%s6428_s30 + $0x128] ss:$16 sps:$4 sm:$0xff]  }
 0x1c0   : > { %3933 = vmatpush1.bf16.msra.mxu0 %v5125_v34  ;;  %v5195_v34 = vld [vmem:[%s6428_s30 + $0x2a8] ss:$16 sps:$4 sm:$0xff]  }
 0x1c1   : > { %3974 = vmatpush1.bf16.msra.mxu1 %v5128_v35  ;;  %3934 = vmatprep.subr.bf16.mxu0 %v5133_v48  ;;  %v5200_v35 = vld [vmem:[%s6428_s30 + $0x10c] ss:$16 sps:$4 sm:$0xff]  }
 0x1c2   : > { %3975 = vmatprep.subr.bf16.mxu1 %v5136_v36  ;;  %v5203_v48 = vld [vmem:[%s6428_s30 + $0x28c] ss:$16 sps:$4 sm:$0xff]   ;;  %v5198_v36 = vld [vmem:[%s6428_s30 + $0x108] ss:$16 sps:$4 sm:$0xff]  }
 0x1c4   : > { %3935 = vmatpush1.bf16.msra.mxu0 %v5131_v37  ;;  %v5201_v37 = vld [vmem:[%s6428_s30 + $0x288] ss:$16 sps:$4 sm:$0xff]  }
 0x1c5   : > { %3976 = vmatpush1.bf16.msra.mxu1 %v5134_v38  ;;  %3936 = vmatprep.subr.bf16.mxu0 %v5139_v39  ;;  %v5209_v38 = vld [vmem:[%s6428_s30 + $0x4ec] ss:$16 sps:$4 sm:$0xff]   ;;  %v5204_v39 = vld [vmem:[%s6428_s30 + $0x268] ss:$16 sps:$4 sm:$0xff]  }
 0x1c6   : > { %3977 = vmatprep.subr.bf16.mxu1 %v5142_v40  ;;  %v5207_v40 = vld [vmem:[%s6428_s30 + $0x4e8] ss:$16 sps:$4 sm:$0xff]  }
 0x1c8   : > { %3937 = vmatpush1.bf16.msra.mxu0 %v5137_v41  ;;  %v5212_v41 = vld [vmem:[%s6428_s30 + $0x24c] ss:$16 sps:$4 sm:$0xff]  }
 0x1c9   : > { %3978 = vmatpush1.bf16.msra.mxu1 %v5140_v42  ;;  %3938 = vmatprep.subr.bf16.mxu0 %v5145_v43  ;;  %v5215_v42 = vld [vmem:[%s6428_s30 + $0x4cc] ss:$16 sps:$4 sm:$0xff]   ;;  %v5210_v43 = vld [vmem:[%s6428_s30 + $0x248] ss:$16 sps:$4 sm:$0xff]  }
 0x1ca   : > { %3979 = vmatprep.subr.bf16.mxu1 %v5148_v44  ;;  %v5213_v44 = vld [vmem:[%s6428_s30 + $0x4c8] ss:$16 sps:$4 sm:$0xff]  }
 0x1cc   : > { %3939 = vmatpush1.bf16.msra.mxu0 %v5143_v50 }
 0x1cd   : > { %3980 = vmatpush1.bf16.msra.mxu1 %v5146_v51  ;;  %3940 = vmatprep.subr.bf16.mxu0 %v5151_v54  ;;  %v5218_v54 = vld [vmem:[%s6428_s30 + $0x22c] ss:$16 sps:$4 sm:$0xff]  }
 0x1ce   : > { %3981 = vmatprep.subr.bf16.mxu1 %v5154_v55  ;;  %v5221_v55 = vld [vmem:[%s6428_s30 + $0x4ac] ss:$16 sps:$4 sm:$0xff]  }
 0x1d0   : > { %3941 = vmatpush1.bf16.msra.mxu0 %v5149_v62  ;;  %v5216_v62 = vld [vmem:[%s6428_s30 + $0x228] ss:$16 sps:$4 sm:$0xff]  }
 0x1d1   : > { %3982 = vmatpush1.bf16.msra.mxu1 %v5152_v63  ;;  %3950 = vmatprep.subr.bf16.mxu0 %v3672_v1  ;;  %v5219_v63 = vld [vmem:[%s6428_s30 + $0x4a8] ss:$16 sps:$4 sm:$0xff]  }
 0x1d2   : > { %3983 = vmatprep.subr.bf16.mxu1 %v5159_v2 }
 0x1d4   : > { %3951 = vmatpush2.bf16.msra.mxu0 %v3669_v6  ;;  %v5227_v6 = vld [vmem:[%s6428_s30 + $0x48c] ss:$16 sps:$4 sm:$0xff]  }
 0x1d5   : > { %3984 = vmatpush2.bf16.msra.mxu1 %v5157_v3  ;;  %3952 = vmatprep.subr.bf16.mxu0 %v5162_v7  ;;  %v5224_v3 = vld [vmem:[%s6428_s30 + $0x20c] ss:$16 sps:$4 sm:$0xff]   ;;  %v5222_v7 = vld [vmem:[%s6428_s30 + $0x208] ss:$16 sps:$4 sm:$0xff]  }
 0x1d6   : > { %3985 = vmatprep.subr.bf16.mxu1 %v5165_v57  ;;  %v5230_v57 = vld [vmem:[%s6428_s30 + $0x3ec] ss:$16 sps:$4 sm:$0xff]  }
 0x1d8   : > { %3953 = vmatpush2.bf16.msra.mxu0 %v5160_v9  ;;  %v5233_v9 = vld [vmem:[%s6428_s30 + $0x46c] ss:$16 sps:$4 sm:$0xff]  }
 0x1d9   : > { %3986 = vmatpush2.bf16.msra.mxu1 %v5163_v12  ;;  %3954 = vmatprep.subr.bf16.mxu0 %v5168_v13  ;;  %v5228_v12 = vld [vmem:[%s6428_s30 + $0x3e8] ss:$16 sps:$4 sm:$0xff]  }
 0x1da   : > { %3987 = vmatprep.subr.bf16.mxu1 %v5171_v14  ;;  %v5231_v13 = vld [vmem:[%s6428_s30 + $0x468] ss:$16 sps:$4 sm:$0xff]   ;;  %v5236_v14 = vld [vmem:[%s6428_s30 + $0x3cc] ss:$16 sps:$4 sm:$0xff]  }
 0x1dc   : > { %3955 = vmatpush2.bf16.msra.mxu0 %v5166_v15  ;;  %v5239_v15 = vld [vmem:[%s6428_s30 + $0x44c] ss:$16 sps:$4 sm:$0xff]  }
 0x1dd   : > { %3988 = vmatpush2.bf16.msra.mxu1 %v5169_v16  ;;  %3956 = vmatprep.subr.bf16.mxu0 %v5174_v17  ;;  %v5234_v16 = vld [vmem:[%s6428_s30 + $0x3c8] ss:$16 sps:$4 sm:$0xff]  }
 0x1de   : > { %3989 = vmatprep.subr.bf16.mxu1 %v5177_v18  ;;  %v5237_v17 = vld [vmem:[%s6428_s30 + $0x448] ss:$16 sps:$4 sm:$0xff]   ;;  %v5242_v18 = vld [vmem:[%s6428_s30 + $0x3ac] ss:$16 sps:$4 sm:$0xff]  }
 0x1e0   : > { %3957 = vmatpush2.bf16.msra.mxu0 %v5172_v19  ;;  %v5245_v19 = vld [vmem:[%s6428_s30 + $0x42c] ss:$16 sps:$4 sm:$0xff]  }
 0x1e1   : > { %3990 = vmatpush2.bf16.msra.mxu1 %v5175_v20  ;;  %4008 = vmatprep.subr.bf16.mxu0 %v5185_v25  ;;  %v5240_v20 = vld [vmem:[%s6428_s30 + $0x3a8] ss:$16 sps:$4 sm:$0xff]   ;;  %v5248_v25 = vld [vmem:[%s6428_s30 + $0x38c] ss:$16 sps:$4 sm:$0xff]  }
 0x1e2   : > { %3991 = vmatprep.subr.bf16.mxu1 %v5182_v23  ;;  %v5243_v23 = vld [vmem:[%s6428_s30 + $0x428] ss:$16 sps:$4 sm:$0xff]  }
 0x1e3   : > { %3959 = vmatmul.mubr.bf16.vlgmr.msra.gmra.mxu0 %v6759_v8 }
 0x1e4   : > { %4009 = vmatpush1.bf16.msra.mxu0 %v5183_v27  ;;  %4040 = vmatprep.mubr.bf16.mxu0 %v6424_v49  ;;  %v5206_v49 = vld [vmem:[%s6428_s30 + $0x26c] ss:$16 sps:$4 sm:$0xff]   ;;  %v5246_v27 = vld [vmem:[%s6428_s30 + $0x388] ss:$16 sps:$4 sm:$0xff]  }
 0x1e5   : > { %3992 = vmatpush2.bf16.msra.mxu1 %v5180_v26  ;;  %4010 = vmatprep.subr.bf16.mxu0 %v5191_v29  ;;  %v5251_v26 = vld [vmem:[%s6428_s30 + $0x40c] ss:$16 sps:$4 sm:$0xff]  }
 0x1e6   : > { %3993 = vmatprep.subr.bf16.mxu1 %v5188_v28  ;;  %v5249_v28 = vld [vmem:[%s6428_s30 + $0x408] ss:$16 sps:$4 sm:$0xff]   ;;  %v5254_v29 = vld [vmem:[%s6428_s30 + $0x36c] ss:$16 sps:$4 sm:$0xff]  }
 0x1e8   : > { %4011 = vmatpush1.bf16.msra.mxu0 %v5189_v31  ;;  %v5252_v31 = vld [vmem:[%s6428_s30 + $0x368] ss:$16 sps:$4 sm:$0xff]  }
 0x1e9   : > { %3994 = vmatpush2.bf16.msra.mxu1 %v5186_v30  ;;  %4012 = vmatprep.subr.bf16.mxu0 %v5197_v32  ;;  %v5257_v30 = vld [vmem:[%s6428_s30 + $0x5ec] ss:$16 sps:$4 sm:$0xff]  }
 0x1ea   : > { %3995 = vmatprep.subr.bf16.mxu1 %v5194_v24  ;;  %v5255_v24 = vld [vmem:[%s6428_s30 + $0x5e8] ss:$16 sps:$4 sm:$0xff]   ;;  %v5260_v32 = vld [vmem:[%s6428_s30 + $0x34c] ss:$16 sps:$4 sm:$0xff]  }
 0x1ec   : > { %4013 = vmatpush1.bf16.msra.mxu0 %v5195_v34  ;;  %v5258_v34 = vld [vmem:[%s6428_s30 + $0x348] ss:$16 sps:$4 sm:$0xff]  }
 0x1ed   : > { %3996 = vmatpush2.bf16.msra.mxu1 %v5192_v33  ;;  %4014 = vmatprep.subr.bf16.mxu0 %v5203_v48  ;;  %v5263_v33 = vld [vmem:[%s6428_s30 + $0x5cc] ss:$16 sps:$4 sm:$0xff]  }
 0x1ee   : > { %3997 = vmatprep.subr.bf16.mxu1 %v5200_v35  ;;  %v5261_v35 = vld [vmem:[%s6428_s30 + $0x5c8] ss:$16 sps:$4 sm:$0xff]   ;;  %v5266_v48 = vld [vmem:[%s6428_s30 + $0x32c] ss:$16 sps:$4 sm:$0xff]  }
 0x1f0   : > { %4015 = vmatpush1.bf16.msra.mxu0 %v5201_v37  ;;  %v5264_v37 = vld [vmem:[%s6428_s30 + $0x328] ss:$16 sps:$4 sm:$0xff]  }
 0x1f1   : > { %3998 = vmatpush2.bf16.msra.mxu1 %v5198_v36  ;;  %4016 = vmatprep.subr.bf16.mxu0 %v5206_v49  ;;  %v5269_v36 = vld [vmem:[%s6428_s30 + $0x5ac] ss:$16 sps:$4 sm:$0xff]   ;;  %v5267_v49 = vld [vmem:[%s6428_s30 + $0x5a8] ss:$16 sps:$4 sm:$0xff]  }
 0x1f2   : > { %4049 = vmatprep.subr.bf16.mxu1 %v5209_v38  ;;  %v5272_v38 = vld [vmem:[%s6428_s30 + $0x30c] ss:$16 sps:$4 sm:$0xff]  }
 0x1f3   : > { %v3714_v45 = vpop.f32.mrf.mxu0 }
 0x1f4   : > { %v3755_v50 = vpop.f32.mrf.mxu1  ;;  %4000 = vmatmul.mubr.bf16.vlgmr.msra.gmra.mxu1 %v6508_v58  ;;  %4017 = vmatpush1.bf16.msra.mxu0 %v5204_v39  ;;  %v5275_v39 = vld [vmem:[%s6428_s30 + $0x58c] ss:$16 sps:$4 sm:$0xff]  }
 0x1f5   : > { %v6786_v51 = vadd.f32 %v3755_v50, %v3714_v45  ;;  %4050 = vmatpush1.bf16.msra.mxu1 %v5207_v40  ;;  %v3716_v52 = vpop.f32.mrf.mxu0  ;;  %4018 = vmatprep.subr.bf16.mxu0 %v5212_v41  ;;  %v5270_v40 = vld [vmem:[%s6428_s30 + $0x308] ss:$16 sps:$4 sm:$0xff]   ;;  %v5284_v50 = vld [vmem:[%s6428_s30 + $0x54c] ss:$16 sps:$4 sm:$0xff]  }
 0x1f6   : > { %v3757_v53 = vpop.f32.mrf.mxu1  ;;  %4051 = vmatprep.subr.bf16.mxu1 %v5215_v42  ;;  %4081 = vmatprep.mubr.bf16.mxu1 %v6520_v46  ;;  %v5225_v46 = vld [vmem:[%s6428_s30 + $0x488] ss:$16 sps:$4 sm:$0xff]   ;;  %v5278_v42 = vld [vmem:[%s6428_s30 + $0x56c] ss:$16 sps:$4 sm:$0xff]  }
 0x1f7   : > { %v6790_v60 = vadd.f32 %v3757_v53, %v3716_v52  ;;  %v3718_v58 = vpop.f32.mrf.mxu0  ;;  %v5273_v41 = vld [vmem:[%s6428_s30 + $0x588] ss:$16 sps:$4 sm:$0xff]   ;;  %v5287_v52 = vld [vmem:[%s6428_s30 + $0x6cc] ss:$16 sps:$4 sm:$0xff]  }
 0x1f8   : > { %v3759_v0 = vpop.f32.mrf.mxu1  ;;  %4019 = vmatpush1.bf16.msra.mxu0 %v5210_v43  ;;  %v5281_v43 = vld [vmem:[%s6428_s30 + $0x6ec] ss:$16 sps:$4 sm:$0xff]   ;;  %v5279_v45 = vld [vmem:[%s6428_s30 + $0x6e8] ss:$16 sps:$4 sm:$0xff]  }
 0x1f9   : > { %4052 = vmatpush1.bf16.msra.mxu1 %v5213_v44  ;;  %v3719_v1 = vpop.f32.mrf.mxu0  ;;  %4020 = vmatprep.subr.bf16.mxu0 %v5218_v54  ;;  %v5276_v44 = vld [vmem:[%s6428_s30 + $0x568] ss:$16 sps:$4 sm:$0xff]   ;;  %v5296_v58 = vld [vmem:[%s6428_s30 + $0x50c] ss:$16 sps:$4 sm:$0xff]  }
 0x1fa   : > { %v3760_v2 = vpop.f32.mrf.mxu1  ;;  %4053 = vmatprep.subr.bf16.mxu1 %v5221_v55  ;;  %v5282_v53 = vld [vmem:[%s6428_s30 + $0x548] ss:$16 sps:$4 sm:$0xff]   ;;  %v5290_v55 = vld [vmem:[%s6428_s30 + $0x52c] ss:$16 sps:$4 sm:$0xff]  }
 0x1fb   : > { %v5285_v54 = vld [vmem:[%s6428_s30 + $0x6c8] ss:$16 sps:$4 sm:$0xff]   ;;  %v5299_v0 = vld [vmem:[%s6428_s30 + $0x68c] ss:$16 sps:$4 sm:$0xff]  }
 0x1fc   : > { %4021 = vmatpush1.bf16.msra.mxu0 %v5216_v62  ;;  %v5293_v62 = vld [vmem:[%s6428_s30 + $0x6ac] ss:$16 sps:$4 sm:$0xff]   ;;  %v5294_v1 = vld [vmem:[%s6428_s30 + $0x508] ss:$16 sps:$4 sm:$0xff]  }
 0x1fd   : > { %4054 = vmatpush1.bf16.msra.mxu1 %v5219_v63  ;;  %4022 = vmatprep.subr.bf16.mxu0 %v5224_v3  ;;  %v5288_v63 = vld [vmem:[%s6428_s30 + $0x528] ss:$16 sps:$4 sm:$0xff]   ;;  %v5305_v3 = vld [vmem:[%s6428_s30 + $0x8ec] ss:$16 sps:$4 sm:$0xff]  }
 0x1fe   : > { %4055 = vmatprep.subr.bf16.mxu1 %v5227_v6  ;;  %v5297_v2 = vld [vmem:[%s6428_s30 + $0x688] ss:$16 sps:$4 sm:$0xff]  }
 0x1ff   : > { %v5300_v6 = vld [vmem:[%s6428_s30 + $0x668] ss:$16 sps:$4 sm:$0xff]  }
 0x200   : > { %4023 = vmatpush1.bf16.msra.mxu0 %v5222_v7  ;;  %v5303_v7 = vld [vmem:[%s6428_s30 + $0x8e8] ss:$16 sps:$4 sm:$0xff]  }
 0x201   : > { %4056 = vmatpush1.bf16.msra.mxu1 %v5225_v46  ;;  %4024 = vmatprep.subr.bf16.mxu0 %v5230_v57  ;;  %v5308_v46 = vld [vmem:[%s6428_s30 + $0x64c] ss:$16 sps:$4 sm:$0xff]  }
 0x202   : > { %4057 = vmatprep.subr.bf16.mxu1 %v5233_v9  ;;  %v5311_v57 = vld [vmem:[%s6428_s30 + $0x8cc] ss:$16 sps:$4 sm:$0xff]  }
 0x204   : > { %4025 = vmatpush2.bf16.msra.mxu0 %v5228_v12 }
 0x205   : > { %4058 = vmatpush1.bf16.msra.mxu1 %v5231_v13  ;;  %4026 = vmatprep.subr.bf16.mxu0 %v5236_v14  ;;  %v5306_v14 = vld [vmem:[%s6428_s30 + $0x648] ss:$16 sps:$4 sm:$0xff]  }
 0x206   : > { %4059 = vmatprep.subr.bf16.mxu1 %v5239_v15  ;;  %v5309_v15 = vld [vmem:[%s6428_s30 + $0x8c8] ss:$16 sps:$4 sm:$0xff]  }
 0x208   : > { %4027 = vmatpush2.bf16.msra.mxu0 %v5234_v16 }
 0x209   : > { %4060 = vmatpush1.bf16.msra.mxu1 %v5237_v17  ;;  %4028 = vmatprep.subr.bf16.mxu0 %v5242_v18  ;;  %v5314_v18 = vld [vmem:[%s6428_s30 + $0x62c] ss:$16 sps:$4 sm:$0xff]  }
 0x20a   : > { %4061 = vmatprep.subr.bf16.mxu1 %v5245_v19  ;;  %v5317_v19 = vld [vmem:[%s6428_s30 + $0x8ac] ss:$16 sps:$4 sm:$0xff]  }
 0x20c   : > { %4029 = vmatpush2.bf16.msra.mxu0 %v5240_v20 }
 0x20d   : > { %4062 = vmatpush1.bf16.msra.mxu1 %v5243_v23  ;;  %4030 = vmatprep.subr.bf16.mxu0 %v5248_v25 }
 0x20e   : > { %4063 = vmatprep.subr.bf16.mxu1 %v5251_v26  ;;  %v5312_v26 = vld [vmem:[%s6428_s30 + $0x628] ss:$16 sps:$4 sm:$0xff]  }
 0x210   : > { %4031 = vmatpush2.bf16.msra.mxu0 %v5246_v27  ;;  %v5315_v27 = vld [vmem:[%s6428_s30 + $0x8a8] ss:$16 sps:$4 sm:$0xff]  }
 0x211   : > { %4064 = vmatpush1.bf16.msra.mxu1 %v5249_v28  ;;  %4032 = vmatprep.subr.bf16.mxu0 %v5254_v29 }
 0x212   : > { %4065 = vmatprep.subr.bf16.mxu1 %v5257_v30  ;;  %v5318_v30 = vld [vmem:[%s6428_s30 + $0x608] ss:$16 sps:$4 sm:$0xff]  }
 0x214   : > { %4033 = vmatpush2.bf16.msra.mxu0 %v5252_v31  ;;  %v5321_v31 = vld [vmem:[%s6428_s30 + $0x888] ss:$16 sps:$4 sm:$0xff]  }
 0x215   : > { %4066 = vmatpush2.bf16.msra.mxu1 %v5255_v24  ;;  %4034 = vmatprep.subr.bf16.mxu0 %v5260_v32  ;;  %v5326_v24 = vld [vmem:[%s6428_s30 + $0x7ec] ss:$16 sps:$4 sm:$0xff]  }
 0x216   : > { %4067 = vmatprep.subr.bf16.mxu1 %v5263_v33  ;;  %v5329_v32 = vld [vmem:[%s6428_s30 + $0x86c] ss:$16 sps:$4 sm:$0xff]   ;;  %v5324_v33 = vld [vmem:[%s6428_s30 + $0x7e8] ss:$16 sps:$4 sm:$0xff]  }
 0x218   : > { %4035 = vmatpush2.bf16.msra.mxu0 %v5258_v34  ;;  %v5327_v34 = vld [vmem:[%s6428_s30 + $0x868] ss:$16 sps:$4 sm:$0xff]  }
 0x219   : > { %4068 = vmatpush2.bf16.msra.mxu1 %v5261_v35  ;;  %4036 = vmatprep.subr.bf16.mxu0 %v5266_v48  ;;  %v5332_v35 = vld [vmem:[%s6428_s30 + $0x7cc] ss:$16 sps:$4 sm:$0xff]  }
 0x21a   : > { %4069 = vmatprep.subr.bf16.mxu1 %v5269_v36  ;;  %v5335_v48 = vld [vmem:[%s6428_s30 + $0x84c] ss:$16 sps:$4 sm:$0xff]   ;;  %v5330_v36 = vld [vmem:[%s6428_s30 + $0x7c8] ss:$16 sps:$4 sm:$0xff]  }
 0x21c   : > { %4037 = vmatpush2.bf16.msra.mxu0 %v5264_v37  ;;  %v5333_v37 = vld [vmem:[%s6428_s30 + $0x848] ss:$16 sps:$4 sm:$0xff]  }
 0x21d   : > { %4070 = vmatpush2.bf16.msra.mxu1 %v5267_v49  ;;  %4038 = vmatprep.subr.bf16.mxu0 %v5272_v38  ;;  %v5338_v49 = vld [vmem:[%s6428_s30 + $0x7ac] ss:$16 sps:$4 sm:$0xff]  }
 0x21e   : > { %4071 = vmatprep.subr.bf16.mxu1 %v5275_v39  ;;  %v5341_v38 = vld [vmem:[%s6428_s30 + $0x82c] ss:$16 sps:$4 sm:$0xff]   ;;  %v5336_v39 = vld [vmem:[%s6428_s30 + $0x7a8] ss:$16 sps:$4 sm:$0xff]  }
 0x220   : > { %4039 = vmatpush2.bf16.msra.mxu0 %v5270_v40  ;;  %v5339_v40 = vld [vmem:[%s6428_s30 + $0x828] ss:$16 sps:$4 sm:$0xff]  }
 0x221   : > { %4072 = vmatpush2.bf16.msra.mxu1 %v5273_v41  ;;  %4090 = vmatprep.subr.bf16.mxu0 %v5281_v43  ;;  %v5344_v41 = vld [vmem:[%s6428_s30 + $0x78c] ss:$16 sps:$4 sm:$0xff]   ;;  %v5342_v43 = vld [vmem:[%s6428_s30 + $0x788] ss:$16 sps:$4 sm:$0xff]  }
 0x222   : > { %4073 = vmatprep.subr.bf16.mxu1 %v5278_v42  ;;  %v5347_v42 = vld [vmem:[%s6428_s30 + $0x80c] ss:$16 sps:$4 sm:$0xff]  }
 0x223   : > { %4041 = vmatmul.mubr.bf16.vlgmr.msra.gmra.mxu0 %v6512_v59  ;;  %v5291_v59 = vld [vmem:[%s6428_s30 + $0x6a8] ss:$16 sps:$4 sm:$0xff]  }
 0x224   : > { %4091 = vmatpush1.bf16.msra.mxu0 %v5279_v45  ;;  %4122 = vmatprep.mubr.bf16.mxu0 %v6524_v47  ;;  %v5302_v47 = vld [vmem:[%s6428_s30 + $0x66c] ss:$16 sps:$4 sm:$0xff]  }
 0x225   : > { %4074 = vmatpush2.bf16.msra.mxu1 %v5276_v44  ;;  %4092 = vmatprep.subr.bf16.mxu0 %v5287_v52  ;;  %v5345_v44 = vld [vmem:[%s6428_s30 + $0x808] ss:$16 sps:$4 sm:$0xff]   ;;  %v5350_v45 = vld [vmem:[%s6428_s30 + $0x76c] ss:$16 sps:$4 sm:$0xff]  }
 0x226   : > { %4075 = vmatprep.subr.bf16.mxu1 %v5284_v50  ;;  %v5353_v50 = vld [vmem:[%s6428_s30 + $0x9ec] ss:$16 sps:$4 sm:$0xff]   ;;  %v5348_v52 = vld [vmem:[%s6428_s30 + $0x768] ss:$16 sps:$4 sm:$0xff]  }
 0x228   : > { %4093 = vmatpush1.bf16.msra.mxu0 %v5285_v54  ;;  %v5356_v54 = vld [vmem:[%s6428_s30 + $0x74c] ss:$16 sps:$4 sm:$0xff]  }
 0x229   : > { %4076 = vmatpush2.bf16.msra.mxu1 %v5282_v53  ;;  %4094 = vmatprep.subr.bf16.mxu0 %v5293_v62  ;;  %v5351_v53 = vld [vmem:[%s6428_s30 + $0x9e8] ss:$16 sps:$4 sm:$0xff]  }
 0x22a   : > { %4077 = vmatprep.subr.bf16.mxu1 %v5290_v55  ;;  %v5359_v55 = vld [vmem:[%s6428_s30 + $0x9cc] ss:$16 sps:$4 sm:$0xff]   ;;  %v5354_v62 = vld [vmem:[%s6428_s30 + $0x748] ss:$16 sps:$4 sm:$0xff]  }
 0x22c   : > { %4095 = vmatpush1.bf16.msra.mxu0 %v5291_v59  ;;  %v5362_v59 = vld [vmem:[%s6428_s30 + $0x72c] ss:$16 sps:$4 sm:$0xff]  }
 0x22d   : > { %4078 = vmatpush2.bf16.msra.mxu1 %v5288_v63  ;;  %4096 = vmatprep.subr.bf16.mxu0 %v5299_v0  ;;  %v5357_v63 = vld [vmem:[%s6428_s30 + $0x9c8] ss:$16 sps:$4 sm:$0xff]  }
 0x22e   : > { %4079 = vmatprep.subr.bf16.mxu1 %v5296_v58  ;;  %v5365_v58 = vld [vmem:[%s6428_s30 + $0x9ac] ss:$16 sps:$4 sm:$0xff]   ;;  %v5360_v0 = vld [vmem:[%s6428_s30 + $0x728] ss:$16 sps:$4 sm:$0xff]  }
 0x230   : > { %4097 = vmatpush1.bf16.msra.mxu0 %v5297_v2  ;;  %v5368_v2 = vld [vmem:[%s6428_s30 + $0x70c] ss:$16 sps:$4 sm:$0xff]  }
 0x231   : > { %4080 = vmatpush2.bf16.msra.mxu1 %v5294_v1  ;;  %4098 = vmatprep.subr.bf16.mxu0 %v5302_v47  ;;  %v5363_v1 = vld [vmem:[%s6428_s30 + $0x9a8] ss:$16 sps:$4 sm:$0xff]   ;;  %v5371_v47 = vld [vmem:[%s6428_s30 + $0x98c] ss:$16 sps:$4 sm:$0xff]  }
 0x232   : > { %4131 = vmatprep.subr.bf16.mxu1 %v5305_v3  ;;  %v5366_v3 = vld [vmem:[%s6428_s30 + $0x708] ss:$16 sps:$4 sm:$0xff]  }
 0x233   : > { %v3796_v9 = vpop.f32.mrf.mxu0 }
 0x234   : > { %v3837_v12 = vpop.f32.mrf.mxu1  ;;  %4082 = vmatmul.mubr.bf16.vlgmr.msra.gmra.mxu1 %v6592_v4  ;;  %v3797_v13 = vadd.f32 %v3796_v9, %v6786_v51  ;;  %4099 = vmatpush1.bf16.msra.mxu0 %v5300_v6  ;;  %v5369_v6 = vld [vmem:[%s6428_s30 + $0x988] ss:$16 sps:$4 sm:$0xff]  }
 0x235   : > { %4132 = vmatpush1.bf16.msra.mxu1 %v5303_v7  ;;  %v3798_v16 = vpop.f32.mrf.mxu0  ;;  %4100 = vmatprep.subr.bf16.mxu0 %v5308_v46  ;;  %v5374_v7 = vld [vmem:[%s6428_s30 + $0x96c] ss:$16 sps:$4 sm:$0xff]   ;;  %v5375_v9 = vld [vmem:[%s6428_s30 + $0xae8] ss:$16 sps:$4 sm:$0xff]  }
 0x236   : > { %v3839_v17 = vpop.f32.mrf.mxu1  ;;  %4133 = vmatprep.subr.bf16.mxu1 %v5311_v57  ;;  %v6861_v20 = vadd.f32 %v3837_v12, %v3797_v13  ;;  %v3799_v4 = vadd.f32 %v3798_v16, %v6790_v60  ;;  %4163 = vmatprep.mubr.bf16.mxu1 %v6614_v10  ;;  %v5320_v60 = vld [vmem:[%s6428_s30 + $0x60c] ss:$16 sps:$4 sm:$0xff]   ;;  %v5372_v57 = vld [vmem:[%s6428_s30 + $0x968] ss:$16 sps:$4 sm:$0xff]  }
 0x237   : > { %v3800_v51 = vpop.f32.mrf.mxu0  ;;  %v5323_v10 = vld [vmem:[%s6428_s30 + $0x88c] ss:$16 sps:$4 sm:$0xff]  }
 0x238   : > { %v3841_v23 = vpop.f32.mrf.mxu1  ;;  %v6865_v25 = vadd.f32 %v3839_v17, %v3799_v4  ;;  %4101 = vmatpush1.bf16.msra.mxu0 %v5306_v14  ;;  %v5377_v46 = vld [vmem:[%s6428_s30 + $0xaec] ss:$16 sps:$4 sm:$0xff]   ;;  %v5378_v14 = vld [vmem:[%s6428_s30 + $0x948] ss:$16 sps:$4 sm:$0xff]  }
 0x239   : > { %4134 = vmatpush1.bf16.msra.mxu1 %v5309_v15  ;;  %v3801_v28 = vpop.f32.mrf.mxu0  ;;  %4102 = vmatprep.subr.bf16.mxu0 %v5314_v18  ;;  %v5380_v12 = vld [vmem:[%s6428_s30 + $0x94c] ss:$16 sps:$4 sm:$0xff]   ;;  %v5381_v15 = vld [vmem:[%s6428_s30 + $0xac8] ss:$16 sps:$4 sm:$0xff]  }
 0x23a   : > { %v3842_v29 = vpop.f32.mrf.mxu1  ;;  %4135 = vmatprep.subr.bf16.mxu1 %v5317_v19  ;;  %v5383_v13 = vld [vmem:[%s6428_s30 + $0xacc] ss:$16 sps:$4 sm:$0xff]   ;;  %v5384_v18 = vld [vmem:[%s6428_s30 + $0x928] ss:$16 sps:$4 sm:$0xff]  }
 0x23b   : > { %v5386_v16 = vld [vmem:[%s6428_s30 + $0x92c] ss:$16 sps:$4 sm:$0xff]   ;;  %v5390_v51 = vld [vmem:[%s6428_s30 + $0x908] ss:$16 sps:$4 sm:$0xff]  }
 0x23c   : > { %4103 = vmatpush1.bf16.msra.mxu0 %v5312_v26  ;;  %v5389_v17 = vld [vmem:[%s6428_s30 + $0xaac] ss:$16 sps:$4 sm:$0xff]   ;;  %v5393_v23 = vld [vmem:[%s6428_s30 + $0xa88] ss:$16 sps:$4 sm:$0xff]  }
 0x23d   : > { %4136 = vmatpush1.bf16.msra.mxu1 %v5315_v27  ;;  %4104 = vmatprep.subr.bf16.mxu0 %v5320_v60  ;;  %v5392_v19 = vld [vmem:[%s6428_s30 + $0x90c] ss:$16 sps:$4 sm:$0xff]   ;;  %v5396_v27 = vld [vmem:[%s6428_s30 + $0xa68] ss:$16 sps:$4 sm:$0xff]  }
 0x23e   : > { %4137 = vmatprep.subr.bf16.mxu1 %v5323_v10  ;;  %v5395_v4 = vld [vmem:[%s6428_s30 + $0xa8c] ss:$16 sps:$4 sm:$0xff]   ;;  %v5399_v28 = vld [vmem:[%s6428_s30 + $0xce8] ss:$16 sps:$4 sm:$0xff]  }
 0x23f   : > { %v5401_v26 = vld [vmem:[%s6428_s30 + $0xcec] ss:$16 sps:$4 sm:$0xff]  }
 0x240   : > { %4105 = vmatpush1.bf16.msra.mxu0 %v5318_v30  ;;  %v5404_v29 = vld [vmem:[%s6428_s30 + $0xa4c] ss:$16 sps:$4 sm:$0xff]  }
 0x241   : > { %4138 = vmatpush1.bf16.msra.mxu1 %v5321_v31  ;;  %4106 = vmatprep.subr.bf16.mxu0 %v5326_v24  ;;  %v5407_v60 = vld [vmem:[%s6428_s30 + $0xccc] ss:$16 sps:$4 sm:$0xff]   ;;  %v5402_v31 = vld [vmem:[%s6428_s30 + $0xa48] ss:$16 sps:$4 sm:$0xff]  }
 0x242   : > { %4139 = vmatprep.subr.bf16.mxu1 %v5329_v32  ;;  %v5405_v24 = vld [vmem:[%s6428_s30 + $0xcc8] ss:$16 sps:$4 sm:$0xff]  }
 0x244   : > { %4107 = vmatpush2.bf16.msra.mxu0 %v5324_v33 }
 0x245   : > { %4140 = vmatpush1.bf16.msra.mxu1 %v5327_v34  ;;  %4108 = vmatprep.subr.bf16.mxu0 %v5332_v35  ;;  %v5410_v34 = vld [vmem:[%s6428_s30 + $0xa2c] ss:$16 sps:$4 sm:$0xff]  }
 0x246   : > { %4141 = vmatprep.subr.bf16.mxu1 %v5335_v48  ;;  %v5413_v35 = vld [vmem:[%s6428_s30 + $0xcac] ss:$16 sps:$4 sm:$0xff]  }
 0x248   : > { %4109 = vmatpush2.bf16.msra.mxu0 %v5330_v36  ;;  %v5408_v36 = vld [vmem:[%s6428_s30 + $0xa28] ss:$16 sps:$4 sm:$0xff]  }
 0x249   : > { %4142 = vmatpush1.bf16.msra.mxu1 %v5333_v37  ;;  %4110 = vmatprep.subr.bf16.mxu0 %v5338_v49  ;;  %v5411_v37 = vld [vmem:[%s6428_s30 + $0xca8] ss:$16 sps:$4 sm:$0xff]  }
 0x24a   : > { %4143 = vmatprep.subr.bf16.mxu1 %v5341_v38 }
 0x24c   : > { %4111 = vmatpush2.bf16.msra.mxu0 %v5336_v39  ;;  %v5416_v39 = vld [vmem:[%s6428_s30 + $0xa0c] ss:$16 sps:$4 sm:$0xff]  }
 0x24d   : > { %4144 = vmatpush1.bf16.msra.mxu1 %v5339_v40  ;;  %4112 = vmatprep.subr.bf16.mxu0 %v5344_v41  ;;  %v5419_v40 = vld [vmem:[%s6428_s30 + $0xc8c] ss:$16 sps:$4 sm:$0xff]   ;;  %v5417_v41 = vld [vmem:[%s6428_s30 + $0xc88] ss:$16 sps:$4 sm:$0xff]  }
 0x24e   : > { %4145 = vmatprep.subr.bf16.mxu1 %v5347_v42  ;;  %v5422_v42 = vld [vmem:[%s6428_s30 + $0xbec] ss:$16 sps:$4 sm:$0xff]  }
 0x250   : > { %4113 = vmatpush2.bf16.msra.mxu0 %v5342_v43  ;;  %v5425_v43 = vld [vmem:[%s6428_s30 + $0xc6c] ss:$16 sps:$4 sm:$0xff]  }
 0x251   : > { %4146 = vmatpush1.bf16.msra.mxu1 %v5345_v44  ;;  %4114 = vmatprep.subr.bf16.mxu0 %v5350_v45  ;;  %v5420_v44 = vld [vmem:[%s6428_s30 + $0xbe8] ss:$16 sps:$4 sm:$0xff]  }
 0x252   : > { %4147 = vmatprep.subr.bf16.mxu1 %v5353_v50  ;;  %v5423_v45 = vld [vmem:[%s6428_s30 + $0xc68] ss:$16 sps:$4 sm:$0xff]   ;;  %v5428_v50 = vld [vmem:[%s6428_s30 + $0xbcc] ss:$16 sps:$4 sm:$0xff]  }
 0x254   : > { %4115 = vmatpush2.bf16.msra.mxu0 %v5348_v52  ;;  %v5431_v52 = vld [vmem:[%s6428_s30 + $0xc4c] ss:$16 sps:$4 sm:$0xff]  }
 0x255   : > { %4148 = vmatpush2.bf16.msra.mxu1 %v5351_v53  ;;  %4116 = vmatprep.subr.bf16.mxu0 %v5356_v54  ;;  %v5426_v53 = vld [vmem:[%s6428_s30 + $0xbc8] ss:$16 sps:$4 sm:$0xff]  }
 0x256   : > { %4149 = vmatprep.subr.bf16.mxu1 %v5359_v55  ;;  %v5429_v54 = vld [vmem:[%s6428_s30 + $0xc48] ss:$16 sps:$4 sm:$0xff]   ;;  %v5434_v55 = vld [vmem:[%s6428_s30 + $0xbac] ss:$16 sps:$4 sm:$0xff]  }
 0x258   : > { %4117 = vmatpush2.bf16.msra.mxu0 %v5354_v62  ;;  %v5437_v62 = vld [vmem:[%s6428_s30 + $0xc2c] ss:$16 sps:$4 sm:$0xff]  }
 0x259   : > { %4150 = vmatpush2.bf16.msra.mxu1 %v5357_v63  ;;  %4118 = vmatprep.subr.bf16.mxu0 %v5362_v59  ;;  %v1461_v63 = vld [vmem:[%s6428_s30 + $0xd68] sm:$0x33] }
 0x25a   : > { %4151 = vmatprep.subr.bf16.mxu1 %v5365_v58  ;;  %v5432_v59 = vld [vmem:[%s6428_s30 + $0xba8] ss:$16 sps:$4 sm:$0xff]  }
 0x25b   : > { %v5435_v58 = vld [vmem:[%s6428_s30 + $0xc28] ss:$16 sps:$4 sm:$0xff]  }
 0x25c   : > { %4119 = vmatpush2.bf16.msra.mxu0 %v5360_v0  ;;  %v5440_v0 = vld [vmem:[%s6428_s30 + $0xb8c] ss:$16 sps:$4 sm:$0xff]  }
 0x25d   : > { %4152 = vmatpush2.bf16.msra.mxu1 %v5363_v1  ;;  %4120 = vmatprep.subr.bf16.mxu0 %v5368_v2  ;;  %v5443_v1 = vld [vmem:[%s6428_s30 + $0xc0c] ss:$16 sps:$4 sm:$0xff]   ;;  %v4774_v2 = vcombine.high %v1461_v63, %v1461_v63 }
 0x25e   : > { %4153 = vmatprep.subr.bf16.mxu1 %v5371_v47  ;;  %v5438_v47 = vld [vmem:[%s6428_s30 + $0xb88] ss:$16 sps:$4 sm:$0xff]  }
 0x260   : > { %4121 = vmatpush2.bf16.msra.mxu0 %v5366_v3  ;;  %v5441_v3 = vld [vmem:[%s6428_s30 + $0xc08] ss:$16 sps:$4 sm:$0xff]  }
 0x261   : > { %4154 = vmatpush2.bf16.msra.mxu1 %v5369_v6  ;;  %4172 = vmatprep.subr.bf16.mxu0 %v5377_v46  ;;  %v4773_v6 = vcombine.low %v1461_v63, %v1461_v63  ;;  %v3678_v46 = vand.u32 %v4774_v2, %v6735_v61 }
 0x262   : > { %4155 = vmatprep.subr.bf16.mxu1 %v5374_v7  ;;  %v5446_v7 = vld [vmem:[%s6428_s30 + $0xb6c] ss:$16 sps:$4 sm:$0xff]  }
 0x263   : > { %4123 = vmatmul.mubr.bf16.vlgmr.msra.gmra.mxu0 %v6596_v5  ;;  %v5387_v5 = vld [vmem:[%s6428_s30 + $0xaa8] ss:$16 sps:$4 sm:$0xff]  }
 0x264   : > { %4173 = vmatpush1.bf16.msra.mxu0 %v5375_v9  ;;  %4204 = vmatprep.mubr.bf16.mxu0 %v6618_v11  ;;  %v5398_v11 = vld [vmem:[%s6428_s30 + $0xa6c] ss:$16 sps:$4 sm:$0xff]   ;;  %v3675_v9 = vand.u32 %v4773_v6, %v6735_v61  ;;  %v5455_v61 = vld [vmem:[%s6428_s30 + $0xb28] ss:$16 sps:$4 sm:$0xff]  }
 0x265   : > { %4156 = vmatpush2.bf16.msra.mxu1 %v5372_v57  ;;  %4174 = vmatprep.subr.bf16.mxu0 %v5383_v13  ;;  %v5444_v57 = vld [vmem:[%s6428_s30 + $0xb68] ss:$16 sps:$4 sm:$0xff]   ;;  %v5454_v13 = vld [vmem:[%s6428_s30 + $0xd4c] ss:$16 sps:$4 sm:$0xff]  }
 0x266   : > { %4157 = vmatprep.subr.bf16.mxu1 %v5380_v12  ;;  %v5451_v12 = vld [vmem:[%s6428_s30 + $0xb4c] ss:$16 sps:$4 sm:$0xff]  }
 0x268   : > { %4175 = vmatpush1.bf16.msra.mxu0 %v5381_v15  ;;  %v5452_v15 = vld [vmem:[%s6428_s30 + $0xd48] ss:$16 sps:$4 sm:$0xff]  }
 0x269   : > { %4158 = vmatpush2.bf16.msra.mxu1 %v5378_v14  ;;  %4176 = vmatprep.subr.bf16.mxu0 %v5389_v17  ;;  %v5449_v14 = vld [vmem:[%s6428_s30 + $0xb48] ss:$16 sps:$4 sm:$0xff]   ;;  %v5460_v17 = vld [vmem:[%s6428_s30 + $0xd2c] ss:$16 sps:$4 sm:$0xff]  }
 0x26a   : > { %4159 = vmatprep.subr.bf16.mxu1 %v5386_v16  ;;  %v5457_v16 = vld [vmem:[%s6428_s30 + $0xb2c] ss:$16 sps:$4 sm:$0xff]  }
 0x26c   : > { %4177 = vmatpush1.bf16.msra.mxu0 %v5387_v5  ;;  %v5463_v5 = vld [vmem:[%s6428_s30 + $0xb0c] ss:$16 sps:$4 sm:$0xff]  }
 0x26d   : > { %4160 = vmatpush2.bf16.msra.mxu1 %v5384_v18  ;;  %4178 = vmatprep.subr.bf16.mxu0 %v5395_v4  ;;  %v5458_v18 = vld [vmem:[%s6428_s30 + $0xd28] ss:$16 sps:$4 sm:$0xff]  }
 0x26e   : > { %4161 = vmatprep.subr.bf16.mxu1 %v5392_v19  ;;  %v5466_v19 = vld [vmem:[%s6428_s30 + $0xd0c] ss:$16 sps:$4 sm:$0xff]   ;;  %v5461_v4 = vld [vmem:[%s6428_s30 + $0xb08] ss:$16 sps:$4 sm:$0xff]  }
 0x270   : > { %4179 = vmatpush1.bf16.msra.mxu0 %v5393_v23 }
 0x271   : > { %4162 = vmatpush2.bf16.msra.mxu1 %v5390_v51  ;;  %4180 = vmatprep.subr.bf16.mxu0 %v5398_v11  ;;  %v5464_v51 = vld [vmem:[%s6428_s30 + $0xd08] ss:$16 sps:$4 sm:$0xff]  }
 0x272   : > { %4213 = vmatprep.subr.bf16.mxu1 %v5401_v26 }
 0x273   : > { %v6929_v10 = vpop.f32.mrf.mxu0 }
 0x274   : > { %v6931_v30 = vpop.f32.mrf.mxu1  ;;  %4164 = vmatmul.mubr.bf16.vlgmr.msra.gmra.mxu1 %v6687_v21  ;;  %4181 = vmatpush1.bf16.msra.mxu0 %v5396_v27  ;;  %v3879_v23 = vadd.f32 %v6929_v10, %v6861_v20 }
 0x275   : > { %4214 = vmatpush1.bf16.msra.mxu1 %v5399_v28  ;;  %v6936_v32 = vpop.f32.mrf.mxu0  ;;  %4182 = vmatprep.subr.bf16.mxu0 %v5404_v29 }
 0x276   : > { %v6938_v33 = vpop.f32.mrf.mxu1  ;;  %4215 = vmatprep.subr.bf16.mxu1 %v5407_v60  ;;  %4776 = vmatprep.mubr.msk.bf16.mxu1 %vm3660_vm0, %v6703_v56  ;;  %v5414_v56 = vld [vmem:[%s6428_s30 + $0xa08] ss:$16 sps:$4 sm:$0xff]   ;;  %v3881_v11 = vadd.f32 %v6936_v32, %v6865_v25  ;;  %v3920_v26 = vadd.f32 %v6931_v30, %v3879_v23 }
 0x277   : > { %v3882_v21 = vpop.f32.mrf.mxu0 }
 0x278   : > { %v3923_v48 = vpop.f32.mrf.mxu1  ;;  %4183 = vmatpush1.bf16.msra.mxu0 %v5402_v31  ;;  %v3922_v20 = vadd.f32 %v6938_v33, %v3881_v11 }
 0x279   : > { %4216 = vmatpush1.bf16.msra.mxu1 %v5405_v24  ;;  %v3883_v49 = vpop.f32.mrf.mxu0  ;;  %4184 = vmatprep.subr.bf16.mxu0 %v5410_v34 }
 0x27a   : > { %v3924_v38 = vpop.f32.mrf.mxu1  ;;  %4217 = vmatprep.subr.bf16.mxu1 %v5413_v35 }
 0x27c   : > { %4185 = vmatpush1.bf16.msra.mxu0 %v5408_v36 }
 0x27d   : > { %4218 = vmatpush1.bf16.msra.mxu1 %v5411_v37  ;;  %4186 = vmatprep.subr.bf16.mxu0 %v5416_v39 }
 0x27e   : > { %4219 = vmatprep.subr.bf16.mxu1 %v5419_v40 }
 0x280   : > { %4187 = vmatpush1.bf16.msra.mxu0 %v5414_v56 }
 0x281   : > { %4220 = vmatpush1.bf16.msra.mxu1 %v5417_v41  ;;  %4188 = vmatprep.subr.bf16.mxu0 %v5422_v42 }
 0x282   : > { %4221 = vmatprep.subr.bf16.mxu1 %v5425_v43 }
 0x284   : > { %4189 = vmatpush2.bf16.msra.mxu0 %v5420_v44 }
 0x285   : > { %4222 = vmatpush1.bf16.msra.mxu1 %v5423_v45  ;;  %4190 = vmatprep.subr.bf16.mxu0 %v5428_v50 }
 0x286   : > { %4223 = vmatprep.subr.bf16.mxu1 %v5431_v52 }
 0x288   : > { %4191 = vmatpush2.bf16.msra.mxu0 %v5426_v53 }
 0x289   : > { %4224 = vmatpush1.bf16.msra.mxu1 %v5429_v54  ;;  %4192 = vmatprep.subr.bf16.mxu0 %v5434_v55 }
 0x28a   : > { %4225 = vmatprep.subr.bf16.mxu1 %v5437_v62 }
 0x28c   : > { %4193 = vmatpush2.bf16.msra.mxu0 %v5432_v59 }
 0x28d   : > { %4226 = vmatpush1.bf16.msra.mxu1 %v5435_v58  ;;  %4194 = vmatprep.subr.bf16.mxu0 %v5440_v0 }
 0x28e   : > { %4227 = vmatprep.subr.bf16.mxu1 %v5443_v1 }
 0x290   : > { %4195 = vmatpush2.bf16.msra.mxu0 %v5438_v47 }
 0x291   : > { %4228 = vmatpush1.bf16.msra.mxu1 %v5441_v3  ;;  %4196 = vmatprep.subr.bf16.mxu0 %v5446_v7 }
 0x292   : > { %4237 = vmatprep.subr.bf16.mxu1 %v3678_v46 }
 0x294   : > { %4197 = vmatpush2.bf16.msra.mxu0 %v5444_v57 }
 0x295   : > { %4238 = vmatpush2.bf16.msra.mxu1 %v3675_v9  ;;  %4198 = vmatprep.subr.bf16.mxu0 %v5451_v12 }
 0x296   : > { %4239 = vmatprep.subr.bf16.mxu1 %v5454_v13 }
 0x298   : > { %4199 = vmatpush2.bf16.msra.mxu0 %v5449_v14 }
 0x299   : > { %4240 = vmatpush2.bf16.msra.mxu1 %v5452_v15  ;;  %4200 = vmatprep.subr.bf16.mxu0 %v5457_v16 }
 0x29a   : > { %4241 = vmatprep.subr.bf16.mxu1 %v5460_v17 }
 0x29c   : > { %4201 = vmatpush2.bf16.msra.mxu0 %v5455_v61 }
 0x29d   : > { %4242 = vmatpush2.bf16.msra.mxu1 %v5458_v18  ;;  %4202 = vmatprep.subr.bf16.mxu0 %v5463_v5 }
 0x29e   : > { %4243 = vmatprep.subr.bf16.mxu1 %v5466_v19 }
 0x2a0   : > { %4203 = vmatpush2.bf16.msra.mxu0 %v5461_v4 }
 0x2a1   : > { %4244 = vmatpush2.bf16.msra.mxu1 %v5464_v51 }
 0x2a3   : > { %v3960_v27 = vpop.f32.mrf.mxu0  ;;  %4205 = vmatmul.mubr.bf16.vlgmr.msra.gmra.mxu0 %v6691_v22 }
 0x2a4   : > { %4246 = vmatmul.mubr.bf16.vlgmr.msra.gmra.mxu1 %v6759_v8  ;;  %v3961_v25 = vadd.f32 %v3960_v27, %v3920_v26 }
 0x2a5   : > { %v3962_v28 = vpop.f32.mrf.mxu0 }
 0x2a6   : > { %4254 = vst [vmem:[%s6993_s20] sm:$0xff] %v3961_v25  ;;  %v3963_v29 = vadd.f32 %v3962_v28, %v3922_v20 }
 0x2a7   : > { %v3964_v60 = vpop.f32.mrf.mxu0 }
 0x2a8   : > { %4255 = vst [vmem:[%s6993_s20 + $0x8] sm:$0xff] %v3963_v29 }
 0x2a9   : > { %v3965_v10 = vpop.f32.mrf.mxu0 }
 0x2b4   : > { %v4001_v30 = vpop.f32.mrf.mxu1 }
 0x2b6   : > { %v4003_v31 = vpop.f32.mrf.mxu1 }
 0x2b8   : > { %v4005_v24 = vpop.f32.mrf.mxu1 }
 0x2ba   : > { %v4006_v32 = vpop.f32.mrf.mxu1 }
 0x2e3   : > { %v4042_v34 = vpop.f32.mrf.mxu0 }
 0x2e4   : > { %v4043_v35 = vadd.f32 %v4042_v34, %v4001_v30 }
 0x2e5   : > { %v4044_v21 = vpop.f32.mrf.mxu0 }
 0x2e6   : > { %v4045_v48 = vadd.f32 %v4044_v21, %v4003_v31 }
 0x2e7   : > { %v4046_v22 = vpop.f32.mrf.mxu0 }
 0x2e9   : > { %v4047_v36 = vpop.f32.mrf.mxu0 }
 0x2f4   : > { %v4083_v8 = vpop.f32.mrf.mxu1 }
 0x2f5   : > { %v4084_v37 = vadd.f32 %v4083_v8, %v4043_v35 }
 0x2f6   : > { %v4085_v33 = vpop.f32.mrf.mxu1 }
 0x2f7   : > { %v4086_v49 = vadd.f32 %v4085_v33, %v4045_v48 }
 0x2f8   : > { %v4087_v38 = vpop.f32.mrf.mxu1 }
 0x2fa   : > { %v4088_v39 = vpop.f32.mrf.mxu1 }
 0x323   : > { %v4124_v40 = vpop.f32.mrf.mxu0 }
 0x324   : > { %v4125_v52 = vadd.f32 %v4124_v40, %v4084_v37 }
 0x325   : > { %v4126_v56 = vpop.f32.mrf.mxu0 }
 0x326   : > { %v4127_v53 = vadd.f32 %v4126_v56, %v4086_v49 }
 0x327   : > { %v4128_v41 = vpop.f32.mrf.mxu0 }
 0x329   : > { %v4129_v42 = vpop.f32.mrf.mxu0 }
 0x334   : > { %v4165_v43 = vpop.f32.mrf.mxu1 }
 0x335   : > { %v4166_v54 = vadd.f32 %v4165_v43, %v4125_v52 }
 0x336   : > { %v4167_v44 = vpop.f32.mrf.mxu1 }
 0x337   : > { %v4168_v63 = vadd.f32 %v4167_v44, %v4127_v53 }
 0x338   : > { %v4169_v45 = vpop.f32.mrf.mxu1 }
 0x33a   : > { %v4170_v50 = vpop.f32.mrf.mxu1 }
 0x363   : > { %v4206_v55 = vpop.f32.mrf.mxu0 }
 0x364   : > { %v4247_v62 = vpop.f32.mrf.mxu1  ;;  %v4207_v59 = vadd.f32 %v4206_v55, %v4166_v54 }
 0x365   : > { %v4208_v58 = vpop.f32.mrf.mxu0 }
 0x366   : > { %v4249_v0 = vpop.f32.mrf.mxu1  ;;  %v4248_v1 = vadd.f32 %v4247_v62, %v4207_v59  ;;  %v4209_v2 = vadd.f32 %v4208_v58, %v4168_v63 }
 0x367   : > { %v4210_v47 = vpop.f32.mrf.mxu0 }
 0x368   : > { %v4251_v3 = vpop.f32.mrf.mxu1  ;;  %4256 = vst [vmem:[%s6993_s20 + $0x10] sm:$0xff] %v4248_v1  ;;  %v4250_v6 = vadd.f32 %v4249_v0, %v4209_v2 }
 0x369   : > { %v4211_v7 = vpop.f32.mrf.mxu0 }
 0x36a   : > { %v4252_v46 = vpop.f32.mrf.mxu1  ;;  %4257 = vst [vmem:[%s6993_s20 + $0x18] sm:$0xff] %v4250_v6 }
 0x36b PF: > { %p9_p9 = scmp.ge.s32.totalorder %s5524_s13, 4   ;;  %s7015_s9 = smov %s5485_s10 }
 0x36c   : > { %s7016_s10 = smov %s5533_s16  ;;  %s7017_s11 = smov %s5524_s13 }
 0x36d   :  { %11 = sbr.rel (!%p9_p9) target bundleno = 2 (0x2), region = 86 }

</bundles_post_ra>
